<compile_context>
chip_gen: v6e
topology: v6e:2x2x1
jax: 0.10.0
libtpu: 0.0.40
codegen_flags: <defaults>
</compile_context>

<pallas_src>
import functools

import jax
import jax.numpy as jnp
from jax.experimental import pallas as pl
from jax.experimental.pallas import tpu as pltpu


# ----------------------------------------------------------------------------
# Pallas kernels
# ----------------------------------------------------------------------------
def _conv1_pool_kernel(p_ref, w_ref, b_ref, o_ref):
    """p:(4, QB, K) corner-major patches -> o:(QB, 128) pooled relu(conv1)."""
    w = w_ref[...]
    b = b_ref[...]
    acc = jnp.zeros(o_ref.shape, jnp.float32)
    for c in range(4):  # 4 corners of each 2x2 pooling window
        h = jnp.dot(p_ref[c], w, preferred_element_type=jnp.float32)
        acc = acc + jnp.maximum(h + b, 0.0)
    o_ref[...] = acc * 0.25


def _conv2_pool_fc_kernel(p_ref, w2_ref, b2_ref, wf1_ref, bf1_ref,
                          wf2_ref, bf2_ref, wf3_ref, bf3_ref, o_ref):
    """conv2 + ReLU + AvgPool2x2 + fc1/ReLU/fc2/ReLU/fc3, all in VMEM.

    p:(4, 25*8, 160) patches, rows ordered (corner, spatial, batch_pad8).
    wf1:(25, 128, 128) = per-spatial-position fc1 weight blocks.
    o:(8, 128) logits (rows = padded batch, lanes = 10 classes + pad).
    """
    q = p_ref.shape[1]            # 25 spatial positions * 8 padded batch rows
    n_spatial = q // 8
    w2 = w2_ref[...]
    b2 = b2_ref[...]

    # conv2 + bias + ReLU, pooled over the 4 window corners.
    pooled = jnp.zeros((q, 128), jnp.float32)
    for c in range(4):
        h = jnp.dot(p_ref[c], w2, preferred_element_type=jnp.float32)
        pooled = pooled + jnp.maximum(h + b2, 0.0)
    pooled = pooled * 0.25

    # fc1 as a sum over spatial positions: (8,128) @ (128,128) per position.
    acc = jnp.zeros((8, 128), jnp.float32)
    for s in range(n_spatial):
        ps = pooled[s * 8:(s + 1) * 8, :].astype(jnp.bfloat16)
        acc = acc + jnp.dot(ps, wf1_ref[s], preferred_element_type=jnp.float32)
    h1 = jnp.maximum(acc + bf1_ref[...], 0.0).astype(jnp.bfloat16)

    h2 = jnp.dot(h1, wf2_ref[...], preferred_element_type=jnp.float32) + bf2_ref[...]
    h2 = jnp.maximum(h2, 0.0).astype(jnp.bfloat16)

    o_ref[...] = (jnp.dot(h2, wf3_ref[...], preferred_element_type=jnp.float32)
                  + bf3_ref[...])


# ----------------------------------------------------------------------------
# Pallas wrappers
# ----------------------------------------------------------------------------
def _row_block(q, cap=256):
    """Largest multiple-of-8 divisor of q that is <= cap (q itself if none)."""
    best = None
    b = 8
    while b <= min(q, cap):
        if q % b == 0:
            best = b
        b += 8
    return best if best is not None else q


def conv1_pool1(p1, w1m, b1):
    """p1:(4, Q, K) bf16 corner-major conv1 patches -> (Q, 128) f32 pooled."""
    _, q, k = p1.shape
    qb = _row_block(q)
    return pl.pallas_call(
        _conv1_pool_kernel,
        out_shape=jax.ShapeDtypeStruct((q, 128), jnp.float32),
        grid=(q // qb,),
        in_specs=[
            pl.BlockSpec((4, qb, k), lambda i: (0, i, 0)),
            pl.BlockSpec((k, 128), lambda i: (0, 0)),
            pl.BlockSpec((1, 128), lambda i: (0, 0)),
        ],
        out_specs=pl.BlockSpec((qb, 128), lambda i: (i, 0)),
        compiler_params=pltpu.CompilerParams(
            dimension_semantics=("parallel",)),
    )(p1, w1m, b1)


def conv2_pool2_fc(p2, w2m, b2, wf1, bf1, wf2, bf2, wf3, bf3):
    """Fused conv2+pool2+fc1+fc2+fc3; returns (8, 128) f32 logits."""
    return pl.pallas_call(
        _conv2_pool_fc_kernel,
        out_shape=jax.ShapeDtypeStruct((8, 128), jnp.float32),
        grid=(1,),
        in_specs=[
            pl.BlockSpec(p2.shape, lambda i: (0, 0, 0)),
            pl.BlockSpec(w2m.shape, lambda i: (0, 0)),
            pl.BlockSpec(b2.shape, lambda i: (0, 0)),
            pl.BlockSpec(wf1.shape, lambda i: (0, 0, 0)),
            pl.BlockSpec(bf1.shape, lambda i: (0, 0)),
            pl.BlockSpec(wf2.shape, lambda i: (0, 0)),
            pl.BlockSpec(bf2.shape, lambda i: (0, 0)),
            pl.BlockSpec(wf3.shape, lambda i: (0, 0)),
            pl.BlockSpec(bf3.shape, lambda i: (0, 0)),
        ],
        out_specs=pl.BlockSpec((8, 128), lambda i: (0, 0)),
        compiler_params=pltpu.CompilerParams(
            dimension_semantics=("arbitrary",)),
    )(p2, w2m, b2, wf1, bf1, wf2, bf2, wf3, bf3)


# ----------------------------------------------------------------------------
# One-time weight preprocessing (hoisted out of the jitted forward)
# ----------------------------------------------------------------------------
def prepare_params(params):
    # conv1: (6,1,5,5) -> (ki,kj,ci,co) -> (25,6), K pad 25->32, lanes 6->128.
    w1m = params["conv1_w"].transpose(2, 3, 1, 0).reshape(25, 6)
    w1m = jnp.pad(w1m, ((0, 7), (0, 122))).astype(jnp.bfloat16)
    b1 = jnp.pad(params["conv1_b"], (0, 122)).reshape(1, 128).astype(jnp.float32)

    # conv2: (16,6,5,5) -> (ki,kj,ci,co) -> (150,16), pad -> (160,128).
    w2m = params["conv2_w"].transpose(2, 3, 1, 0).reshape(150, 16)
    w2m = jnp.pad(w2m, ((0, 10), (0, 112))).astype(jnp.bfloat16)
    b2 = jnp.pad(params["conv2_b"], (0, 112)).reshape(1, 128).astype(jnp.float32)

    # fc1: (120,400) with PyTorch (C,H,W) flatten order -> per-spatial blocks
    # (25, 16, 120) so fc1 = sum_s pooled_s @ wf1[s]; pad -> (25,128,128).
    wf1 = (params["fc1_w"].reshape(120, 16, 5, 5)
           .transpose(2, 3, 1, 0).reshape(25, 16, 120))
    wf1 = jnp.pad(wf1, ((0, 0), (0, 112), (0, 8))).astype(jnp.bfloat16)
    bf1 = jnp.pad(params["fc1_b"], (0, 8)).reshape(1, 128).astype(jnp.float32)

    wf2 = jnp.pad(params["fc2_w"].T, ((0, 8), (0, 44))).astype(jnp.bfloat16)
    bf2 = jnp.pad(params["fc2_b"], (0, 44)).reshape(1, 128).astype(jnp.float32)

    wf3 = jnp.pad(params["fc3_w"].T, ((0, 44), (0, 118))).astype(jnp.bfloat16)
    bf3 = jnp.pad(params["fc3_b"], (0, 118)).reshape(1, 128).astype(jnp.float32)

    return {"w1m": w1m, "b1": b1, "w2m": w2m, "b2": b2,
            "wf1": wf1, "bf1": bf1, "wf2": wf2, "bf2": bf2,
            "wf3": wf3, "bf3": bf3}


# ----------------------------------------------------------------------------
# Forward pass (Pallas kernels + thin im2col glue)
# ----------------------------------------------------------------------------
def lenet_forward(prep, x):
    n = x.shape[0]
    assert n <= 8, "FC tail pads batch to 8; use batch <= 8 here."

    # ---- conv1 im2col: rows ordered (pool corner, n, i, j) --------------------
    # padded input (n,32,32); conv output pixel (2i+di, 2j+dj) -> corner di*2+dj
    xp = jnp.pad(x[:, 0], ((0, 0), (2, 2), (2, 2)))
    cols = [xp[:, ki:ki + 28, kj:kj + 28] for ki in range(5) for kj in range(5)]
    p1 = jnp.stack(cols, axis=-1)                                  # (n,28,28,25)
    p1 = (p1.reshape(n, 14, 2, 14, 2, 25)
            .transpose(2, 4, 0, 1, 3, 5)                           # (di,dj,n,i,j,k)
            .reshape(4, n * 196, 25))
    p1 = jnp.pad(p1, ((0, 0), (0, 0), (0, 7))).astype(jnp.bfloat16)  # (4, Q, 32)

    a1 = conv1_pool1(p1, prep["w1m"], prep["b1"])                  # (n*196, 128)

    # ---- conv2 im2col on pooled1: rows ordered (corner, spatial, batch_pad8) --
    pooled1 = a1[:, :6].reshape(n, 14, 14, 6)
    cols2 = [pooled1[:, ki:ki + 10, kj:kj + 10, :]
             for ki in range(5) for kj in range(5)]
    p2 = jnp.stack(cols2, axis=3)                                  # (n,10,10,25,6)
    p2 = (p2.reshape(n, 5, 2, 5, 2, 150)
            .transpose(2, 4, 1, 3, 0, 5)                           # (di,dj,i,j,n,K)
            .reshape(4, 25, n, 150))
    p2 = jnp.pad(p2, ((0, 0), (0, 0), (0, 8 - n), (0, 10)))
    p2 = p2.reshape(4, 200, 160).astype(jnp.bfloat16)

    out = conv2_pool2_fc(p2, prep["w2m"], prep["b2"],
                         prep["wf1"], prep["bf1"],
                         prep["wf2"], prep["bf2"],
                         prep["wf3"], prep["bf3"])                 # (8, 128)
    return out[:n, :10]


# ----------------------------------------------------------------------------
# Pure-JAX reference (f32) and synthetic parameters (PyTorch layouts)
# ----------------------------------------------------------------------------
def lenet_reference(params, x):
    h = jax.lax.conv_general_dilated(
        x, params["conv1_w"], window_strides=(1, 1), padding=((2, 2), (2, 2)),
        dimension_numbers=("NCHW", "OIHW", "NCHW"))
    h = jax.nn.relu(h + params["conv1_b"][None, :, None, None])
    n, c, hh, ww = h.shape
    h = h.reshape(n, c, hh // 2, 2, ww // 2, 2).mean(axis=(3, 5))
    h = jax.lax.conv_general_dilated(
        h, params["conv2_w"], window_strides=(1, 1), padding=((0, 0), (0, 0)),
        dimension_numbers=("NCHW", "OIHW", "NCHW"))
    h = jax.nn.relu(h + params["conv2_b"][None, :, None, None])
    n, c, hh, ww = h.shape
    h = h.reshape(n, c, hh // 2, 2, ww // 2, 2).mean(axis=(3, 5))
    h = h.reshape(n, -1)
    h = jax.nn.relu(h @ params["fc1_w"].T + params["fc1_b"])
    h = jax.nn.relu(h @ params["fc2_w"].T + params["fc2_b"])
    return h @ params["fc3_w"].T + params["fc3_b"]


def init_lenet_params(key):
    def dense(k, shape, fan_in):
        return (jax.random.normal(k, shape, jnp.float32)
                * (1.0 / jnp.sqrt(jnp.float32(fan_in))))

    ks = jax.random.split(key, 10)
    return {
        "conv1_w": dense(ks[0], (6, 1, 5, 5), 1 * 5 * 5),
        "conv1_b": dense(ks[1], (6,), 1 * 5 * 5),
        "conv2_w": dense(ks[2], (16, 6, 5, 5), 6 * 5 * 5),
        "conv2_b": dense(ks[3], (16,), 6 * 5 * 5),
        "fc1_w": dense(ks[4], (120, 400), 400),   # PyTorch Linear: (out, in)
        "fc1_b": dense(ks[5], (120,), 400),
        "fc2_w": dense(ks[6], (84, 120), 120),
        "fc2_b": dense(ks[7], (84,), 120),
        "fc3_w": dense(ks[8], (10, 84), 84),
        "fc3_b": dense(ks[9], (10,), 84),
    }


if __name__ == "__main__":
    key = jax.random.PRNGKey(0)
    k_param, k_x = jax.random.split(key)
    params = init_lenet_params(k_param)
    # 28x28 input is required by the module (flatten -> 16*5*5 = 400).
    x = jax.random.normal(k_x, (2, 1, 28, 28), jnp.float32)

    prep = prepare_params(params)          # one-time, outside the jitted forward
    out = jax.jit(lenet_forward)(prep, x)
    out = jax.block_until_ready(out)
    assert out.shape == (2, 10) and out.dtype == jnp.float32

    ref = jax.block_until_ready(jax.jit(lenet_reference)(params, x))
    if not jnp.allclose(out, ref, atol=5e-2, rtol=5e-2):
        max_err = float(jnp.max(jnp.abs(out - ref)))
        raise AssertionError(f"mismatch vs f32 reference, max abs err {max_err}")
    print("KERNEL_OK")
</pallas_src>

<mosaic_0001>
module attributes {stable_mosaic.version = 11 : i64} {
  func.func @_conv1_pool_kernel(%arg0: i32, %arg1: memref<4x56x32xbf16, #tpu.memory_space<vmem>>, %arg2: memref<32x128xbf16, #tpu.memory_space<vmem>>, %arg3: memref<1x128xf32, #tpu.memory_space<vmem>>, %arg4: memref<56x128xf32, #tpu.memory_space<vmem>>) attributes {dimension_semantics = [#tpu.dimension_semantics<parallel>], iteration_bounds = array<i64: 7>, scalar_prefetch = 0 : i64, scratch_operands = 0 : i64, tpu.core_type = #tpu.core_type<tc>, window_params = [{transform_indices = @transform_0, window_bounds = array<i64: 4, 56, 32>}, {pipeline_mode = #tpu.pipeline_mode<synchronous>, transform_indices = @transform_1, window_bounds = array<i64: 32, 128>}, {pipeline_mode = #tpu.pipeline_mode<synchronous>, transform_indices = @transform_2, window_bounds = array<i64: 1, 128>}, {transform_indices = @transform_3, window_bounds = array<i64: 56, 128>}]} {
    %c0 = arith.constant 0 : index
    %c0_0 = arith.constant 0 : index
    %0 = vector.load %arg2[%c0, %c0_0] : memref<32x128xbf16, #tpu.memory_space<vmem>>, vector<32x128xbf16>
    %c0_1 = arith.constant 0 : index
    %c0_2 = arith.constant 0 : index
    %1 = vector.load %arg3[%c0_1, %c0_2] : memref<1x128xf32, #tpu.memory_space<vmem>>, vector<1x128xf32>
    %cst = arith.constant 0.000000e+00 : f32
    %2 = vector.broadcast %cst : f32 to vector<56x128xf32>
    %c0_3 = arith.constant 0 : index
    %c0_4 = arith.constant 0 : index
    %c0_5 = arith.constant 0 : index
    %3 = vector.load %arg1[%c0_3, %c0_4, %c0_5] : memref<4x56x32xbf16, #tpu.memory_space<vmem>>, vector<1x56x32xbf16>
    %4 = vector.shape_cast %3 : vector<1x56x32xbf16> to vector<56x32xbf16>
    %cst_6 = arith.constant dense<0.000000e+00> : vector<56x128xf32>
    %5 = tpu.matmul %4, %0, %cst_6 {dimension_numbers = #tpu.dot_dimension_numbers<[1], [0], [0], [1], [0, 0, 1, 1], [], []>} : vector<56x32xbf16>, vector<32x128xbf16>, vector<56x128xf32> -> vector<56x128xf32>
    %6 = vector.broadcast %1 : vector<1x128xf32> to vector<56x128xf32>
    %7 = arith.addf %5, %6 : vector<56x128xf32>
    %cst_7 = arith.constant 0.000000e+00 : f32
    %8 = vector.broadcast %cst_7 : f32 to vector<56x128xf32>
    %9 = arith.maximumf %7, %8 : vector<56x128xf32>
    %10 = arith.addf %2, %9 : vector<56x128xf32>
    %c1 = arith.constant 1 : index
    %c0_8 = arith.constant 0 : index
    %c0_9 = arith.constant 0 : index
    %11 = vector.load %arg1[%c1, %c0_8, %c0_9] : memref<4x56x32xbf16, #tpu.memory_space<vmem>>, vector<1x56x32xbf16>
    %12 = vector.shape_cast %11 : vector<1x56x32xbf16> to vector<56x32xbf16>
    %cst_10 = arith.constant dense<0.000000e+00> : vector<56x128xf32>
    %13 = tpu.matmul %12, %0, %cst_10 {dimension_numbers = #tpu.dot_dimension_numbers<[1], [0], [0], [1], [0, 0, 1, 1], [], []>} : vector<56x32xbf16>, vector<32x128xbf16>, vector<56x128xf32> -> vector<56x128xf32>
    %14 = vector.broadcast %1 : vector<1x128xf32> to vector<56x128xf32>
    %15 = arith.addf %13, %14 : vector<56x128xf32>
    %cst_11 = arith.constant 0.000000e+00 : f32
    %16 = vector.broadcast %cst_11 : f32 to vector<56x128xf32>
    %17 = arith.maximumf %15, %16 : vector<56x128xf32>
    %18 = arith.addf %10, %17 : vector<56x128xf32>
    %c2 = arith.constant 2 : index
    %c0_12 = arith.constant 0 : index
    %c0_13 = arith.constant 0 : index
    %19 = vector.load %arg1[%c2, %c0_12, %c0_13] : memref<4x56x32xbf16, #tpu.memory_space<vmem>>, vector<1x56x32xbf16>
    %20 = vector.shape_cast %19 : vector<1x56x32xbf16> to vector<56x32xbf16>
    %cst_14 = arith.constant dense<0.000000e+00> : vector<56x128xf32>
    %21 = tpu.matmul %20, %0, %cst_14 {dimension_numbers = #tpu.dot_dimension_numbers<[1], [0], [0], [1], [0, 0, 1, 1], [], []>} : vector<56x32xbf16>, vector<32x128xbf16>, vector<56x128xf32> -> vector<56x128xf32>
    %22 = vector.broadcast %1 : vector<1x128xf32> to vector<56x128xf32>
    %23 = arith.addf %21, %22 : vector<56x128xf32>
    %cst_15 = arith.constant 0.000000e+00 : f32
    %24 = vector.broadcast %cst_15 : f32 to vector<56x128xf32>
    %25 = arith.maximumf %23, %24 : vector<56x128xf32>
    %26 = arith.addf %18, %25 : vector<56x128xf32>
    %c3 = arith.constant 3 : index
    %c0_16 = arith.constant 0 : index
    %c0_17 = arith.constant 0 : index
    %27 = vector.load %arg1[%c3, %c0_16, %c0_17] : memref<4x56x32xbf16, #tpu.memory_space<vmem>>, vector<1x56x32xbf16>
    %28 = vector.shape_cast %27 : vector<1x56x32xbf16> to vector<56x32xbf16>
    %cst_18 = arith.constant dense<0.000000e+00> : vector<56x128xf32>
    %29 = tpu.matmul %28, %0, %cst_18 {dimension_numbers = #tpu.dot_dimension_numbers<[1], [0], [0], [1], [0, 0, 1, 1], [], []>} : vector<56x32xbf16>, vector<32x128xbf16>, vector<56x128xf32> -> vector<56x128xf32>
    %30 = vector.broadcast %1 : vector<1x128xf32> to vector<56x128xf32>
    %31 = arith.addf %29, %30 : vector<56x128xf32>
    %cst_19 = arith.constant 0.000000e+00 : f32
    %32 = vector.broadcast %cst_19 : f32 to vector<56x128xf32>
    %33 = arith.maximumf %31, %32 : vector<56x128xf32>
    %34 = arith.addf %26, %33 : vector<56x128xf32>
    %cst_20 = arith.constant 2.500000e-01 : f32
    %35 = vector.broadcast %cst_20 : f32 to vector<56x128xf32>
    %36 = arith.mulf %34, %35 : vector<56x128xf32>
    %c0_21 = arith.constant 0 : index
    %c0_22 = arith.constant 0 : index
    %37 = vector.load %arg4[%c0_21, %c0_22] : memref<56x128xf32, #tpu.memory_space<vmem>>, vector<56x128xf32>
    tpu.vector_store %arg4[%c0_21, %c0_22], %36 {strides = array<i32>} : memref<56x128xf32, #tpu.memory_space<vmem>>, vector<56x128xf32>,
    return
  }
  func.func @transform_0(%arg0: i32) -> (i32, i32, i32) {
    %c0_i32 = arith.constant 0 : i32
    %c0_i32_0 = arith.constant 0 : i32
    %c0_i32_1 = arith.constant 0 : i32
    return %c0_i32, %arg0, %c0_i32_0 : i32, i32, i32
  }
  func.func @transform_1(%arg0: i32) -> (i32, i32) {
    %c0_i32 = arith.constant 0 : i32
    %c0_i32_0 = arith.constant 0 : i32
    %c0_i32_1 = arith.constant 0 : i32
    return %c0_i32, %c0_i32_0 : i32, i32
  }
  func.func @transform_2(%arg0: i32) -> (i32, i32) {
    %c0_i32 = arith.constant 0 : i32
    %c0_i32_0 = arith.constant 0 : i32
    %c0_i32_1 = arith.constant 0 : i32
    return %c0_i32, %c0_i32_0 : i32, i32
  }
  func.func @transform_3(%arg0: i32) -> (i32, i32) {
    %c0_i32 = arith.constant 0 : i32
    %c0_i32_0 = arith.constant 0 : i32
    return %arg0, %c0_i32 : i32, i32
  }
}

module attributes {stable_mosaic.version = 11 : i64} {
  func.func @_conv2_pool_fc_kernel(%arg0: i32, %arg1: memref<4x200x160xbf16, #tpu.memory_space<vmem>>, %arg2: memref<160x128xbf16, #tpu.memory_space<vmem>>, %arg3: memref<1x128xf32, #tpu.memory_space<vmem>>, %arg4: memref<25x128x128xbf16, #tpu.memory_space<vmem>>, %arg5: memref<1x128xf32, #tpu.memory_space<vmem>>, %arg6: memref<128x128xbf16, #tpu.memory_space<vmem>>, %arg7: memref<1x128xf32, #tpu.memory_space<vmem>>, %arg8: memref<128x128xbf16, #tpu.memory_space<vmem>>, %arg9: memref<1x128xf32, #tpu.memory_space<vmem>>, %arg10: memref<8x128xf32, #tpu.memory_space<vmem>>) attributes {dimension_semantics = [#tpu.dimension_semantics<arbitrary>], iteration_bounds = array<i64: 1>, scalar_prefetch = 0 : i64, scratch_operands = 0 : i64, tpu.core_type = #tpu.core_type<tc>, window_params = [{pipeline_mode = #tpu.pipeline_mode<synchronous>, transform_indices = @transform_0, window_bounds = array<i64: 4, 200, 160>}, {pipeline_mode = #tpu.pipeline_mode<synchronous>, transform_indices = @transform_1, window_bounds = array<i64: 160, 128>}, {pipeline_mode = #tpu.pipeline_mode<synchronous>, transform_indices = @transform_2, window_bounds = array<i64: 1, 128>}, {pipeline_mode = #tpu.pipeline_mode<synchronous>, transform_indices = @transform_3, window_bounds = array<i64: 25, 128, 128>}, {pipeline_mode = #tpu.pipeline_mode<synchronous>, transform_indices = @transform_4, window_bounds = array<i64: 1, 128>}, {pipeline_mode = #tpu.pipeline_mode<synchronous>, transform_indices = @transform_5, window_bounds = array<i64: 128, 128>}, {pipeline_mode = #tpu.pipeline_mode<synchronous>, transform_indices = @transform_6, window_bounds = array<i64: 1, 128>}, {pipeline_mode = #tpu.pipeline_mode<synchronous>, transform_indices = @transform_7, window_bounds = array<i64: 128, 128>}, {pipeline_mode = #tpu.pipeline_mode<synchronous>, transform_indices = @transform_8, window_bounds = array<i64: 1, 128>}, {pipeline_mode = #tpu.pipeline_mode<synchronous>, transform_indices = @transform_9, window_bounds = array<i64: 8, 128>}]} {
    %c0 = arith.constant 0 : index
    %c0_0 = arith.constant 0 : index
    %0 = vector.load %arg2[%c0, %c0_0] : memref<160x128xbf16, #tpu.memory_space<vmem>>, vector<160x128xbf16>
    %c0_1 = arith.constant 0 : index
    %c0_2 = arith.constant 0 : index
    %1 = vector.load %arg3[%c0_1, %c0_2] : memref<1x128xf32, #tpu.memory_space<vmem>>, vector<1x128xf32>
    %cst = arith.constant 0.000000e+00 : f32
    %2 = vector.broadcast %cst : f32 to vector<200x128xf32>
    %c0_3 = arith.constant 0 : index
    %c0_4 = arith.constant 0 : index
    %c0_5 = arith.constant 0 : index
    %3 = vector.load %arg1[%c0_3, %c0_4, %c0_5] : memref<4x200x160xbf16, #tpu.memory_space<vmem>>, vector<1x200x160xbf16>
    %4 = vector.shape_cast %3 : vector<1x200x160xbf16> to vector<200x160xbf16>
    %cst_6 = arith.constant dense<0.000000e+00> : vector<200x128xf32>
    %5 = tpu.matmul %4, %0, %cst_6 {dimension_numbers = #tpu.dot_dimension_numbers<[1], [0], [0], [1], [0, 0, 1, 1], [], []>} : vector<200x160xbf16>, vector<160x128xbf16>, vector<200x128xf32> -> vector<200x128xf32>
    %6 = vector.broadcast %1 : vector<1x128xf32> to vector<200x128xf32>
    %7 = arith.addf %5, %6 : vector<200x128xf32>
    %cst_7 = arith.constant 0.000000e+00 : f32
    %8 = vector.broadcast %cst_7 : f32 to vector<200x128xf32>
    %9 = arith.maximumf %7, %8 : vector<200x128xf32>
    %10 = arith.addf %2, %9 : vector<200x128xf32>
    %c1 = arith.constant 1 : index
    %c0_8 = arith.constant 0 : index
    %c0_9 = arith.constant 0 : index
    %11 = vector.load %arg1[%c1, %c0_8, %c0_9] : memref<4x200x160xbf16, #tpu.memory_space<vmem>>, vector<1x200x160xbf16>
    %12 = vector.shape_cast %11 : vector<1x200x160xbf16> to vector<200x160xbf16>
    %cst_10 = arith.constant dense<0.000000e+00> : vector<200x128xf32>
    %13 = tpu.matmul %12, %0, %cst_10 {dimension_numbers = #tpu.dot_dimension_numbers<[1], [0], [0], [1], [0, 0, 1, 1], [], []>} : vector<200x160xbf16>, vector<160x128xbf16>, vector<200x128xf32> -> vector<200x128xf32>
    %14 = vector.broadcast %1 : vector<1x128xf32> to vector<200x128xf32>
    %15 = arith.addf %13, %14 : vector<200x128xf32>
    %cst_11 = arith.constant 0.000000e+00 : f32
    %16 = vector.broadcast %cst_11 : f32 to vector<200x128xf32>
    %17 = arith.maximumf %15, %16 : vector<200x128xf32>
    %18 = arith.addf %10, %17 : vector<200x128xf32>
    %c2 = arith.constant 2 : index
    %c0_12 = arith.constant 0 : index
    %c0_13 = arith.constant 0 : index
    %19 = vector.load %arg1[%c2, %c0_12, %c0_13] : memref<4x200x160xbf16, #tpu.memory_space<vmem>>, vector<1x200x160xbf16>
    %20 = vector.shape_cast %19 : vector<1x200x160xbf16> to vector<200x160xbf16>
    %cst_14 = arith.constant dense<0.000000e+00> : vector<200x128xf32>
    %21 = tpu.matmul %20, %0, %cst_14 {dimension_numbers = #tpu.dot_dimension_numbers<[1], [0], [0], [1], [0, 0, 1, 1], [], []>} : vector<200x160xbf16>, vector<160x128xbf16>, vector<200x128xf32> -> vector<200x128xf32>
    %22 = vector.broadcast %1 : vector<1x128xf32> to vector<200x128xf32>
    %23 = arith.addf %21, %22 : vector<200x128xf32>
    %cst_15 = arith.constant 0.000000e+00 : f32
    %24 = vector.broadcast %cst_15 : f32 to vector<200x128xf32>
    %25 = arith.maximumf %23, %24 : vector<200x128xf32>
    %26 = arith.addf %18, %25 : vector<200x128xf32>
    %c3 = arith.constant 3 : index
    %c0_16 = arith.constant 0 : index
    %c0_17 = arith.constant 0 : index
    %27 = vector.load %arg1[%c3, %c0_16, %c0_17] : memref<4x200x160xbf16, #tpu.memory_space<vmem>>, vector<1x200x160xbf16>
    %28 = vector.shape_cast %27 : vector<1x200x160xbf16> to vector<200x160xbf16>
    %cst_18 = arith.constant dense<0.000000e+00> : vector<200x128xf32>
    %29 = tpu.matmul %28, %0, %cst_18 {dimension_numbers = #tpu.dot_dimension_numbers<[1], [0], [0], [1], [0, 0, 1, 1], [], []>} : vector<200x160xbf16>, vector<160x128xbf16>, vector<200x128xf32> -> vector<200x128xf32>
    %30 = vector.broadcast %1 : vector<1x128xf32> to vector<200x128xf32>
    %31 = arith.addf %29, %30 : vector<200x128xf32>
    %cst_19 = arith.constant 0.000000e+00 : f32
    %32 = vector.broadcast %cst_19 : f32 to vector<200x128xf32>
    %33 = arith.maximumf %31, %32 : vector<200x128xf32>
    %34 = arith.addf %26, %33 : vector<200x128xf32>
    %cst_20 = arith.constant 2.500000e-01 : f32
    %35 = vector.broadcast %cst_20 : f32 to vector<200x128xf32>
    %36 = arith.mulf %34, %35 : vector<200x128xf32>
    %cst_21 = arith.constant 0.000000e+00 : f32
    %37 = vector.broadcast %cst_21 : f32 to vector<8x128xf32>
    %38 = vector.extract_strided_slice %36 {offsets = [0, 0], sizes = [8, 128], strides = [1, 1]} : vector<200x128xf32> to vector<8x128xf32>
    %39 = arith.truncf %38 : vector<8x128xf32> to vector<8x128xbf16>
    %c0_22 = arith.constant 0 : index
    %c0_23 = arith.constant 0 : index
    %c0_24 = arith.constant 0 : index
    %40 = vector.load %arg4[%c0_22, %c0_23, %c0_24] : memref<25x128x128xbf16, #tpu.memory_space<vmem>>, vector<1x128x128xbf16>
    %41 = vector.shape_cast %40 : vector<1x128x128xbf16> to vector<128x128xbf16>
    %cst_25 = arith.constant dense<0.000000e+00> : vector<8x128xf32>
    %42 = tpu.matmul %39, %41, %cst_25 {dimension_numbers = #tpu.dot_dimension_numbers<[1], [0], [0], [1], [0, 0, 1, 1], [], []>} : vector<8x128xbf16>, vector<128x128xbf16>, vector<8x128xf32> -> vector<8x128xf32>
    %43 = arith.addf %37, %42 : vector<8x128xf32>
    %44 = vector.extract_strided_slice %36 {offsets = [8, 0], sizes = [8, 128], strides = [1, 1]} : vector<200x128xf32> to vector<8x128xf32>
    %45 = arith.truncf %44 : vector<8x128xf32> to vector<8x128xbf16>
    %c1_26 = arith.constant 1 : index
    %c0_27 = arith.constant 0 : index
    %c0_28 = arith.constant 0 : index
    %46 = vector.load %arg4[%c1_26, %c0_27, %c0_28] : memref<25x128x128xbf16, #tpu.memory_space<vmem>>, vector<1x128x128xbf16>
    %47 = vector.shape_cast %46 : vector<1x128x128xbf16> to vector<128x128xbf16>
    %cst_29 = arith.constant dense<0.000000e+00> : vector<8x128xf32>
    %48 = tpu.matmul %45, %47, %cst_29 {dimension_numbers = #tpu.dot_dimension_numbers<[1], [0], [0], [1], [0, 0, 1, 1], [], []>} : vector<8x128xbf16>, vector<128x128xbf16>, vector<8x128xf32> -> vector<8x128xf32>
    %49 = arith.addf %43, %48 : vector<8x128xf32>
    %50 = vector.extract_strided_slice %36 {offsets = [16, 0], sizes = [8, 128], strides = [1, 1]} : vector<200x128xf32> to vector<8x128xf32>
    %51 = arith.truncf %50 : vector<8x128xf32> to vector<8x128xbf16>
    %c2_30 = arith.constant 2 : index
    %c0_31 = arith.constant 0 : index
    %c0_32 = arith.constant 0 : index
    %52 = vector.load %arg4[%c2_30, %c0_31, %c0_32] : memref<25x128x128xbf16, #tpu.memory_space<vmem>>, vector<1x128x128xbf16>
    %53 = vector.shape_cast %52 : vector<1x128x128xbf16> to vector<128x128xbf16>
    %cst_33 = arith.constant dense<0.000000e+00> : vector<8x128xf32>
    %54 = tpu.matmul %51, %53, %cst_33 {dimension_numbers = #tpu.dot_dimension_numbers<[1], [0], [0], [1], [0, 0, 1, 1], [], []>} : vector<8x128xbf16>, vector<128x128xbf16>, vector<8x128xf32> -> vector<8x128xf32>
    %55 = arith.addf %49, %54 : vector<8x128xf32>
    %56 = vector.extract_strided_slice %36 {offsets = [24, 0], sizes = [8, 128], strides = [1, 1]} : vector<200x128xf32> to vector<8x128xf32>
    %57 = arith.truncf %56 : vector<8x128xf32> to vector<8x128xbf16>
    %c3_34 = arith.constant 3 : index
    %c0_35 = arith.constant 0 : index
    %c0_36 = arith.constant 0 : index
    %58 = vector.load %arg4[%c3_34, %c0_35, %c0_36] : memref<25x128x128xbf16, #tpu.memory_space<vmem>>, vector<1x128x128xbf16>
    %59 = vector.shape_cast %58 : vector<1x128x128xbf16> to vector<128x128xbf16>
    %cst_37 = arith.constant dense<0.000000e+00> : vector<8x128xf32>
    %60 = tpu.matmul %57, %59, %cst_37 {dimension_numbers = #tpu.dot_dimension_numbers<[1], [0], [0], [1], [0, 0, 1, 1], [], []>} : vector<8x128xbf16>, vector<128x128xbf16>, vector<8x128xf32> -> vector<8x128xf32>
    %61 = arith.addf %55, %60 : vector<8x128xf32>
    %62 = vector.extract_strided_slice %36 {offsets = [32, 0], sizes = [8, 128], strides = [1, 1]} : vector<200x128xf32> to vector<8x128xf32>
    %63 = arith.truncf %62 : vector<8x128xf32> to vector<8x128xbf16>
    %c4 = arith.constant 4 : index
    %c0_38 = arith.constant 0 : index
    %c0_39 = arith.constant 0 : index
    %64 = vector.load %arg4[%c4, %c0_38, %c0_39] : memref<25x128x128xbf16, #tpu.memory_space<vmem>>, vector<1x128x128xbf16>
    %65 = vector.shape_cast %64 : vector<1x128x128xbf16> to vector<128x128xbf16>
    %cst_40 = arith.constant dense<0.000000e+00> : vector<8x128xf32>
    %66 = tpu.matmul %63, %65, %cst_40 {dimension_numbers = #tpu.dot_dimension_numbers<[1], [0], [0], [1], [0, 0, 1, 1], [], []>} : vector<8x128xbf16>, vector<128x128xbf16>, vector<8x128xf32> -> vector<8x128xf32>
    %67 = arith.addf %61, %66 : vector<8x128xf32>
    %68 = vector.extract_strided_slice %36 {offsets = [40, 0], sizes = [8, 128], strides = [1, 1]} : vector<200x128xf32> to vector<8x128xf32>
    %69 = arith.truncf %68 : vector<8x128xf32> to vector<8x128xbf16>
    %c5 = arith.constant 5 : index
    %c0_41 = arith.constant 0 : index
    %c0_42 = arith.constant 0 : index
    %70 = vector.load %arg4[%c5, %c0_41, %c0_42] : memref<25x128x128xbf16, #tpu.memory_space<vmem>>, vector<1x128x128xbf16>
    %71 = vector.shape_cast %70 : vector<1x128x128xbf16> to vector<128x128xbf16>
    %cst_43 = arith.constant dense<0.000000e+00> : vector<8x128xf32>
    %72 = tpu.matmul %69, %71, %cst_43 {dimension_numbers = #tpu.dot_dimension_numbers<[1], [0], [0], [1], [0, 0, 1, 1], [], []>} : vector<8x128xbf16>, vector<128x128xbf16>, vector<8x128xf32> -> vector<8x128xf32>
    %73 = arith.addf %67, %72 : vector<8x128xf32>
    %74 = vector.extract_strided_slice %36 {offsets = [48, 0], sizes = [8, 128], strides = [1, 1]} : vector<200x128xf32> to vector<8x128xf32>
    %75 = arith.truncf %74 : vector<8x128xf32> to vector<8x128xbf16>
    %c6 = arith.constant 6 : index
    %c0_44 = arith.constant 0 : index
    %c0_45 = arith.constant 0 : index
    %76 = vector.load %arg4[%c6, %c0_44, %c0_45] : memref<25x128x128xbf16, #tpu.memory_space<vmem>>, vector<1x128x128xbf16>
    %77 = vector.shape_cast %76 : vector<1x128x128xbf16> to vector<128x128xbf16>
    %cst_46 = arith.constant dense<0.000000e+00> : vector<8x128xf32>
    %78 = tpu.matmul %75, %77, %cst_46 {dimension_numbers = #tpu.dot_dimension_numbers<[1], [0], [0], [1], [0, 0, 1, 1], [], []>} : vector<8x128xbf16>, vector<128x128xbf16>, vector<8x128xf32> -> vector<8x128xf32>
    %79 = arith.addf %73, %78 : vector<8x128xf32>
    %80 = vector.extract_strided_slice %36 {offsets = [56, 0], sizes = [8, 128], strides = [1, 1]} : vector<200x128xf32> to vector<8x128xf32>
    %81 = arith.truncf %80 : vector<8x128xf32> to vector<8x128xbf16>
    %c7 = arith.constant 7 : index
    %c0_47 = arith.constant 0 : index
    %c0_48 = arith.constant 0 : index
    %82 = vector.load %arg4[%c7, %c0_47, %c0_48] : memref<25x128x128xbf16, #tpu.memory_space<vmem>>, vector<1x128x128xbf16>
    %83 = vector.shape_cast %82 : vector<1x128x128xbf16> to vector<128x128xbf16>
    %cst_49 = arith.constant dense<0.000000e+00> : vector<8x128xf32>
    %84 = tpu.matmul %81, %83, %cst_49 {dimension_numbers = #tpu.dot_dimension_numbers<[1], [0], [0], [1], [0, 0, 1, 1], [], []>} : vector<8x128xbf16>, vector<128x128xbf16>, vector<8x128xf32> -> vector<8x128xf32>
    %85 = arith.addf %79, %84 : vector<8x128xf32>
    %86 = vector.extract_strided_slice %36 {offsets = [64, 0], sizes = [8, 128], strides = [1, 1]} : vector<200x128xf32> to vector<8x128xf32>
    %87 = arith.truncf %86 : vector<8x128xf32> to vector<8x128xbf16>
    %c8 = arith.constant 8 : index
    %c0_50 = arith.constant 0 : index
    %c0_51 = arith.constant 0 : index
    %88 = vector.load %arg4[%c8, %c0_50, %c0_51] : memref<25x128x128xbf16, #tpu.memory_space<vmem>>, vector<1x128x128xbf16>
    %89 = vector.shape_cast %88 : vector<1x128x128xbf16> to vector<128x128xbf16>
    %cst_52 = arith.constant dense<0.000000e+00> : vector<8x128xf32>
    %90 = tpu.matmul %87, %89, %cst_52 {dimension_numbers = #tpu.dot_dimension_numbers<[1], [0], [0], [1], [0, 0, 1, 1], [], []>} : vector<8x128xbf16>, vector<128x128xbf16>, vector<8x128xf32> -> vector<8x128xf32>
    %91 = arith.addf %85, %90 : vector<8x128xf32>
    %92 = vector.extract_strided_slice %36 {offsets = [72, 0], sizes = [8, 128], strides = [1, 1]} : vector<200x128xf32> to vector<8x128xf32>
    %93 = arith.truncf %92 : vector<8x128xf32> to vector<8x128xbf16>
    %c9 = arith.constant 9 : index
    %c0_53 = arith.constant 0 : index
    %c0_54 = arith.constant 0 : index
    %94 = vector.load %arg4[%c9, %c0_53, %c0_54] : memref<25x128x128xbf16, #tpu.memory_space<vmem>>, vector<1x128x128xbf16>
    %95 = vector.shape_cast %94 : vector<1x128x128xbf16> to vector<128x128xbf16>
    %cst_55 = arith.constant dense<0.000000e+00> : vector<8x128xf32>
    %96 = tpu.matmul %93, %95, %cst_55 {dimension_numbers = #tpu.dot_dimension_numbers<[1], [0], [0], [1], [0, 0, 1, 1], [], []>} : vector<8x128xbf16>, vector<128x128xbf16>, vector<8x128xf32> -> vector<8x128xf32>
    %97 = arith.addf %91, %96 : vector<8x128xf32>
    %98 = vector.extract_strided_slice %36 {offsets = [80, 0], sizes = [8, 128], strides = [1, 1]} : vector<200x128xf32> to vector<8x128xf32>
    %99 = arith.truncf %98 : vector<8x128xf32> to vector<8x128xbf16>
    %c10 = arith.constant 10 : index
    %c0_56 = arith.constant 0 : index
    %c0_57 = arith.constant 0 : index
    %100 = vector.load %arg4[%c10, %c0_56, %c0_57] : memref<25x128x128xbf16, #tpu.memory_space<vmem>>, vector<1x128x128xbf16>
    %101 = vector.shape_cast %100 : vector<1x128x128xbf16> to vector<128x128xbf16>
    %cst_58 = arith.constant dense<0.000000e+00> : vector<8x128xf32>
    %102 = tpu.matmul %99, %101, %cst_58 {dimension_numbers = #tpu.dot_dimension_numbers<[1], [0], [0], [1], [0, 0, 1, 1], [], []>} : vector<8x128xbf16>, vector<128x128xbf16>, vector<8x128xf32> -> vector<8x128xf32>
    %103 = arith.addf %97, %102 : vector<8x128xf32>
    %104 = vector.extract_strided_slice %36 {offsets = [88, 0], sizes = [8, 128], strides = [1, 1]} : vector<200x128xf32> to vector<8x128xf32>
    %105 = arith.truncf %104 : vector<8x128xf32> to vector<8x128xbf16>
    %c11 = arith.constant 11 : index
    %c0_59 = arith.constant 0 : index
    %c0_60 = arith.constant 0 : index
    %106 = vector.load %arg4[%c11, %c0_59, %c0_60] : memref<25x128x128xbf16, #tpu.memory_space<vmem>>, vector<1x128x128xbf16>
    %107 = vector.shape_cast %106 : vector<1x128x128xbf16> to vector<128x128xbf16>
    %cst_61 = arith.constant dense<0.000000e+00> : vector<8x128xf32>
    %108 = tpu.matmul %105, %107, %cst_61 {dimension_numbers = #tpu.dot_dimension_numbers<[1], [0], [0], [1], [0, 0, 1, 1], [], []>} : vector<8x128xbf16>, vector<128x128xbf16>, vector<8x128xf32> -> vector<8x128xf32>
    %109 = arith.addf %103, %108 : vector<8x128xf32>
    %110 = vector.extract_strided_slice %36 {offsets = [96, 0], sizes = [8, 128], strides = [1, 1]} : vector<200x128xf32> to vector<8x128xf32>
    %111 = arith.truncf %110 : vector<8x128xf32> to vector<8x128xbf16>
    %c12 = arith.constant 12 : index
    %c0_62 = arith.constant 0 : index
    %c0_63 = arith.constant 0 : index
    %112 = vector.load %arg4[%c12, %c0_62, %c0_63] : memref<25x128x128xbf16, #tpu.memory_space<vmem>>, vector<1x128x128xbf16>
    %113 = vector.shape_cast %112 : vector<1x128x128xbf16> to vector<128x128xbf16>
    %cst_64 = arith.constant dense<0.000000e+00> : vector<8x128xf32>
    %114 = tpu.matmul %111, %113, %cst_64 {dimension_numbers = #tpu.dot_dimension_numbers<[1], [0], [0], [1], [0, 0, 1, 1], [], []>} : vector<8x128xbf16>, vector<128x128xbf16>, vector<8x128xf32> -> vector<8x128xf32>
    %115 = arith.addf %109, %114 : vector<8x128xf32>
    %116 = vector.extract_strided_slice %36 {offsets = [104, 0], sizes = [8, 128], strides = [1, 1]} : vector<200x128xf32> to vector<8x128xf32>
    %117 = arith.truncf %116 : vector<8x128xf32> to vector<8x128xbf16>
    %c13 = arith.constant 13 : index
    %c0_65 = arith.constant 0 : index
    %c0_66 = arith.constant 0 : index
    %118 = vector.load %arg4[%c13, %c0_65, %c0_66] : memref<25x128x128xbf16, #tpu.memory_space<vmem>>, vector<1x128x128xbf16>
    %119 = vector.shape_cast %118 : vector<1x128x128xbf16> to vector<128x128xbf16>
    %cst_67 = arith.constant dense<0.000000e+00> : vector<8x128xf32>
    %120 = tpu.matmul %117, %119, %cst_67 {dimension_numbers = #tpu.dot_dimension_numbers<[1], [0], [0], [1], [0, 0, 1, 1], [], []>} : vector<8x128xbf16>, vector<128x128xbf16>, vector<8x128xf32> -> vector<8x128xf32>
    %121 = arith.addf %115, %120 : vector<8x128xf32>
    %122 = vector.extract_strided_slice %36 {offsets = [112, 0], sizes = [8, 128], strides = [1, 1]} : vector<200x128xf32> to vector<8x128xf32>
    %123 = arith.truncf %122 : vector<8x128xf32> to vector<8x128xbf16>
    %c14 = arith.constant 14 : index
    %c0_68 = arith.constant 0 : index
    %c0_69 = arith.constant 0 : index
    %124 = vector.load %arg4[%c14, %c0_68, %c0_69] : memref<25x128x128xbf16, #tpu.memory_space<vmem>>, vector<1x128x128xbf16>
    %125 = vector.shape_cast %124 : vector<1x128x128xbf16> to vector<128x128xbf16>
    %cst_70 = arith.constant dense<0.000000e+00> : vector<8x128xf32>
    %126 = tpu.matmul %123, %125, %cst_70 {dimension_numbers = #tpu.dot_dimension_numbers<[1], [0], [0], [1], [0, 0, 1, 1], [], []>} : vector<8x128xbf16>, vector<128x128xbf16>, vector<8x128xf32> -> vector<8x128xf32>
    %127 = arith.addf %121, %126 : vector<8x128xf32>
    %128 = vector.extract_strided_slice %36 {offsets = [120, 0], sizes = [8, 128], strides = [1, 1]} : vector<200x128xf32> to vector<8x128xf32>
    %129 = arith.truncf %128 : vector<8x128xf32> to vector<8x128xbf16>
    %c15 = arith.constant 15 : index
    %c0_71 = arith.constant 0 : index
    %c0_72 = arith.constant 0 : index
    %130 = vector.load %arg4[%c15, %c0_71, %c0_72] : memref<25x128x128xbf16, #tpu.memory_space<vmem>>, vector<1x128x128xbf16>
    %131 = vector.shape_cast %130 : vector<1x128x128xbf16> to vector<128x128xbf16>
    %cst_73 = arith.constant dense<0.000000e+00> : vector<8x128xf32>
    %132 = tpu.matmul %129, %131, %cst_73 {dimension_numbers = #tpu.dot_dimension_numbers<[1], [0], [0], [1], [0, 0, 1, 1], [], []>} : vector<8x128xbf16>, vector<128x128xbf16>, vector<8x128xf32> -> vector<8x128xf32>
    %133 = arith.addf %127, %132 : vector<8x128xf32>
    %134 = vector.extract_strided_slice %36 {offsets = [128, 0], sizes = [8, 128], strides = [1, 1]} : vector<200x128xf32> to vector<8x128xf32>
    %135 = arith.truncf %134 : vector<8x128xf32> to vector<8x128xbf16>
    %c16 = arith.constant 16 : index
    %c0_74 = arith.constant 0 : index
    %c0_75 = arith.constant 0 : index
    %136 = vector.load %arg4[%c16, %c0_74, %c0_75] : memref<25x128x128xbf16, #tpu.memory_space<vmem>>, vector<1x128x128xbf16>
    %137 = vector.shape_cast %136 : vector<1x128x128xbf16> to vector<128x128xbf16>
    %cst_76 = arith.constant dense<0.000000e+00> : vector<8x128xf32>
    %138 = tpu.matmul %135, %137, %cst_76 {dimension_numbers = #tpu.dot_dimension_numbers<[1], [0], [0], [1], [0, 0, 1, 1], [], []>} : vector<8x128xbf16>, vector<128x128xbf16>, vector<8x128xf32> -> vector<8x128xf32>
    %139 = arith.addf %133, %138 : vector<8x128xf32>
    %140 = vector.extract_strided_slice %36 {offsets = [136, 0], sizes = [8, 128], strides = [1, 1]} : vector<200x128xf32> to vector<8x128xf32>
    %141 = arith.truncf %140 : vector<8x128xf32> to vector<8x128xbf16>
    %c17 = arith.constant 17 : index
    %c0_77 = arith.constant 0 : index
    %c0_78 = arith.constant 0 : index
    %142 = vector.load %arg4[%c17, %c0_77, %c0_78] : memref<25x128x128xbf16, #tpu.memory_space<vmem>>, vector<1x128x128xbf16>
    %143 = vector.shape_cast %142 : vector<1x128x128xbf16> to vector<128x128xbf16>
    %cst_79 = arith.constant dense<0.000000e+00> : vector<8x128xf32>
    %144 = tpu.matmul %141, %143, %cst_79 {dimension_numbers = #tpu.dot_dimension_numbers<[1], [0], [0], [1], [0, 0, 1, 1], [], []>} : vector<8x128xbf16>, vector<128x128xbf16>, vector<8x128xf32> -> vector<8x128xf32>
    %145 = arith.addf %139, %144 : vector<8x128xf32>
    %146 = vector.extract_strided_slice %36 {offsets = [144, 0], sizes = [8, 128], strides = [1, 1]} : vector<200x128xf32> to vector<8x128xf32>
    %147 = arith.truncf %146 : vector<8x128xf32> to vector<8x128xbf16>
    %c18 = arith.constant 18 : index
    %c0_80 = arith.constant 0 : index
    %c0_81 = arith.constant 0 : index
    %148 = vector.load %arg4[%c18, %c0_80, %c0_81] : memref<25x128x128xbf16, #tpu.memory_space<vmem>>, vector<1x128x128xbf16>
    %149 = vector.shape_cast %148 : vector<1x128x128xbf16> to vector<128x128xbf16>
    %cst_82 = arith.constant dense<0.000000e+00> : vector<8x128xf32>
    %150 = tpu.matmul %147, %149, %cst_82 {dimension_numbers = #tpu.dot_dimension_numbers<[1], [0], [0], [1], [0, 0, 1, 1], [], []>} : vector<8x128xbf16>, vector<128x128xbf16>, vector<8x128xf32> -> vector<8x128xf32>
    %151 = arith.addf %145, %150 : vector<8x128xf32>
    %152 = vector.extract_strided_slice %36 {offsets = [152, 0], sizes = [8, 128], strides = [1, 1]} : vector<200x128xf32> to vector<8x128xf32>
    %153 = arith.truncf %152 : vector<8x128xf32> to vector<8x128xbf16>
    %c19 = arith.constant 19 : index
    %c0_83 = arith.constant 0 : index
    %c0_84 = arith.constant 0 : index
    %154 = vector.load %arg4[%c19, %c0_83, %c0_84] : memref<25x128x128xbf16, #tpu.memory_space<vmem>>, vector<1x128x128xbf16>
    %155 = vector.shape_cast %154 : vector<1x128x128xbf16> to vector<128x128xbf16>
    %cst_85 = arith.constant dense<0.000000e+00> : vector<8x128xf32>
    %156 = tpu.matmul %153, %155, %cst_85 {dimension_numbers = #tpu.dot_dimension_numbers<[1], [0], [0], [1], [0, 0, 1, 1], [], []>} : vector<8x128xbf16>, vector<128x128xbf16>, vector<8x128xf32> -> vector<8x128xf32>
    %157 = arith.addf %151, %156 : vector<8x128xf32>
    %158 = vector.extract_strided_slice %36 {offsets = [160, 0], sizes = [8, 128], strides = [1, 1]} : vector<200x128xf32> to vector<8x128xf32>
    %159 = arith.truncf %158 : vector<8x128xf32> to vector<8x128xbf16>
    %c20 = arith.constant 20 : index
    %c0_86 = arith.constant 0 : index
    %c0_87 = arith.constant 0 : index
    %160 = vector.load %arg4[%c20, %c0_86, %c0_87] : memref<25x128x128xbf16, #tpu.memory_space<vmem>>, vector<1x128x128xbf16>
    %161 = vector.shape_cast %160 : vector<1x128x128xbf16> to vector<128x128xbf16>
    %cst_88 = arith.constant dense<0.000000e+00> : vector<8x128xf32>
    %162 = tpu.matmul %159, %161, %cst_88 {dimension_numbers = #tpu.dot_dimension_numbers<[1], [0], [0], [1], [0, 0, 1, 1], [], []>} : vector<8x128xbf16>, vector<128x128xbf16>, vector<8x128xf32> -> vector<8x128xf32>
    %163 = arith.addf %157, %162 : vector<8x128xf32>
    %164 = vector.extract_strided_slice %36 {offsets = [168, 0], sizes = [8, 128], strides = [1, 1]} : vector<200x128xf32> to vector<8x128xf32>
    %165 = arith.truncf %164 : vector<8x128xf32> to vector<8x128xbf16>
    %c21 = arith.constant 21 : index
    %c0_89 = arith.constant 0 : index
    %c0_90 = arith.constant 0 : index
    %166 = vector.load %arg4[%c21, %c0_89, %c0_90] : memref<25x128x128xbf16, #tpu.memory_space<vmem>>, vector<1x128x128xbf16>
    %167 = vector.shape_cast %166 : vector<1x128x128xbf16> to vector<128x128xbf16>
    %cst_91 = arith.constant dense<0.000000e+00> : vector<8x128xf32>
    %168 = tpu.matmul %165, %167, %cst_91 {dimension_numbers = #tpu.dot_dimension_numbers<[1], [0], [0], [1], [0, 0, 1, 1], [], []>} : vector<8x128xbf16>, vector<128x128xbf16>, vector<8x128xf32> -> vector<8x128xf32>
    %169 = arith.addf %163, %168 : vector<8x128xf32>
    %170 = vector.extract_strided_slice %36 {offsets = [176, 0], sizes = [8, 128], strides = [1, 1]} : vector<200x128xf32> to vector<8x128xf32>
    %171 = arith.truncf %170 : vector<8x128xf32> to vector<8x128xbf16>
    %c22 = arith.constant 22 : index
    %c0_92 = arith.constant 0 : index
    %c0_93 = arith.constant 0 : index
    %172 = vector.load %arg4[%c22, %c0_92, %c0_93] : memref<25x128x128xbf16, #tpu.memory_space<vmem>>, vector<1x128x128xbf16>
    %173 = vector.shape_cast %172 : vector<1x128x128xbf16> to vector<128x128xbf16>
    %cst_94 = arith.constant dense<0.000000e+00> : vector<8x128xf32>
    %174 = tpu.matmul %171, %173, %cst_94 {dimension_numbers = #tpu.dot_dimension_numbers<[1], [0], [0], [1], [0, 0, 1, 1], [], []>} : vector<8x128xbf16>, vector<128x128xbf16>, vector<8x128xf32> -> vector<8x128xf32>
    %175 = arith.addf %169, %174 : vector<8x128xf32>
    %176 = vector.extract_strided_slice %36 {offsets = [184, 0], sizes = [8, 128], strides = [1, 1]} : vector<200x128xf32> to vector<8x128xf32>
    %177 = arith.truncf %176 : vector<8x128xf32> to vector<8x128xbf16>
    %c23 = arith.constant 23 : index
    %c0_95 = arith.constant 0 : index
    %c0_96 = arith.constant 0 : index
    %178 = vector.load %arg4[%c23, %c0_95, %c0_96] : memref<25x128x128xbf16, #tpu.memory_space<vmem>>, vector<1x128x128xbf16>
    %179 = vector.shape_cast %178 : vector<1x128x128xbf16> to vector<128x128xbf16>
    %cst_97 = arith.constant dense<0.000000e+00> : vector<8x128xf32>
    %180 = tpu.matmul %177, %179, %cst_97 {dimension_numbers = #tpu.dot_dimension_numbers<[1], [0], [0], [1], [0, 0, 1, 1], [], []>} : vector<8x128xbf16>, vector<128x128xbf16>, vector<8x128xf32> -> vector<8x128xf32>
    %181 = arith.addf %175, %180 : vector<8x128xf32>
    %182 = vector.extract_strided_slice %36 {offsets = [192, 0], sizes = [8, 128], strides = [1, 1]} : vector<200x128xf32> to vector<8x128xf32>
    %183 = arith.truncf %182 : vector<8x128xf32> to vector<8x128xbf16>
    %c24 = arith.constant 24 : index
    %c0_98 = arith.constant 0 : index
    %c0_99 = arith.constant 0 : index
    %184 = vector.load %arg4[%c24, %c0_98, %c0_99] : memref<25x128x128xbf16, #tpu.memory_space<vmem>>, vector<1x128x128xbf16>
    %185 = vector.shape_cast %184 : vector<1x128x128xbf16> to vector<128x128xbf16>
    %cst_100 = arith.constant dense<0.000000e+00> : vector<8x128xf32>
    %186 = tpu.matmul %183, %185, %cst_100 {dimension_numbers = #tpu.dot_dimension_numbers<[1], [0], [0], [1], [0, 0, 1, 1], [], []>} : vector<8x128xbf16>, vector<128x128xbf16>, vector<8x128xf32> -> vector<8x128xf32>
    %187 = arith.addf %181, %186 : vector<8x128xf32>
    %c0_101 = arith.constant 0 : index
    %c0_102 = arith.constant 0 : index
    %188 = vector.load %arg5[%c0_101, %c0_102] : memref<1x128xf32, #tpu.memory_space<vmem>>, vector<1x128xf32>
    %189 = vector.broadcast %188 : vector<1x128xf32> to vector<8x128xf32>
    %190 = arith.addf %187, %189 : vector<8x128xf32>
    %cst_103 = arith.constant 0.000000e+00 : f32
    %191 = vector.broadcast %cst_103 : f32 to vector<8x128xf32>
    %192 = arith.maximumf %190, %191 : vector<8x128xf32>
    %193 = arith.truncf %192 : vector<8x128xf32> to vector<8x128xbf16>
    %c0_104 = arith.constant 0 : index
    %c0_105 = arith.constant 0 : index
    %194 = vector.load %arg6[%c0_104, %c0_105] : memref<128x128xbf16, #tpu.memory_space<vmem>>, vector<128x128xbf16>
    %cst_106 = arith.constant dense<0.000000e+00> : vector<8x128xf32>
    %195 = tpu.matmul %193, %194, %cst_106 {dimension_numbers = #tpu.dot_dimension_numbers<[1], [0], [0], [1], [0, 0, 1, 1], [], []>} : vector<8x128xbf16>, vector<128x128xbf16>, vector<8x128xf32> -> vector<8x128xf32>
    %c0_107 = arith.constant 0 : index
    %c0_108 = arith.constant 0 : index
    %196 = vector.load %arg7[%c0_107, %c0_108] : memref<1x128xf32, #tpu.memory_space<vmem>>, vector<1x128xf32>
    %197 = vector.broadcast %196 : vector<1x128xf32> to vector<8x128xf32>
    %198 = arith.addf %195, %197 : vector<8x128xf32>
    %cst_109 = arith.constant 0.000000e+00 : f32
    %199 = vector.broadcast %cst_109 : f32 to vector<8x128xf32>
    %200 = arith.maximumf %198, %199 : vector<8x128xf32>
    %201 = arith.truncf %200 : vector<8x128xf32> to vector<8x128xbf16>
    %c0_110 = arith.constant 0 : index
    %c0_111 = arith.constant 0 : index
    %202 = vector.load %arg8[%c0_110, %c0_111] : memref<128x128xbf16, #tpu.memory_space<vmem>>, vector<128x128xbf16>
    %cst_112 = arith.constant dense<0.000000e+00> : vector<8x128xf32>
    %203 = tpu.matmul %201, %202, %cst_112 {dimension_numbers = #tpu.dot_dimension_numbers<[1], [0], [0], [1], [0, 0, 1, 1], [], []>} : vector<8x128xbf16>, vector<128x128xbf16>, vector<8x128xf32> -> vector<8x128xf32>
    %c0_113 = arith.constant 0 : index
    %c0_114 = arith.constant 0 : index
    %204 = vector.load %arg9[%c0_113, %c0_114] : memref<1x128xf32, #tpu.memory_space<vmem>>, vector<1x128xf32>
    %205 = vector.broadcast %204 : vector<1x128xf32> to vector<8x128xf32>
    %206 = arith.addf %203, %205 : vector<8x128xf32>
    %c0_115 = arith.constant 0 : index
    %c0_116 = arith.constant 0 : index
    %207 = vector.load %arg10[%c0_115, %c0_116] : memref<8x128xf32, #tpu.memory_space<vmem>>, vector<8x128xf32>
    tpu.vector_store %arg10[%c0_115, %c0_116], %206 {strides = array<i32>} : memref<8x128xf32, #tpu.memory_space<vmem>>, vector<8x128xf32>,
    return
  }
  func.func @transform_0(%arg0: i32) -> (i32, i32, i32) {
    %c0_i32 = arith.constant 0 : i32
    %c0_i32_0 = arith.constant 0 : i32
    %c0_i32_1 = arith.constant 0 : i32
    %c0_i32_2 = arith.constant 0 : i32
    return %c0_i32, %c0_i32_0, %c0_i32_1 : i32, i32, i32
  }
  func.func @transform_1(%arg0: i32) -> (i32, i32) {
    %c0_i32 = arith.constant 0 : i32
    %c0_i32_0 = arith.constant 0 : i32
    %c0_i32_1 = arith.constant 0 : i32
    return %c0_i32, %c0_i32_0 : i32, i32
  }
  func.func @transform_2(%arg0: i32) -> (i32, i32) {
    %c0_i32 = arith.constant 0 : i32
    %c0_i32_0 = arith.constant 0 : i32
    %c0_i32_1 = arith.constant 0 : i32
    return %c0_i32, %c0_i32_0 : i32, i32
  }
  func.func @transform_3(%arg0: i32) -> (i32, i32, i32) {
    %c0_i32 = arith.constant 0 : i32
    %c0_i32_0 = arith.constant 0 : i32
    %c0_i32_1 = arith.constant 0 : i32
    %c0_i32_2 = arith.constant 0 : i32
    return %c0_i32, %c0_i32_0, %c0_i32_1 : i32, i32, i32
  }
  func.func @transform_4(%arg0: i32) -> (i32, i32) {
    %c0_i32 = arith.constant 0 : i32
    %c0_i32_0 = arith.constant 0 : i32
    %c0_i32_1 = arith.constant 0 : i32
    return %c0_i32, %c0_i32_0 : i32, i32
  }
  func.func @transform_5(%arg0: i32) -> (i32, i32) {
    %c0_i32 = arith.constant 0 : i32
    %c0_i32_0 = arith.constant 0 : i32
    %c0_i32_1 = arith.constant 0 : i32
    return %c0_i32, %c0_i32_0 : i32, i32
  }
  func.func @transform_6(%arg0: i32) -> (i32, i32) {
    %c0_i32 = arith.constant 0 : i32
    %c0_i32_0 = arith.constant 0 : i32
    %c0_i32_1 = arith.constant 0 : i32
    return %c0_i32, %c0_i32_0 : i32, i32
  }
  func.func @transform_7(%arg0: i32) -> (i32, i32) {
    %c0_i32 = arith.constant 0 : i32
    %c0_i32_0 = arith.constant 0 : i32
    %c0_i32_1 = arith.constant 0 : i32
    return %c0_i32, %c0_i32_0 : i32, i32
  }
  func.func @transform_8(%arg0: i32) -> (i32, i32) {
    %c0_i32 = arith.constant 0 : i32
    %c0_i32_0 = arith.constant 0 : i32
    %c0_i32_1 = arith.constant 0 : i32
    return %c0_i32, %c0_i32_0 : i32, i32
  }
  func.func @transform_9(%arg0: i32) -> (i32, i32) {
    %c0_i32 = arith.constant 0 : i32
    %c0_i32_0 = arith.constant 0 : i32
    %c0_i32_1 = arith.constant 0 : i32
    return %c0_i32, %c0_i32_0 : i32, i32
  }
}

</mosaic_0001>

<bundles_post_ra>
// kernel: lenet_forward.2
= control target key start
LH: loop header
LB: loop body
LE: loop exit
PB: predicated region body
PF: predicated region fallthrough
CT: control target
= control target key end

     0   :  { %s1115_s12 = smov 0   ;;  %s1117_s13 = smov 0   ;;  %s1271_s0 = inlined_call_operand.vmem [shape: bf16[4,392,32], index: 0, kind: input, shape index: {}]   ;;  %s1272_s1 = inlined_call_operand.vmem [shape: bf16[32,128], index: 1, kind: input, shape index: {}]   ;;  %s1273_s2 = inlined_call_operand.vmem [shape: f32[1,128], index: 2, kind: input, shape index: {}]   ;;  %s1274_s3 = inlined_call_operand.vmem [shape: f32[392,128], index: 3, kind: output, shape index: {}]  }
   0x1   :  { %s1119_s14 = smov 0  }
   0x2 LB: > { %s889_s15 = sadd.s32 4294967295, %s1093_s14   ;;  %s1132_s16 = sadd.s32 1, %s1093_s14   ;;  %s1093_s14 = sphi %s1119_s14, %s1277_s14   ;;  %s1089_s13 = sphi %s1117_s13, %s1276_s13   ;;  %s1085_s12 = sphi %s1115_s12, %s1275_s12  }
   0x3   : > { %s17_s17 = ssub.s32 %s1093_s14, %s1132_s16  ;;  %s20_s18 = sadd.s32 1, %s1089_s13 }
   0x4   : > { %p18_p0 = scmp.eq.s32.totalorder %s17_s17, 0  ;;  %p27_p1 = scmp.ne.s32.totalorder %s1089_s13, %s1085_s12 }
   0x5   : > { %p28_p2 = scmp.eq.s32.totalorder %s1093_s14, 0  ;;  %p892_p4 = scmp.ge.s32.totalorder %s1093_s14, 7 }
   0x6   : > { %s1141_s19 = scalar_select %p18_p0, %s1089_s13, %s20_s18  }
   0x7   : > { %p29_p3 = por %p28_p2, %p27_p1  ;;  %127 = sbr.rel (%p892_p4) target bundleno = 25 (0x19), region = 24 }
   0xc   : > { %130 = sbr.rel (!%p29_p3) target bundleno = 25 (0x19), region = 28  ;;  %s132_s20 = sand.u32 (%p29_p3), 1, %s1089_s13  }
   0xd   : > { %s954_s21 = smul.u32 (%p29_p3), 28, %s1093_s14 }
   0xe   : > { %s1027_s22 = smul.u32 (%p29_p3), 112, %s132_s20 }
   0xf   : > { %s1149_s25 = scalar_lea.vmem (%p29_p3), %s1271_s0, %s954_s21 }
  0x10   : > { %v154_v0 = vld [vmem:[%s1149_s25] sm:$0xff] (%p29_p3)   ;;  %v158_v1 = vld [vmem:[%s1149_s25 + $0x8] sm:$0xff] (%p29_p3)   ;;  %v162_v2 = vld [vmem:[%s1149_s25 + $0x10] sm:$0xff] (%p29_p3)   ;;  %s134_s26 = scalar_lea.vmem (%p29_p3), [#allocation2], %s1027_s22 }
  0x11   : > { %155 = vst [vmem:[%s134_s26] sm:$0xff] %v154_v0   ;;  %159 = vst [vmem:[%s134_s26 + $0x8] sm:$0xff] %v158_v1   ;;  %v166_v3 = vld [vmem:[%s1149_s25 + $0x18] sm:$0xf]  ;;  %v168_v4 = vld [vmem:[%s1149_s25 + $0xc4] sm:$0xff]  }
  0x12   : > { %163 = vst [vmem:[%s134_s26 + $0x10] sm:$0xff] %v162_v2   ;;  %v172_v5 = vld [vmem:[%s1149_s25 + $0xcc] sm:$0xff]   ;;  %167 = vst [vmem:[%s134_s26 + $0x18] sm:$0xf] %v166_v3  ;;  %v176_v6 = vld [vmem:[%s1149_s25 + $0xd4] sm:$0xff]  }
  0x13   : > { %169 = vst [vmem:[%s134_s26 + $0x1c] sm:$0xff] %v168_v4   ;;  %173 = vst [vmem:[%s134_s26 + $0x24] sm:$0xff] %v172_v5   ;;  %v180_v7 = vld [vmem:[%s1149_s25 + $0xdc] sm:$0xf]  ;;  %v182_v8 = vld [vmem:[%s1149_s25 + $0x188] sm:$0xff]  }
  0x14   : > { %177 = vst [vmem:[%s134_s26 + $0x2c] sm:$0xff] %v176_v6   ;;  %181 = vst [vmem:[%s134_s26 + $0x34] sm:$0xf] %v180_v7  ;;  %v186_v9 = vld [vmem:[%s1149_s25 + $0x190] sm:$0xff]   ;;  %v190_v10 = vld [vmem:[%s1149_s25 + $0x198] sm:$0xff]  }
  0x15   : > { %183 = vst [vmem:[%s134_s26 + $0x38] sm:$0xff] %v182_v8   ;;  %v194_v11 = vld [vmem:[%s1149_s25 + $0x1a0] sm:$0xf]  ;;  %187 = vst [vmem:[%s134_s26 + $0x40] sm:$0xff] %v186_v9   ;;  %v196_v12 = vld [vmem:[%s1149_s25 + $0x24c] sm:$0xff]  }
  0x16   : > { %191 = vst [vmem:[%s134_s26 + $0x48] sm:$0xff] %v190_v10   ;;  %195 = vst [vmem:[%s134_s26 + $0x50] sm:$0xf] %v194_v11  ;;  %v200_v13 = vld [vmem:[%s1149_s25 + $0x254] sm:$0xff]   ;;  %v204_v14 = vld [vmem:[%s1149_s25 + $0x25c] sm:$0xff]  }
  0x17   : > { %197 = vst [vmem:[%s134_s26 + $0x54] sm:$0xff] %v196_v12   ;;  %201 = vst [vmem:[%s134_s26 + $0x5c] sm:$0xff] %v200_v13   ;;  %v208_v15 = vld [vmem:[%s1149_s25 + $0x264] sm:$0xf] }
  0x18   : > { %205 = vst [vmem:[%s134_s26 + $0x64] sm:$0xff] %v204_v14   ;;  %209 = vst [vmem:[%s134_s26 + $0x6c] sm:$0xf] %v208_v15 }
  0x19 PF: > { %p894_p5 = scmp.ge.s32.totalorder %s1093_s14, 1  ;;  %p288_p6 = scmp.lt.s32.totalorder %s1093_s14, 8 }
  0x1b   : > { %p289_p7 = pnand %p894_p5, %p288_p6 }
  0x1c   : > { %s295_s29 = sand.u32 (!%p289_p7), 1, %s1085_s12   ;;  %s319_s9 = smul.u32 (!%p289_p7), 7, %s889_s15 }
  0x1d   : > { %292 = sbr.rel (%p289_p7) target bundleno = 277 (0x115), region = 69 }
  0x1e   : > { %s1028_s5 = smul.u32 (!%p289_p7), 112, %s295_s29  ;;  %p320_p8 = scmp.lt.s32.totalorder (!%p289_p7), %s319_s9, 48 }
  0x20   : > { %s1176_s6 = scalar_lea.vmem (!%p289_p7), [#allocation2], %s1028_s5 }
  0x22   : > { %v1053_v16 = vld [vmem:[%s1272_s1 + $0x8] sm:$0xff]   ;;  %v1054_v17 = vld [vmem:[%s1272_s1] sm:$0xff]   ;;  %vm374_vm0 = vcmask 261120   ;;  %s1279_s9 = smov (!%p320_p8, %s319_s9), 48 }
  0x23   : > { %979 = vmatprep.subr.bf16.mxu0 %v1053_v16  ;;  %991 = vmatprep.subr.bf16.mxu1 %v1053_v16  ;;  %v1055_v18 = vld [vmem:[%s1176_s6] sm:$0xff]   ;;  %v1057_v20 = vld [vmem:[%s1176_s6 + $0x8] sm:$0xff]   ;;  %v1059_v22 = vld [vmem:[%s1176_s6 + $0x10] sm:$0xff]   ;;  %s895_s10 = sshll.u32 %s1279_s9, 3 }
  0x24   : > { %980 = vmatpush3.bf16.msra.mxu0 %v1053_v16  ;;  %992 = vmatpush3.bf16.msra.mxu1 %v1053_v16  ;;  %v1056_v19 = vld [vmem:[%s1176_s6 + $0x1c] sm:$0xff]   ;;  %v1058_v21 = vld [vmem:[%s1176_s6 + $0x24] sm:$0xff]   ;;  %v1060_v23 = vld [vmem:[%s1176_s6 + $0x2c] sm:$0xff]   ;;  %s1244_s14 = scalar_lea.vmem %s1274_s3, %s895_s10 }
  0x25   : > { %981 = vmatprep.subr.bf16.mxu0 %v1054_v17  ;;  %993 = vmatprep.subr.bf16.mxu1 %v1054_v17  ;;  %v1061_v24 = vld [vmem:[%s1176_s6 + $0x18] ss:$0 sps:$4 sm:$0xff]   ;;  %v1062_v25 = vld [vmem:[%s1176_s6 + $0x34] ss:$0 sps:$4 sm:$0xff]   ;;  %v1065_v28 = vld [vmem:[%s1176_s6 + $0x40] sm:$0xff]  }
  0x26   : > { %983 = vmatprep.mubr.msk.bf16.mxu0 %vm374_vm0, %v1055_v18  ;;  %995 = vmatprep.mubr.msk.bf16.mxu1 %vm374_vm0, %v1056_v19  ;;  %v1063_v26 = vld [vmem:[%s1176_s6 + $0x38] sm:$0xff]   ;;  %v1067_v30 = vld [vmem:[%s1176_s6 + $0x48] sm:$0xff]   ;;  %v1069_v32 = vld [vmem:[%s1176_s6 + $0x50] ss:$0 sps:$4 sm:$0xff]  }
  0x27   : > { %v1064_v27 = vld [vmem:[%s1176_s6 + $0x54] sm:$0xff]   ;;  %v1066_v29 = vld [vmem:[%s1176_s6 + $0x5c] sm:$0xff]   ;;  %v1068_v31 = vld [vmem:[%s1176_s6 + $0x64] sm:$0xff]  }
  0x28   : > { %982 = vmatpush3.bf16.msra.mxu0 %v1054_v17  ;;  %994 = vmatpush3.bf16.msra.mxu1 %v1054_v17  ;;  %v1070_v33 = vld [vmem:[%s1176_s6 + $0x6c] ss:$0 sps:$4 sm:$0xff]   ;;  %v1213_v42 = vld [vmem:[%s1273_s2] ss:$0 sm:$0xff] }
  0x29   : > { %1003 = vmatprep.subr.bf16.mxu0 %v1053_v16  ;;  %1015 = vmatprep.subr.bf16.mxu1 %v1053_v16 }
  0x2b   : > { %984 = vmatmul.mubr.msk.bf16.vlgmr.msra.gmra.mxu0 %vm374_vm0, %v1057_v20  ;;  %996 = vmatmul.mubr.msk.bf16.vlgmr.msra.gmra.mxu1 %vm374_vm0, %v1058_v21 }
  0x2c   : > { %1004 = vmatpush3.bf16.msra.mxu0 %v1053_v16  ;;  %1016 = vmatpush3.bf16.msra.mxu1 %v1053_v16 }
  0x2d   : > { %987 = vmatprep.mubr.msk.bf16.mxu0 %vm374_vm0, %v1059_v22  ;;  %999 = vmatprep.mubr.msk.bf16.mxu1 %vm374_vm0, %v1060_v23 }
  0x2e   : > { %1005 = vmatprep.subr.bf16.mxu0 %v1054_v17  ;;  %1017 = vmatprep.subr.bf16.mxu1 %v1054_v17 }
  0x30   : > { %1006 = vmatpush3.bf16.msra.mxu0 %v1054_v17  ;;  %1018 = vmatpush3.bf16.msra.mxu1 %v1054_v17 }
  0x33   : > { %988 = vmatmul.mubr.msk.bf16.gmra.mxu0 %vm374_vm0, %v1061_v24  ;;  %1000 = vmatmul.mubr.msk.bf16.gmra.mxu1 %vm374_vm0, %v1062_v25 }
  0x34   : > { %1007 = vmatprep.mubr.msk.bf16.mxu0 %vm374_vm0, %v1063_v26  ;;  %1019 = vmatprep.mubr.msk.bf16.mxu1 %vm374_vm0, %v1064_v27 }
  0x3b   : > { %1008 = vmatmul.mubr.msk.bf16.vlgmr.msra.gmra.mxu0 %vm374_vm0, %v1065_v28  ;;  %1020 = vmatmul.mubr.msk.bf16.vlgmr.msra.gmra.mxu1 %vm374_vm0, %v1066_v29 }
  0x3c   : > { %1011 = vmatprep.mubr.msk.bf16.mxu0 %vm374_vm0, %v1067_v30  ;;  %1023 = vmatprep.mubr.msk.bf16.mxu1 %vm374_vm0, %v1068_v31 }
  0x43   : > { %1012 = vmatmul.mubr.msk.bf16.gmra.mxu0 %vm374_vm0, %v1069_v32  ;;  %1024 = vmatmul.mubr.msk.bf16.gmra.mxu1 %vm374_vm0, %v1070_v33 }
  0xeb   : > { %v985_v34 = vpop.f32.mrf.mxu0  ;;  %v997_v35 = vpop.f32.mrf.mxu1 }
  0xec   : > { %v430_v47 = vadd.f32 %v985_v34, %v1213_v42  ;;  %v546_v48 = vadd.f32 %v997_v35, %v1213_v42 }
  0xed   : > { %v421_v36 = vpop.f32.mrf.mxu0  ;;  %v537_v37 = vpop.f32.mrf.mxu1 }
  0xee   : > { %v422_v49 = vadd.f32 %v1213_v42, %v421_v36  ;;  %v538_v50 = vadd.f32 %v1213_v42, %v537_v37  ;;  %v453_v61 = vmax.f32 %v430_v47, 0.0  ;;  %v569_v62 = vmax.f32 %v546_v48, 0.0 }
  0xef   : > { %v986_v38 = vpop.f32.mrf.mxu0  ;;  %v998_v39 = vpop.f32.mrf.mxu1 }
  0xf0   : > { %v433_v51 = vadd.f32 %v986_v38, %v1213_v42  ;;  %v549_v52 = vadd.f32 %v998_v39, %v1213_v42  ;;  %v451_v63 = vmax.f32 %v422_v49, 0.0  ;;  %v567_v0 = vmax.f32 %v538_v50, 0.0 }
  0xf1   : > { %v424_v40 = vpop.f32.mrf.mxu0  ;;  %v540_v41 = vpop.f32.mrf.mxu1  ;;  %v576_v15 = vadd.f32 %v569_v62, %v453_v61 }
  0xf2   : > { %v425_v53 = vadd.f32 %v1213_v42, %v424_v40  ;;  %v541_v54 = vadd.f32 %v1213_v42, %v540_v41  ;;  %v454_v1 = vmax.f32 %v433_v51, 0.0  ;;  %v570_v2 = vmax.f32 %v549_v52, 0.0 }
  0xf3   : > { %v989_v43 = vpop.f32.mrf.mxu0  ;;  %v1001_v44 = vpop.f32.mrf.mxu1  ;;  %v574_v19 = vadd.f32 %v567_v0, %v451_v63 }
  0xf4   : > { %v446_v57 = vadd.f32 %v989_v43, %v1213_v42  ;;  %v562_v58 = vadd.f32 %v1001_v44, %v1213_v42  ;;  %v452_v3 = vmax.f32 %v425_v53, 0.0  ;;  %v568_v4 = vmax.f32 %v541_v54, 0.0 }
  0xf5   : > { %v437_v45 = vpop.f32.mrf.mxu0  ;;  %v553_v46 = vpop.f32.mrf.mxu1  ;;  %v577_v20 = vadd.f32 %v570_v2, %v454_v1 }
  0xf6   : > { %v457_v9 = vmax.f32 %v446_v57, 0.0  ;;  %v573_v10 = vmax.f32 %v562_v58, 0.0  ;;  %v438_v11 = vadd.f32 %v1213_v42, %v437_v45  ;;  %v554_v12 = vadd.f32 %v1213_v42, %v553_v46 }
  0xf7   : > { %v990_v55 = vpop.f32.mrf.mxu0  ;;  %v1002_v56 = vpop.f32.mrf.mxu1  ;;  %v575_v21 = vadd.f32 %v568_v4, %v452_v3 }
  0xf8   : > { %v580_v29 = vadd.f32 %v573_v10, %v457_v9  ;;  %v455_v30 = vmax.f32 %v438_v11, 0.0  ;;  %v571_v31 = vmax.f32 %v554_v12, 0.0 }
  0xf9   : > { %v440_v59 = vpop.f32.mrf.mxu0  ;;  %v556_v60 = vpop.f32.mrf.mxu1 }
  0xfa   : > { %v441_v32 = vadd.f32 %v1213_v42, %v440_v59  ;;  %v557_v39 = vadd.f32 %v1213_v42, %v556_v60  ;;  %v578_v50 = vadd.f32 %v571_v31, %v455_v30 }
  0xfb   : > { %v1009_v5 = vpop.f32.mrf.mxu0  ;;  %v1021_v6 = vpop.f32.mrf.mxu1 }
  0xfc   : > { %v662_v7 = vadd.f32 %v1009_v5, %v1213_v42  ;;  %v778_v8 = vadd.f32 %v1021_v6, %v1213_v42  ;;  %v456_v51 = vmax.f32 %v441_v32, 0.0  ;;  %v572_v2 = vmax.f32 %v557_v39, 0.0 }
  0xfd   : > { %v653_v13 = vpop.f32.mrf.mxu0  ;;  %v769_v14 = vpop.f32.mrf.mxu1 }
  0xfe   : > { %v685_v16 = vmax.f32 %v662_v7, 0.0  ;;  %v801_v17 = vmax.f32 %v778_v8, 0.0  ;;  %v654_v18 = vadd.f32 %v1213_v42, %v653_v13  ;;  %v770_v22 = vadd.f32 %v1213_v42, %v769_v14 }
  0xff   : > { %v1010_v23 = vpop.f32.mrf.mxu0  ;;  %v1022_v24 = vpop.f32.mrf.mxu1 }
 0x100   : > { %v692_v25 = vadd.f32 %v685_v16, %v576_v15  ;;  %v683_v26 = vmax.f32 %v654_v18, 0.0  ;;  %v665_v27 = vadd.f32 %v1010_v23, %v1213_v42  ;;  %v781_v28 = vadd.f32 %v1022_v24, %v1213_v42 }
 0x101   : > { %v656_v33 = vpop.f32.mrf.mxu0  ;;  %v772_v34 = vpop.f32.mrf.mxu1  ;;  %v799_v37 = vmax.f32 %v770_v22, 0.0  ;;  %v579_v15 = vadd.f32 %v572_v2, %v456_v51 }
 0x102   : > { %v808_v35 = vadd.f32 %v801_v17, %v692_v25  ;;  %v690_v36 = vadd.f32 %v683_v26, %v574_v19  ;;  %v686_v38 = vmax.f32 %v665_v27, 0.0  ;;  %v802_v40 = vmax.f32 %v781_v28, 0.0 }
 0x103   : > { %v657_v41 = vadd.f32 %v1213_v42, %v656_v33  ;;  %v773_v43 = vadd.f32 %v1213_v42, %v772_v34  ;;  %v1013_v44 = vpop.f32.mrf.mxu0  ;;  %v1025_v45 = vpop.f32.mrf.mxu1 }
 0x104   : > { %v815_v46 = vmul.f32 0.25, %v808_v35  ;;  %v806_v47 = vadd.f32 %v799_v37, %v690_v36  ;;  %v693_v48 = vadd.f32 %v686_v38, %v577_v20  ;;  %v678_v49 = vadd.f32 %v1013_v44, %v1213_v42 }
 0x105   : > { %v684_v52 = vmax.f32 %v657_v41, 0.0  ;;  %v794_v53 = vadd.f32 %v1025_v45, %v1213_v42  ;;  %v669_v54 = vpop.f32.mrf.mxu0  ;;  %v785_v55 = vpop.f32.mrf.mxu1  ;;  %v800_v61 = vmax.f32 %v773_v43, 0.0 }
 0x106   : > { %822 = vst [vmem:[%s1244_s14 + $0x10] sm:$0xff] %v815_v46  ;;  %v813_v56 = vmul.f32 0.25, %v806_v47  ;;  %v809_v57 = vadd.f32 %v802_v40, %v693_v48  ;;  %v689_v58 = vmax.f32 %v678_v49, 0.0  ;;  %v670_v59 = vadd.f32 %v1213_v42, %v669_v54 }
 0x107   : > { %v691_v60 = vadd.f32 %v684_v52, %v575_v21  ;;  %v805_v62 = vmax.f32 %v794_v53, 0.0  ;;  %v786_v63 = vadd.f32 %v1213_v42, %v785_v55  ;;  %v1014_v0 = vpop.f32.mrf.mxu0  ;;  %v1026_v1 = vpop.f32.mrf.mxu1 }
 0x108   : > { %820 = vst [vmem:[%s1244_s14] sm:$0xff] %v813_v56  ;;  %v816_v3 = vmul.f32 0.25, %v809_v57  ;;  %v696_v4 = vadd.f32 %v689_v58, %v580_v29  ;;  %v687_v5 = vmax.f32 %v670_v59, 0.0 }
 0x109   : > { %v807_v6 = vadd.f32 %v800_v61, %v691_v60  ;;  %v803_v7 = vmax.f32 %v786_v63, 0.0  ;;  %v672_v8 = vpop.f32.mrf.mxu0  ;;  %v788_v9 = vpop.f32.mrf.mxu1 }
 0x10a   : > { %823 = vst [vmem:[%s1244_s14 + $0x18] sm:$0xff] %v816_v3  ;;  %v812_v10 = vadd.f32 %v805_v62, %v696_v4  ;;  %v694_v11 = vadd.f32 %v687_v5, %v578_v50  ;;  %v673_v12 = vadd.f32 %v1213_v42, %v672_v8  ;;  %v789_v13 = vadd.f32 %v1213_v42, %v788_v9 }
 0x10b   : > { %v814_v14 = vmul.f32 0.25, %v807_v6 }
 0x10c   : > { %v819_v16 = vmul.f32 0.25, %v812_v10  ;;  %v810_v17 = vadd.f32 %v803_v7, %v694_v11  ;;  %v688_v18 = vmax.f32 %v673_v12, 0.0  ;;  %v804_v21 = vmax.f32 %v789_v13, 0.0 }
 0x10d   : > { %821 = vst [vmem:[%s1244_s14 + $0x8] sm:$0xff] %v814_v14 }
 0x10e   : > { %826 = vst [vmem:[%s1244_s14 + $0x30] sm:$0xff] %v819_v16  ;;  %v817_v19 = vmul.f32 0.25, %v810_v17  ;;  %v695_v20 = vadd.f32 %v688_v18, %v579_v15 }
 0x110   : > { %824 = vst [vmem:[%s1244_s14 + $0x20] sm:$0xff] %v817_v19  ;;  %v811_v22 = vadd.f32 %v804_v21, %v695_v20 }
 0x112   : > { %v818_v23 = vmul.f32 0.25, %v811_v22 }
 0x114   : > { %825 = vst [vmem:[%s1244_s14 + $0x28] sm:$0xff] %v818_v23 }
 0x115 PF: > { %p10_p9 = scmp.ge.s32.totalorder %s1132_s16, 9   ;;  %s1275_s12 = smov %s1089_s13 }
 0x116   : > { %s1276_s13 = smov %s1141_s19  ;;  %s1277_s14 = smov %s1132_s16 }
 0x117   :  { %12 = sbr.rel (!%p10_p9) target bundleno = 2 (0x2), region = 111 }

// kernel: lenet_forward.3
= control target key start
LH: loop header
LB: loop body
LE: loop exit
PB: predicated region body
PF: predicated region fallthrough
CT: control target
= control target key end

     0   :  { %v6526_v0 = vmov 0   ;;  %vm259_vm0 = vcmask 261120   ;;  %v6527_v63 = vmov 0.0   ;;  %vm6528_vm1 = vmmov 0   ;;  %s8245_s1 = inlined_call_operand.vmem [shape: bf16[160,128], index: 1, kind: input, shape index: {}]   ;;  %s8246_s0 = inlined_call_operand.vmem [shape: bf16[4,200,160], index: 0, kind: input, shape index: {}]   ;;  %s8247_s3 = inlined_call_operand.vmem [shape: bf16[25,128,128], index: 3, kind: input, shape index: {}]   ;;  %s8248_s2 = inlined_call_operand.vmem [shape: f32[1,128], index: 2, kind: input, shape index: {}]   ;;  %s8249_s5 = inlined_call_operand.vmem [shape: bf16[128,128], index: 5, kind: input, shape index: {}]   ;;  %s8250_s7 = inlined_call_operand.vmem [shape: bf16[128,128], index: 7, kind: input, shape index: {}]   ;;  %s8251_s4 = inlined_call_operand.vmem [shape: f32[1,128], index: 4, kind: input, shape index: {}]   ;;  %s8252_s6 = inlined_call_operand.vmem [shape: f32[1,128], index: 6, kind: input, shape index: {}]   ;;  %s8253_s8 = inlined_call_operand.vmem [shape: f32[1,128], index: 8, kind: input, shape index: {}]   ;;  %s8254_s9 = inlined_call_operand.vmem [shape: f32[8,128], index: 9, kind: output, shape index: {}]  }
   0x1   :  { %299 = vmatprep.subr.bf16.mxu0 %v6526_v0  ;;  %664 = vmatprep.subr.bf16.mxu1 %v6526_v0  ;;  %v6147_v1 = vld [vmem:[%s8245_s1 + $0x38] sm:$0xff]   ;;  %v6587_v2 = vld [vmem:[%s8245_s1 + $0x30] sm:$0xff]   ;;  %v6596_v3 = vld [vmem:[%s8245_s1 + $0x28] sm:$0xff]  }
   0x2   :  { %300 = vmatpush1.bf16.msra.mxu0 %v6147_v1  ;;  %665 = vmatpush1.bf16.msra.mxu1 %v6147_v1  ;;  %v6605_v4 = vld [vmem:[%s8245_s1 + $0x20] sm:$0xff]   ;;  %v6162_v6 = vld [vmem:[%s8246_s0 + $0xcc] ss:$8 sps:$4 sm:$0xff]   ;;  %v6621_v7 = vld [vmem:[%s8245_s1 + $0x18] sm:$0xff]  }
   0x3   :  { %301 = vmatprep.subr.bf16.mxu0 %v6526_v0  ;;  %666 = vmatprep.subr.bf16.mxu1 %v6526_v0  ;;  %v6159_v5 = vld [vmem:[%s8246_s0 + $0x4] ss:$8 sps:$4 sm:$0xff]   ;;  %v6631_v8 = vld [vmem:[%s8245_s1 + $0x10] sm:$0xff]   ;;  %v6157_v13 = vld [vmem:[%s8246_s0] ss:$8 sps:$4 sm:$0xff]  }
   0x4   :  { %4553 = vmatprep.mubr.msk.bf16.mxu0 %vm259_vm0, %v6159_v5  ;;  %4617 = vmatprep.mubr.msk.bf16.mxu1 %vm259_vm0, %v6162_v6  ;;  %v6640_v9 = vld [vmem:[%s8245_s1 + $0x8] sm:$0xff]   ;;  %v6649_v10 = vld [vmem:[%s8245_s1] sm:$0xff]   ;;  %v6163_v15 = vld [vmem:[%s8246_s0 + $0x14] ss:$8 sps:$4 sm:$0xff]  }
   0x5   :  { %v6658_v11 = vld [vmem:[%s8245_s1 + $0x48] sm:$0xff]   ;;  %v6667_v12 = vld [vmem:[%s8245_s1 + $0x40] sm:$0xff]   ;;  %v6167_v17 = vld [vmem:[%s8246_s0 + $0x10] ss:$8 sps:$4 sm:$0xff]  }
   0x6   :  { %302 = vmatpush1.bf16.msra.mxu0 %v6587_v2  ;;  %667 = vmatpush1.bf16.msra.mxu1 %v6587_v2  ;;  %v6160_v14 = vld [vmem:[%s8246_s0 + $0xc8] ss:$8 sps:$4 sm:$0xff]   ;;  %v6165_v16 = vld [vmem:[%s8246_s0 + $0xdc] ss:$8 sps:$4 sm:$0xff]   ;;  %v6168_v18 = vld [vmem:[%s8246_s0 + $0xd8] ss:$8 sps:$4 sm:$0xff]  }
   0x7   :  { %303 = vmatprep.subr.bf16.mxu0 %v6526_v0  ;;  %668 = vmatprep.subr.bf16.mxu1 %v6526_v0  ;;  %v6169_v19 = vld [vmem:[%s8246_s0 + $0x24] ss:$8 sps:$4 sm:$0xff]   ;;  %v6173_v21 = vld [vmem:[%s8246_s0 + $0x20] ss:$8 sps:$4 sm:$0xff]   ;;  %v6175_v23 = vld [vmem:[%s8246_s0 + $0x34] ss:$8 sps:$4 sm:$0xff]  }
   0x8   :  { %v6171_v20 = vld [vmem:[%s8246_s0 + $0xec] ss:$8 sps:$4 sm:$0xff]   ;;  %v6174_v22 = vld [vmem:[%s8246_s0 + $0xe8] ss:$8 sps:$4 sm:$0xff]   ;;  %v6177_v24 = vld [vmem:[%s8246_s0 + $0xfc] ss:$8 sps:$4 sm:$0xff]  }
   0x9   :  { %v6179_v25 = vld [vmem:[%s8246_s0 + $0x30] ss:$8 sps:$4 sm:$0xff]   ;;  %v6181_v27 = vld [vmem:[%s8246_s0 + $0x44] ss:$8 sps:$4 sm:$0xff]   ;;  %v6185_v29 = vld [vmem:[%s8246_s0 + $0x40] ss:$8 sps:$4 sm:$0xff]  }
   0xa   :  { %304 = vmatpush1.bf16.msra.mxu0 %v6596_v3  ;;  %669 = vmatpush1.bf16.msra.mxu1 %v6596_v3  ;;  %v6180_v26 = vld [vmem:[%s8246_s0 + $0xf8] ss:$8 sps:$4 sm:$0xff]   ;;  %v6183_v28 = vld [vmem:[%s8246_s0 + $0x10c] ss:$8 sps:$4 sm:$0xff]   ;;  %v6186_v30 = vld [vmem:[%s8246_s0 + $0x108] ss:$8 sps:$4 sm:$0xff]  }
   0xb   :  { %305 = vmatprep.subr.bf16.mxu0 %v6526_v0  ;;  %670 = vmatprep.subr.bf16.mxu1 %v6526_v0  ;;  %v6187_v31 = vld [vmem:[%s8246_s0 + $0x54] ss:$8 sps:$4 sm:$0xff]   ;;  %v6191_v33 = vld [vmem:[%s8246_s0 + $0x50] ss:$8 sps:$4 sm:$0xff]   ;;  %v6193_v35 = vld [vmem:[%s8246_s0 + $0x64] ss:$8 sps:$4 sm:$0xff]  }
   0xc   :  { %v6189_v32 = vld [vmem:[%s8246_s0 + $0x11c] ss:$8 sps:$4 sm:$0xff]   ;;  %v6192_v34 = vld [vmem:[%s8246_s0 + $0x118] ss:$8 sps:$4 sm:$0xff]   ;;  %v6195_v36 = vld [vmem:[%s8246_s0 + $0x12c] ss:$8 sps:$4 sm:$0xff]  }
   0xd   :  { %v6197_v37 = vld [vmem:[%s8246_s0 + $0x60] ss:$8 sps:$4 sm:$0xff]   ;;  %v6199_v39 = vld [vmem:[%s8246_s0 + $0x74] ss:$8 sps:$4 sm:$0xff]   ;;  %v6203_v41 = vld [vmem:[%s8246_s0 + $0x70] ss:$8 sps:$4 sm:$0xff]  }
   0xe   :  { %306 = vmatpush1.bf16.msra.mxu0 %v6605_v4  ;;  %671 = vmatpush1.bf16.msra.mxu1 %v6605_v4  ;;  %v6198_v38 = vld [vmem:[%s8246_s0 + $0x128] ss:$8 sps:$4 sm:$0xff]   ;;  %v6201_v40 = vld [vmem:[%s8246_s0 + $0x13c] ss:$8 sps:$4 sm:$0xff]   ;;  %v6204_v42 = vld [vmem:[%s8246_s0 + $0x138] ss:$8 sps:$4 sm:$0xff]  }
   0xf   :  { %307 = vmatprep.subr.bf16.mxu0 %v6526_v0  ;;  %672 = vmatprep.subr.bf16.mxu1 %v6526_v0  ;;  %v6205_v43 = vld [vmem:[%s8246_s0 + $0x84] ss:$8 sps:$4 sm:$0xff]   ;;  %v6209_v45 = vld [vmem:[%s8246_s0 + $0x80] ss:$8 sps:$4 sm:$0xff]   ;;  %v6211_v47 = vld [vmem:[%s8246_s0 + $0x94] ss:$8 sps:$4 sm:$0xff]  }
  0x10   :  { %v6207_v44 = vld [vmem:[%s8246_s0 + $0x14c] ss:$8 sps:$4 sm:$0xff]   ;;  %v6210_v46 = vld [vmem:[%s8246_s0 + $0x148] ss:$8 sps:$4 sm:$0xff]   ;;  %v6213_v48 = vld [vmem:[%s8246_s0 + $0x15c] ss:$8 sps:$4 sm:$0xff]  }
  0x11   :  { %v6215_v49 = vld [vmem:[%s8246_s0 + $0x90] ss:$8 sps:$4 sm:$0xff]   ;;  %v6217_v51 = vld [vmem:[%s8246_s0 + $0xa4] ss:$8 sps:$4 sm:$0xff]   ;;  %v6221_v53 = vld [vmem:[%s8246_s0 + $0xa0] ss:$8 sps:$4 sm:$0xff]  }
  0x12   :  { %308 = vmatpush1.bf16.msra.mxu0 %v6621_v7  ;;  %673 = vmatpush1.bf16.msra.mxu1 %v6621_v7  ;;  %v6216_v50 = vld [vmem:[%s8246_s0 + $0x158] ss:$8 sps:$4 sm:$0xff]   ;;  %v6219_v52 = vld [vmem:[%s8246_s0 + $0x16c] ss:$8 sps:$4 sm:$0xff]   ;;  %v6222_v54 = vld [vmem:[%s8246_s0 + $0x168] ss:$8 sps:$4 sm:$0xff]  }
  0x13   :  { %309 = vmatprep.subr.bf16.mxu0 %v6526_v0  ;;  %674 = vmatprep.subr.bf16.mxu1 %v6526_v0  ;;  %v6223_v55 = vld [vmem:[%s8246_s0 + $0xb4] ss:$8 sps:$4 sm:$0xff]   ;;  %v78_v57 = vld [vmem:[%s8246_s0 + $0xc0] sm:$0xff]  ;;  %v4590_v58 = vld [vmem:[%s8246_s0 + $0x188] sm:$0xff] }
  0x14   :  { %v6225_v56 = vld [vmem:[%s8246_s0 + $0x17c] ss:$8 sps:$4 sm:$0xff]   ;;  %v6227_v59 = vld [vmem:[%s8246_s0 + $0xb0] ss:$8 sps:$4 sm:$0xff]   ;;  %v4542_v61 = vcombine.high %v78_v57, %v78_v57  ;;  %v4616_v62 = vcombine.high %v4590_v58, %v4590_v58 }
  0x15   :  { %v6228_v60 = vld [vmem:[%s8246_s0 + $0x178] ss:$8 sps:$4 sm:$0xff]   ;;  %v6239_v6 = vld [vmem:[%s8246_s0 + $0x1a4] ss:$8 sps:$4 sm:$0xff]  }
  0x16   :  { %310 = vmatpush1.bf16.msra.mxu0 %v6631_v8  ;;  %675 = vmatpush1.bf16.msra.mxu1 %v6631_v8  ;;  %v6236_v5 = vld [vmem:[%s8246_s0 + $0x258] ss:$8 sps:$4 sm:$0xff]  }
  0x17   :  { %311 = vmatprep.subr.bf16.mxu0 %v6526_v0  ;;  %676 = vmatprep.subr.bf16.mxu1 %v6526_v0 }
  0x1a   :  { %312 = vmatpush1.bf16.msra.mxu0 %v6640_v9  ;;  %677 = vmatpush1.bf16.msra.mxu1 %v6640_v9 }
  0x1b   :  { %313 = vmatprep.subr.bf16.mxu0 %v6526_v0  ;;  %678 = vmatprep.subr.bf16.mxu1 %v6526_v0 }
  0x1e   :  { %314 = vmatpush1.bf16.msra.mxu0 %v6649_v10  ;;  %679 = vmatpush1.bf16.msra.mxu1 %v6649_v10 }
  0x1f   :  { %327 = vmatprep.subr.bf16.mxu0 %v6526_v0  ;;  %692 = vmatprep.subr.bf16.mxu1 %v6526_v0 }
  0x22   :  { %328 = vmatpush2.bf16.msra.mxu0 %v6658_v11  ;;  %693 = vmatpush2.bf16.msra.mxu1 %v6658_v11 }
  0x23   :  { %329 = vmatprep.subr.bf16.mxu0 %v6526_v0  ;;  %694 = vmatprep.subr.bf16.mxu1 %v6526_v0 }
  0x26   :  { %330 = vmatpush2.bf16.msra.mxu0 %v6667_v12  ;;  %695 = vmatpush2.bf16.msra.mxu1 %v6667_v12 }
  0x27   :  { %1029 = vmatprep.subr.bf16.mxu0 %v6526_v0  ;;  %1394 = vmatprep.subr.bf16.mxu1 %v6526_v0 }
  0x29   :  { %332 = vmatmul.mubr.bf16.vlgmr.msra.gmra.mxu0 %v6157_v13  ;;  %697 = vmatmul.mubr.bf16.vlgmr.msra.gmra.mxu1 %v6160_v14  ;;  %v6248_v13 = vld [vmem:[%s8246_s0 + $0x27c] ss:$8 sps:$4 sm:$0xff]   ;;  %v6311_v14 = vld [vmem:[%s8247_s3 + $0x68] sm:$0xff]  }
  0x2a   :  { %1030 = vmatpush1.bf16.msra.mxu0 %v6147_v1  ;;  %1395 = vmatpush1.bf16.msra.mxu1 %v6147_v1  ;;  %v6238_v1 = vld [vmem:[%s8246_s0 + $0x25c] ss:$8 sps:$4 sm:$0xff]  }
  0x2b   :  { %4554 = vmatprep.mubr.msk.bf16.mxu0 %vm259_vm0, %v6163_v15  ;;  %4618 = vmatprep.mubr.msk.bf16.mxu1 %vm259_vm0, %v6165_v16  ;;  %v6247_v15 = vld [vmem:[%s8246_s0 + $0x1b0] ss:$8 sps:$4 sm:$0xff]  }
  0x2c   :  { %1031 = vmatprep.subr.bf16.mxu0 %v6526_v0  ;;  %1396 = vmatprep.subr.bf16.mxu1 %v6526_v0  ;;  %v6250_v16 = vld [vmem:[%s8246_s0 + $0x278] ss:$8 sps:$4 sm:$0xff]  }
  0x2e   :  { %1032 = vmatpush1.bf16.msra.mxu0 %v6587_v2  ;;  %1397 = vmatpush1.bf16.msra.mxu1 %v6587_v2  ;;  %v4541_v2 = vcombine.low %v78_v57, %v78_v57  ;;  %v6323_v57 = vld [vmem:[%s8247_s3 + $0x8] sm:$0xff]  }
  0x2f   :  { %1033 = vmatprep.subr.bf16.mxu0 %v6526_v0  ;;  %1398 = vmatprep.subr.bf16.mxu1 %v6526_v0 }
  0x31   :  { %340 = vmatmul.mubr.bf16.gmra.mxu0 %v6167_v17  ;;  %705 = vmatmul.mubr.bf16.gmra.mxu1 %v6168_v18  ;;  %v6251_v17 = vld [vmem:[%s8246_s0 + $0x1c4] ss:$8 sps:$4 sm:$0xff]  }
  0x32   :  { %4555 = vmatprep.mubr.msk.bf16.mxu0 %vm259_vm0, %v6169_v19  ;;  %4619 = vmatprep.mubr.msk.bf16.mxu1 %vm259_vm0, %v6171_v20  ;;  %v6254_v18 = vld [vmem:[%s8246_s0 + $0x28c] ss:$8 sps:$4 sm:$0xff]   ;;  %v6312_v19 = vld [vmem:[%s8247_s3 + $0x38] sm:$0xff]   ;;  %v6253_v20 = vld [vmem:[%s8246_s0 + $0x1c0] ss:$8 sps:$4 sm:$0xff]  }
  0x33   :  { %1034 = vmatpush1.bf16.msra.mxu0 %v6596_v3  ;;  %1399 = vmatpush1.bf16.msra.mxu1 %v6596_v3  ;;  %v4615_v3 = vcombine.low %v4590_v58, %v4590_v58  ;;  %v6324_v58 = vld [vmem:[%s8247_s3] sm:$0xff]  }
  0x34   :  { %1035 = vmatprep.subr.bf16.mxu0 %v6526_v0  ;;  %1400 = vmatprep.subr.bf16.mxu1 %v6526_v0 }
  0x37   :  { %1036 = vmatpush1.bf16.msra.mxu0 %v6605_v4  ;;  %1401 = vmatpush1.bf16.msra.mxu1 %v6605_v4  ;;  %v6233_v4 = vld [vmem:[%s8246_s0 + $0x190] ss:$8 sps:$4 sm:$0xff]  }
  0x38   :  { %1037 = vmatprep.subr.bf16.mxu0 %v6526_v0  ;;  %1402 = vmatprep.subr.bf16.mxu1 %v6526_v0 }
  0x39   :  { %348 = vmatmul.mubr.bf16.gmra.mxu0 %v6173_v21  ;;  %713 = vmatmul.mubr.bf16.gmra.mxu1 %v6174_v22  ;;  %v6256_v21 = vld [vmem:[%s8246_s0 + $0x288] ss:$8 sps:$4 sm:$0xff]   ;;  %v6257_v22 = vld [vmem:[%s8246_s0 + $0x1d4] ss:$8 sps:$4 sm:$0xff]  }
  0x3a   :  { %4556 = vmatprep.mubr.msk.bf16.mxu0 %vm259_vm0, %v6175_v23  ;;  %4620 = vmatprep.mubr.msk.bf16.mxu1 %vm259_vm0, %v6177_v24  ;;  %v6260_v23 = vld [vmem:[%s8246_s0 + $0x29c] ss:$8 sps:$4 sm:$0xff]  }
  0x3b   :  { %1038 = vmatpush1.bf16.msra.mxu0 %v6621_v7  ;;  %1403 = vmatpush1.bf16.msra.mxu1 %v6621_v7  ;;  %v6242_v7 = vld [vmem:[%s8246_s0 + $0x26c] ss:$8 sps:$4 sm:$0xff]   ;;  %v6313_v24 = vld [vmem:[%s8247_s3 + $0x60] sm:$0xff]  }
  0x3c   :  { %1039 = vmatprep.subr.bf16.mxu0 %v6526_v0  ;;  %1404 = vmatprep.subr.bf16.mxu1 %v6526_v0 }
  0x3f   :  { %1040 = vmatpush1.bf16.msra.mxu0 %v6631_v8  ;;  %1405 = vmatpush1.bf16.msra.mxu1 %v6631_v8  ;;  %v6309_v8 = vld [vmem:[%s8247_s3 + $0x78] sm:$0xff]  }
  0x40   :  { %1041 = vmatprep.subr.bf16.mxu0 %v6526_v0  ;;  %1406 = vmatprep.subr.bf16.mxu1 %v6526_v0 }
  0x41   :  { %356 = vmatmul.mubr.bf16.gmra.mxu0 %v6179_v25  ;;  %721 = vmatmul.mubr.bf16.gmra.mxu1 %v6180_v26  ;;  %v6314_v25 = vld [vmem:[%s8247_s3 + $0x30] sm:$0xff]  }
  0x42   :  { %4557 = vmatprep.mubr.msk.bf16.mxu0 %vm259_vm0, %v6181_v27  ;;  %4621 = vmatprep.mubr.msk.bf16.mxu1 %vm259_vm0, %v6183_v28  ;;  %v6259_v26 = vld [vmem:[%s8246_s0 + $0x1d0] ss:$8 sps:$4 sm:$0xff]   ;;  %v6263_v28 = vld [vmem:[%s8246_s0 + $0x1e4] ss:$8 sps:$4 sm:$0xff]  }
  0x43   :  { %1042 = vmatpush1.bf16.msra.mxu0 %v6640_v9  ;;  %1407 = vmatpush1.bf16.msra.mxu1 %v6640_v9  ;;  %v6310_v9 = vld [vmem:[%s8247_s3 + $0x70] sm:$0xff]   ;;  %v6262_v27 = vld [vmem:[%s8246_s0 + $0x298] ss:$8 sps:$4 sm:$0xff]  }
  0x44   :  { %1043 = vmatprep.subr.bf16.mxu0 %v6526_v0  ;;  %1408 = vmatprep.subr.bf16.mxu1 %v6526_v0 }
  0x47   :  { %1044 = vmatpush1.bf16.msra.mxu0 %v6649_v10  ;;  %1409 = vmatpush1.bf16.msra.mxu1 %v6649_v10  ;;  %v6241_v10 = vld [vmem:[%s8246_s0 + $0x1a0] ss:$8 sps:$4 sm:$0xff]  }
  0x48   :  { %1057 = vmatprep.subr.bf16.mxu0 %v6526_v0  ;;  %1422 = vmatprep.subr.bf16.mxu1 %v6526_v0 }
  0x49   :  { %364 = vmatmul.mubr.bf16.gmra.mxu0 %v6185_v29  ;;  %729 = vmatmul.mubr.bf16.gmra.mxu1 %v6186_v30  ;;  %v6266_v29 = vld [vmem:[%s8246_s0 + $0x2ac] ss:$8 sps:$4 sm:$0xff]   ;;  %v6315_v30 = vld [vmem:[%s8247_s3 + $0x58] sm:$0xff]  }
  0x4a   :  { %4558 = vmatprep.mubr.msk.bf16.mxu0 %vm259_vm0, %v6187_v31  ;;  %4622 = vmatprep.mubr.msk.bf16.mxu1 %vm259_vm0, %v6189_v32  ;;  %v6265_v31 = vld [vmem:[%s8246_s0 + $0x1e0] ss:$8 sps:$4 sm:$0xff]  }
  0x4b   :  { %1058 = vmatpush2.bf16.msra.mxu0 %v6658_v11  ;;  %1423 = vmatpush2.bf16.msra.mxu1 %v6658_v11  ;;  %v6244_v11 = vld [vmem:[%s8246_s0 + $0x268] ss:$8 sps:$4 sm:$0xff]  }
  0x4c   :  { %1059 = vmatprep.subr.bf16.mxu0 %v6526_v0  ;;  %1424 = vmatprep.subr.bf16.mxu1 %v6526_v0  ;;  %v6235_v0 = vld [vmem:[%s8246_s0 + $0x194] ss:$8 sps:$4 sm:$0xff]   ;;  %v6268_v32 = vld [vmem:[%s8246_s0 + $0x2a8] ss:$8 sps:$4 sm:$0xff]  }
  0x4f   :  { %1060 = vmatpush2.bf16.msra.mxu0 %v6667_v12  ;;  %1425 = vmatpush2.bf16.msra.mxu1 %v6667_v12  ;;  %v6245_v12 = vld [vmem:[%s8246_s0 + $0x1b4] ss:$8 sps:$4 sm:$0xff]  }
  0x50   :  { %5604 = vmatprep.subr.bf16.mxu0 %v6527_v63  ;;  %5624 = vmatprep.subr.bf16.mxu1 %v6527_v63 }
  0x51   :  { %372 = vmatmul.mubr.bf16.gmra.mxu0 %v6191_v33  ;;  %737 = vmatmul.mubr.bf16.gmra.mxu1 %v6192_v34  ;;  %v6269_v33 = vld [vmem:[%s8246_s0 + $0x1f4] ss:$8 sps:$4 sm:$0xff]  }
  0x52   :  { %4559 = vmatprep.mubr.msk.bf16.mxu0 %vm259_vm0, %v6193_v35  ;;  %4623 = vmatprep.mubr.msk.bf16.mxu1 %vm259_vm0, %v6195_v36  ;;  %v6272_v34 = vld [vmem:[%s8246_s0 + $0x2bc] ss:$8 sps:$4 sm:$0xff]   ;;  %v6316_v35 = vld [vmem:[%s8247_s3 + $0x28] sm:$0xff]   ;;  %v6271_v36 = vld [vmem:[%s8246_s0 + $0x1f0] ss:$8 sps:$4 sm:$0xff]  }
  0x59   :  { %380 = vmatmul.mubr.bf16.gmra.mxu0 %v6197_v37  ;;  %745 = vmatmul.mubr.bf16.gmra.mxu1 %v6198_v38  ;;  %v6274_v37 = vld [vmem:[%s8246_s0 + $0x2b8] ss:$8 sps:$4 sm:$0xff]   ;;  %v6275_v38 = vld [vmem:[%s8246_s0 + $0x204] ss:$8 sps:$4 sm:$0xff]  }
  0x5a   :  { %4560 = vmatprep.mubr.msk.bf16.mxu0 %vm259_vm0, %v6199_v39  ;;  %4624 = vmatprep.mubr.msk.bf16.mxu1 %vm259_vm0, %v6201_v40  ;;  %v6278_v39 = vld [vmem:[%s8246_s0 + $0x2cc] ss:$8 sps:$4 sm:$0xff]  }
  0x5b   :  { %v6317_v40 = vld [vmem:[%s8247_s3 + $0x50] sm:$0xff]  }
  0x61   :  { %388 = vmatmul.mubr.bf16.gmra.mxu0 %v6203_v41  ;;  %753 = vmatmul.mubr.bf16.gmra.mxu1 %v6204_v42  ;;  %v6318_v41 = vld [vmem:[%s8247_s3 + $0x20] sm:$0xff]  }
  0x62   :  { %4561 = vmatprep.mubr.msk.bf16.mxu0 %vm259_vm0, %v6205_v43  ;;  %4625 = vmatprep.mubr.msk.bf16.mxu1 %vm259_vm0, %v6207_v44  ;;  %v6277_v42 = vld [vmem:[%s8246_s0 + $0x200] ss:$8 sps:$4 sm:$0xff]   ;;  %v6281_v44 = vld [vmem:[%s8246_s0 + $0x214] ss:$8 sps:$4 sm:$0xff]  }
  0x63   :  { %v6280_v43 = vld [vmem:[%s8246_s0 + $0x2c8] ss:$8 sps:$4 sm:$0xff]  }
  0x69   :  { %396 = vmatmul.mubr.bf16.gmra.mxu0 %v6209_v45  ;;  %761 = vmatmul.mubr.bf16.gmra.mxu1 %v6210_v46  ;;  %v6284_v45 = vld [vmem:[%s8246_s0 + $0x2dc] ss:$8 sps:$4 sm:$0xff]   ;;  %v6283_v46 = vld [vmem:[%s8246_s0 + $0x210] ss:$8 sps:$4 sm:$0xff]  }
  0x6a   :  { %4562 = vmatprep.mubr.msk.bf16.mxu0 %vm259_vm0, %v6211_v47  ;;  %4626 = vmatprep.mubr.msk.bf16.mxu1 %vm259_vm0, %v6213_v48  ;;  %v6286_v47 = vld [vmem:[%s8246_s0 + $0x2d8] ss:$8 sps:$4 sm:$0xff]   ;;  %v6287_v48 = vld [vmem:[%s8246_s0 + $0x224] ss:$8 sps:$4 sm:$0xff]  }
  0x71   :  { %404 = vmatmul.mubr.bf16.gmra.mxu0 %v6215_v49  ;;  %769 = vmatmul.mubr.bf16.gmra.mxu1 %v6216_v50  ;;  %v6290_v49 = vld [vmem:[%s8246_s0 + $0x2ec] ss:$8 sps:$4 sm:$0xff]   ;;  %v6320_v50 = vld [vmem:[%s8247_s3 + $0x18] sm:$0xff]  }
  0x72   :  { %4563 = vmatprep.mubr.msk.bf16.mxu0 %vm259_vm0, %v6217_v51  ;;  %4627 = vmatprep.mubr.msk.bf16.mxu1 %vm259_vm0, %v6219_v52  ;;  %v6319_v51 = vld [vmem:[%s8247_s3 + $0x48] sm:$0xff]   ;;  %v6321_v52 = vld [vmem:[%s8247_s3 + $0x10] sm:$0xff]  }
  0x79   :  { %412 = vmatmul.mubr.bf16.gmra.mxu0 %v6221_v53  ;;  %777 = vmatmul.mubr.bf16.gmra.mxu1 %v6222_v54  ;;  %v6289_v53 = vld [vmem:[%s8246_s0 + $0x220] ss:$8 sps:$4 sm:$0xff]  }
  0x7a   :  { %4564 = vmatprep.mubr.msk.bf16.mxu0 %vm259_vm0, %v6223_v55  ;;  %4628 = vmatprep.mubr.msk.bf16.mxu1 %vm259_vm0, %v6225_v56  ;;  %v6292_v54 = vld [vmem:[%s8246_s0 + $0x2e8] ss:$8 sps:$4 sm:$0xff]   ;;  %v6293_v55 = vld [vmem:[%s8246_s0 + $0x234] ss:$8 sps:$4 sm:$0xff]  }
  0x7b   :  { %v6296_v56 = vld [vmem:[%s8246_s0 + $0x2fc] ss:$8 sps:$4 sm:$0xff]  }
  0x81   :  { %420 = vmatmul.mubr.bf16.gmra.mxu0 %v6227_v59  ;;  %785 = vmatmul.mubr.bf16.gmra.mxu1 %v6228_v60  ;;  %v6295_v59 = vld [vmem:[%s8246_s0 + $0x230] ss:$8 sps:$4 sm:$0xff]  }
  0x82   :  { %4565 = vmatprep.mubr.msk.bf16.mxu0 %vm259_vm0, %v4542_v61  ;;  %4629 = vmatprep.mubr.msk.bf16.mxu1 %vm259_vm0, %v4616_v62  ;;  %v6298_v60 = vld [vmem:[%s8246_s0 + $0x2f8] ss:$8 sps:$4 sm:$0xff]   ;;  %v6299_v61 = vld [vmem:[%s8246_s0 + $0x244] ss:$8 sps:$4 sm:$0xff]  }
  0x83   :  { %v6302_v62 = vld [vmem:[%s8246_s0 + $0x30c] ss:$8 sps:$4 sm:$0xff]  }
  0x89   :  { %428 = vmatmul.mubr.bf16.gmra.mxu0 %v4541_v2  ;;  %793 = vmatmul.mubr.bf16.gmra.mxu1 %v4615_v3  ;;  %v4718_v2 = vld [vmem:[%s8246_s0 + $0x318] sm:$0xff]  ;;  %v7116_v3 = vld [vmem:[%s8248_s2] ss:$0 sm:$0xff] }
  0x8a   :  { %4681 = vmatprep.mubr.msk.bf16.mxu0 %vm259_vm0, %v6235_v0  ;;  %4745 = vmatprep.mubr.msk.bf16.mxu1 %vm259_vm0, %v6238_v1  ;;  %v6322_v0 = vld [vmem:[%s8247_s3 + $0x40] sm:$0xff]   ;;  %v4654_v1 = vld [vmem:[%s8246_s0 + $0x250] sm:$0xff] }
  0x91   :  { %1062 = vmatmul.mubr.bf16.vlgmr.msra.gmra.mxu0 %v6233_v4  ;;  %1427 = vmatmul.mubr.bf16.vlgmr.msra.gmra.mxu1 %v6236_v5  ;;  %v6301_v4 = vld [vmem:[%s8246_s0 + $0x240] ss:$8 sps:$4 sm:$0xff]  }
  0x92   :  { %4682 = vmatprep.mubr.msk.bf16.mxu0 %vm259_vm0, %v6239_v6  ;;  %4746 = vmatprep.mubr.msk.bf16.mxu1 %vm259_vm0, %v6242_v7  ;;  %v6304_v5 = vld [vmem:[%s8246_s0 + $0x308] ss:$8 sps:$4 sm:$0xff]   ;;  %v4680_v6 = vcombine.high %v4654_v1, %v4654_v1  ;;  %v4744_v7 = vcombine.high %v4718_v2, %v4718_v2 }
  0x93   :  { %5605 = vmatpush3.bf16.msra.mxu0 %v6309_v8  ;;  %5625 = vmatpush3.bf16.msra.mxu1 %v6312_v19  ;;  %v4743_v19 = vcombine.low %v4718_v2, %v4718_v2 }
  0x94   :  { %5606 = vmatprep.subr.bf16.mxu0 %v6527_v63  ;;  %5626 = vmatprep.subr.bf16.mxu1 %v6527_v63 }
  0x97   :  { %5607 = vmatpush3.bf16.msra.mxu0 %v6310_v9  ;;  %5627 = vmatpush3.bf16.msra.mxu1 %v6314_v25 }
  0x98   :  { %5608 = vmatprep.subr.bf16.mxu0 %v6527_v63  ;;  %5628 = vmatprep.subr.bf16.mxu1 %v6527_v63 }
  0x99   :  { %1070 = vmatmul.mubr.bf16.gmra.mxu0 %v6241_v10  ;;  %1435 = vmatmul.mubr.bf16.gmra.mxu1 %v6244_v11 }
  0x9a   :  { %4683 = vmatprep.mubr.msk.bf16.mxu0 %vm259_vm0, %v6245_v12  ;;  %4747 = vmatprep.mubr.msk.bf16.mxu1 %vm259_vm0, %v6248_v13 }
  0x9b   :  { %5609 = vmatpush3.bf16.msra.mxu0 %v6311_v14  ;;  %5629 = vmatpush3.bf16.msra.mxu1 %v6316_v35 }
  0x9c   :  { %5610 = vmatprep.subr.bf16.mxu0 %v6527_v63  ;;  %5630 = vmatprep.subr.bf16.mxu1 %v6527_v63 }
  0x9f   :  { %5611 = vmatpush3.bf16.msra.mxu0 %v6313_v24  ;;  %5631 = vmatpush3.bf16.msra.mxu1 %v6318_v41 }
  0xa0   :  { %5612 = vmatprep.subr.bf16.mxu0 %v6527_v63  ;;  %5632 = vmatprep.subr.bf16.mxu1 %v6527_v63 }
  0xa1   :  { %1078 = vmatmul.mubr.bf16.gmra.mxu0 %v6247_v15  ;;  %1443 = vmatmul.mubr.bf16.gmra.mxu1 %v6250_v16 }
  0xa2   :  { %4684 = vmatprep.mubr.msk.bf16.mxu0 %vm259_vm0, %v6251_v17  ;;  %4748 = vmatprep.mubr.msk.bf16.mxu1 %vm259_vm0, %v6254_v18  ;;  %v4679_v18 = vcombine.low %v4654_v1, %v4654_v1 }
  0xa3   :  { %5613 = vmatpush3.bf16.msra.mxu0 %v6315_v30  ;;  %5633 = vmatpush3.bf16.msra.mxu1 %v6320_v50 }
  0xa4   :  { %5614 = vmatprep.subr.bf16.mxu0 %v6527_v63  ;;  %5634 = vmatprep.subr.bf16.mxu1 %v6527_v63 }
  0xa7   :  { %5615 = vmatpush3.bf16.msra.mxu0 %v6317_v40  ;;  %5635 = vmatpush3.bf16.msra.mxu1 %v6321_v52 }
  0xa8   :  { %5616 = vmatprep.subr.bf16.mxu0 %v6527_v63  ;;  %5636 = vmatprep.subr.bf16.mxu1 %v6527_v63 }
  0xa9   :  { %1086 = vmatmul.mubr.bf16.gmra.mxu0 %v6253_v20  ;;  %1451 = vmatmul.mubr.bf16.gmra.mxu1 %v6256_v21 }
  0xaa   :  { %4685 = vmatprep.mubr.msk.bf16.mxu0 %vm259_vm0, %v6257_v22  ;;  %4749 = vmatprep.mubr.msk.bf16.mxu1 %vm259_vm0, %v6260_v23 }
  0xab   :  { %5617 = vmatpush3.bf16.msra.mxu0 %v6319_v51  ;;  %5637 = vmatpush3.bf16.msra.mxu1 %v6323_v57 }
  0xac   :  { %5618 = vmatprep.subr.bf16.mxu0 %v6527_v63  ;;  %5638 = vmatprep.subr.bf16.mxu1 %v6527_v63 }
  0xaf   :  { %5639 = vmatpush3.bf16.msra.mxu1 %v6324_v58  ;;  %5619 = vmatpush3.bf16.msra.mxu0 %v6322_v0 }
  0xb0   :  { %5664 = vmatprep.subr.bf16.mxu1 %v6527_v63  ;;  %5644 = vmatprep.subr.bf16.mxu0 %v6527_v63 }
  0xb1   :  { %1094 = vmatmul.mubr.bf16.gmra.mxu0 %v6259_v26  ;;  %1459 = vmatmul.mubr.bf16.gmra.mxu1 %v6262_v27 }
  0xb2   :  { %4686 = vmatprep.mubr.msk.bf16.mxu0 %vm259_vm0, %v6263_v28  ;;  %4750 = vmatprep.mubr.msk.bf16.mxu1 %vm259_vm0, %v6266_v29 }
  0xb9   :  { %1102 = vmatmul.mubr.bf16.gmra.mxu0 %v6265_v31  ;;  %1467 = vmatmul.mubr.bf16.gmra.mxu1 %v6268_v32 }
  0xba   :  { %4687 = vmatprep.mubr.msk.bf16.mxu0 %vm259_vm0, %v6269_v33  ;;  %4751 = vmatprep.mubr.msk.bf16.mxu1 %vm259_vm0, %v6272_v34 }
  0xc1   :  { %1110 = vmatmul.mubr.bf16.gmra.mxu0 %v6271_v36  ;;  %1475 = vmatmul.mubr.bf16.gmra.mxu1 %v6274_v37 }
  0xc2   :  { %4688 = vmatprep.mubr.msk.bf16.mxu0 %vm259_vm0, %v6275_v38  ;;  %4752 = vmatprep.mubr.msk.bf16.mxu1 %vm259_vm0, %v6278_v39 }
  0xc9   :  { %1118 = vmatmul.mubr.bf16.gmra.mxu0 %v6277_v42  ;;  %1483 = vmatmul.mubr.bf16.gmra.mxu1 %v6280_v43 }
  0xca   :  { %4689 = vmatprep.mubr.msk.bf16.mxu0 %vm259_vm0, %v6281_v44  ;;  %4753 = vmatprep.mubr.msk.bf16.mxu1 %vm259_vm0, %v6284_v45 }
  0xd1   :  { %1126 = vmatmul.mubr.bf16.gmra.mxu0 %v6283_v46  ;;  %1491 = vmatmul.mubr.bf16.gmra.mxu1 %v6286_v47 }
  0xd2   :  { %4690 = vmatprep.mubr.msk.bf16.mxu0 %vm259_vm0, %v6287_v48  ;;  %4754 = vmatprep.mubr.msk.bf16.mxu1 %vm259_vm0, %v6290_v49 }
  0xd9   :  { %1134 = vmatmul.mubr.bf16.gmra.mxu0 %v6289_v53  ;;  %1499 = vmatmul.mubr.bf16.gmra.mxu1 %v6292_v54 }
  0xda   :  { %4691 = vmatprep.mubr.msk.bf16.mxu0 %vm259_vm0, %v6293_v55  ;;  %4755 = vmatprep.mubr.msk.bf16.mxu1 %vm259_vm0, %v6296_v56 }
  0xe1   :  { %1142 = vmatmul.mubr.bf16.gmra.mxu0 %v6295_v59  ;;  %1507 = vmatmul.mubr.bf16.gmra.mxu1 %v6298_v60 }
  0xe2   :  { %4692 = vmatprep.mubr.msk.bf16.mxu0 %vm259_vm0, %v6299_v61  ;;  %4756 = vmatprep.mubr.msk.bf16.mxu1 %vm259_vm0, %v6302_v62 }
  0xe9   :  { %v333_v8 = vpop.f32.mrf.mxu0  ;;  %v698_v9 = vpop.f32.mrf.mxu1  ;;  %1150 = vmatmul.mubr.bf16.gmra.mxu0 %v6301_v4  ;;  %1515 = vmatmul.mubr.bf16.gmra.mxu1 %v6304_v5 }
  0xea   :  { %v334_v10 = vadd.f32 %v7116_v3, %v333_v8  ;;  %v699_v11 = vadd.f32 %v7116_v3, %v698_v9  ;;  %4693 = vmatprep.mubr.msk.bf16.mxu0 %vm259_vm0, %v4680_v6  ;;  %4757 = vmatprep.mubr.msk.bf16.mxu1 %vm259_vm0, %v4744_v7 }
  0xeb   :  { %v335_v12 = vpop.f32.mrf.mxu0  ;;  %v700_v13 = vpop.f32.mrf.mxu1 }
  0xec   :  { %v435_v14 = vmax.f32 %v334_v10, 0.0  ;;  %v800_v15 = vmax.f32 %v699_v11, 0.0 }
  0xed   :  { %v336_v16 = vpop.f32.mrf.mxu0  ;;  %v701_v17 = vpop.f32.mrf.mxu1 }
  0xee   :  { %v7128_v20 = vadd.f32 %v800_v15, %v435_v14  ;;  %v337_v21 = vadd.f32 %v7116_v3, %v336_v16  ;;  %v702_v22 = vadd.f32 %v7116_v3, %v701_v17 }
  0xef   :  { %v338_v23 = vpop.f32.mrf.mxu0  ;;  %v703_v24 = vpop.f32.mrf.mxu1 }
  0xf0   :  { %v436_v25 = vmax.f32 %v337_v21, 0.0  ;;  %v801_v26 = vmax.f32 %v702_v22, 0.0 }
  0xf1   :  { %v341_v27 = vpop.f32.mrf.mxu0  ;;  %v706_v28 = vpop.f32.mrf.mxu1  ;;  %1158 = vmatmul.mubr.bf16.gmra.mxu0 %v4679_v18  ;;  %1523 = vmatmul.mubr.bf16.gmra.mxu1 %v4743_v19 }
  0xf2   :  { %v7132_v29 = vadd.f32 %v801_v26, %v436_v25  ;;  %v342_v30 = vadd.f32 %v7116_v3, %v341_v27  ;;  %v707_v31 = vadd.f32 %v7116_v3, %v706_v28  ;;  %5640 = vmatprep.mubr.msk.bf16.mxu1 %vm6528_vm1, %v6527_v63  ;;  %5620 = vmatprep.mubr.msk.bf16.mxu0 %vm6528_vm1, %v6527_v63 }
  0xf3   :  { %v343_v32 = vpop.f32.mrf.mxu0  ;;  %v708_v33 = vpop.f32.mrf.mxu1 }
  0xf4   :  { %v437_v34 = vmax.f32 %v342_v30, 0.0  ;;  %v802_v35 = vmax.f32 %v707_v31, 0.0 }
  0xf5   :  { %v344_v36 = vpop.f32.mrf.mxu0  ;;  %v709_v37 = vpop.f32.mrf.mxu1 }
  0xf6   :  { %v7140_v38 = vadd.f32 %v802_v35, %v437_v34  ;;  %v345_v39 = vadd.f32 %v7116_v3, %v344_v36  ;;  %v710_v40 = vadd.f32 %v7116_v3, %v709_v37 }
  0xf7   :  { %v346_v41 = vpop.f32.mrf.mxu0  ;;  %v711_v42 = vpop.f32.mrf.mxu1 }
  0xf8   :  { %v438_v43 = vmax.f32 %v345_v39, 0.0  ;;  %v803_v44 = vmax.f32 %v710_v40, 0.0 }
  0xf9   :  { %v349_v45 = vpop.f32.mrf.mxu0  ;;  %v714_v46 = vpop.f32.mrf.mxu1 }
  0xfa   :  { %v7144_v47 = vadd.f32 %v803_v44, %v438_v43  ;;  %v350_v48 = vadd.f32 %v7116_v3, %v349_v45  ;;  %v715_v49 = vadd.f32 %v7116_v3, %v714_v46 }
  0xfb   :  { %v351_v50 = vpop.f32.mrf.mxu0  ;;  %v716_v51 = vpop.f32.mrf.mxu1 }
  0xfc   :  { %v439_v52 = vmax.f32 %v350_v48, 0.0  ;;  %v804_v53 = vmax.f32 %v715_v49, 0.0 }
  0xfd   :  { %v352_v54 = vpop.f32.mrf.mxu0  ;;  %v717_v55 = vpop.f32.mrf.mxu1 }
  0xfe   :  { %v7148_v56 = vadd.f32 %v804_v53, %v439_v52  ;;  %v353_v57 = vadd.f32 %v7116_v3, %v352_v54  ;;  %v718_v58 = vadd.f32 %v7116_v3, %v717_v55 }
  0xff   :  { %v354_v59 = vpop.f32.mrf.mxu0  ;;  %v719_v60 = vpop.f32.mrf.mxu1 }
 0x100   :  { %v440_v61 = vmax.f32 %v353_v57, 0.0  ;;  %v805_v62 = vmax.f32 %v718_v58, 0.0 }
 0x101   :  { %v357_v0 = vpop.f32.mrf.mxu0  ;;  %v722_v1 = vpop.f32.mrf.mxu1 }
 0x102   :  { %v7152_v2 = vadd.f32 %v805_v62, %v440_v61  ;;  %v358_v4 = vadd.f32 %v7116_v3, %v357_v0  ;;  %v723_v5 = vadd.f32 %v7116_v3, %v722_v1 }
 0x103   :  { %v359_v6 = vpop.f32.mrf.mxu0  ;;  %v724_v7 = vpop.f32.mrf.mxu1 }
 0x104   :  { %v441_v8 = vmax.f32 %v358_v4, 0.0  ;;  %v806_v9 = vmax.f32 %v723_v5, 0.0 }
 0x105   :  { %v360_v10 = vpop.f32.mrf.mxu0  ;;  %v725_v11 = vpop.f32.mrf.mxu1 }
 0x106   :  { %v7156_v12 = vadd.f32 %v806_v9, %v441_v8  ;;  %v361_v13 = vadd.f32 %v7116_v3, %v360_v10  ;;  %v726_v14 = vadd.f32 %v7116_v3, %v725_v11 }
 0x107   :  { %v362_v15 = vpop.f32.mrf.mxu0  ;;  %v727_v16 = vpop.f32.mrf.mxu1 }
 0x108   :  { %v442_v17 = vmax.f32 %v361_v13, 0.0  ;;  %v807_v18 = vmax.f32 %v726_v14, 0.0 }
 0x109   :  { %v365_v19 = vpop.f32.mrf.mxu0  ;;  %v730_v21 = vpop.f32.mrf.mxu1 }
 0x10a   :  { %v7160_v22 = vadd.f32 %v807_v18, %v442_v17  ;;  %v366_v23 = vadd.f32 %v7116_v3, %v365_v19  ;;  %v731_v24 = vadd.f32 %v7116_v3, %v730_v21 }
 0x10b   :  { %v367_v25 = vpop.f32.mrf.mxu0  ;;  %v732_v26 = vpop.f32.mrf.mxu1 }
 0x10c   :  { %v443_v27 = vmax.f32 %v366_v23, 0.0  ;;  %v808_v28 = vmax.f32 %v731_v24, 0.0 }
 0x10d   :  { %v368_v30 = vpop.f32.mrf.mxu0  ;;  %v733_v31 = vpop.f32.mrf.mxu1 }
 0x10e   :  { %v7164_v32 = vadd.f32 %v808_v28, %v443_v27  ;;  %v369_v33 = vadd.f32 %v7116_v3, %v368_v30  ;;  %v734_v34 = vadd.f32 %v7116_v3, %v733_v31 }
 0x10f   :  { %v370_v35 = vpop.f32.mrf.mxu0  ;;  %v735_v36 = vpop.f32.mrf.mxu1 }
 0x110   :  { %v444_v37 = vmax.f32 %v369_v33, 0.0  ;;  %v809_v39 = vmax.f32 %v734_v34, 0.0 }
 0x111   :  { %v373_v40 = vpop.f32.mrf.mxu0  ;;  %v738_v41 = vpop.f32.mrf.mxu1 }
 0x112   :  { %v7168_v42 = vadd.f32 %v809_v39, %v444_v37  ;;  %v374_v43 = vadd.f32 %v7116_v3, %v373_v40  ;;  %v739_v44 = vadd.f32 %v7116_v3, %v738_v41 }
 0x113   :  { %v375_v45 = vpop.f32.mrf.mxu0  ;;  %v740_v46 = vpop.f32.mrf.mxu1 }
 0x114   :  { %v445_v48 = vmax.f32 %v374_v43, 0.0  ;;  %v810_v49 = vmax.f32 %v739_v44, 0.0 }
 0x115   :  { %v376_v50 = vpop.f32.mrf.mxu0  ;;  %v741_v51 = vpop.f32.mrf.mxu1 }
 0x116   :  { %v7172_v52 = vadd.f32 %v810_v49, %v445_v48  ;;  %v377_v53 = vadd.f32 %v7116_v3, %v376_v50  ;;  %v742_v54 = vadd.f32 %v7116_v3, %v741_v51 }
 0x117   :  { %v378_v55 = vpop.f32.mrf.mxu0  ;;  %v743_v57 = vpop.f32.mrf.mxu1 }
 0x118   :  { %v446_v58 = vmax.f32 %v377_v53, 0.0  ;;  %v811_v59 = vmax.f32 %v742_v54, 0.0 }
 0x119   :  { %v381_v60 = vpop.f32.mrf.mxu0  ;;  %v746_v61 = vpop.f32.mrf.mxu1 }
 0x11a   :  { %v7176_v62 = vadd.f32 %v811_v59, %v446_v58  ;;  %v382_v0 = vadd.f32 %v7116_v3, %v381_v60  ;;  %v747_v1 = vadd.f32 %v7116_v3, %v746_v61 }
 0x11b   :  { %v383_v4 = vpop.f32.mrf.mxu0  ;;  %v748_v5 = vpop.f32.mrf.mxu1 }
 0x11c   :  { %v447_v6 = vmax.f32 %v382_v0, 0.0  ;;  %v812_v7 = vmax.f32 %v747_v1, 0.0 }
 0x11d   :  { %v384_v8 = vpop.f32.mrf.mxu0  ;;  %v749_v9 = vpop.f32.mrf.mxu1 }
 0x11e   :  { %v7180_v10 = vadd.f32 %v812_v7, %v447_v6  ;;  %v385_v11 = vadd.f32 %v7116_v3, %v384_v8  ;;  %v750_v13 = vadd.f32 %v7116_v3, %v749_v9 }
 0x11f   :  { %v386_v14 = vpop.f32.mrf.mxu0  ;;  %v751_v15 = vpop.f32.mrf.mxu1 }
 0x120   :  { %v448_v16 = vmax.f32 %v385_v11, 0.0  ;;  %v813_v17 = vmax.f32 %v750_v13, 0.0 }
 0x121   :  { %v389_v18 = vpop.f32.mrf.mxu0  ;;  %v754_v19 = vpop.f32.mrf.mxu1 }
 0x122   :  { %v7184_v21 = vadd.f32 %v813_v17, %v448_v16  ;;  %v390_v23 = vadd.f32 %v7116_v3, %v389_v18  ;;  %v755_v24 = vadd.f32 %v7116_v3, %v754_v19 }
 0x123   :  { %v391_v25 = vpop.f32.mrf.mxu0  ;;  %v756_v26 = vpop.f32.mrf.mxu1 }
 0x124   :  { %v449_v27 = vmax.f32 %v390_v23, 0.0  ;;  %v814_v28 = vmax.f32 %v755_v24, 0.0 }
 0x125   :  { %v392_v30 = vpop.f32.mrf.mxu0  ;;  %v757_v31 = vpop.f32.mrf.mxu1 }
 0x126   :  { %v7188_v33 = vadd.f32 %v814_v28, %v449_v27  ;;  %v393_v34 = vadd.f32 %v7116_v3, %v392_v30  ;;  %v758_v35 = vadd.f32 %v7116_v3, %v757_v31 }
 0x127   :  { %v394_v36 = vpop.f32.mrf.mxu0  ;;  %v759_v37 = vpop.f32.mrf.mxu1 }
 0x128   :  { %v450_v39 = vmax.f32 %v393_v34, 0.0  ;;  %v815_v40 = vmax.f32 %v758_v35, 0.0 }
 0x129   :  { %v397_v41 = vpop.f32.mrf.mxu0  ;;  %v762_v43 = vpop.f32.mrf.mxu1 }
 0x12a   :  { %v7192_v44 = vadd.f32 %v815_v40, %v450_v39  ;;  %v398_v45 = vadd.f32 %v7116_v3, %v397_v41  ;;  %v763_v46 = vadd.f32 %v7116_v3, %v762_v43 }
 0x12b   :  { %v399_v48 = vpop.f32.mrf.mxu0  ;;  %v764_v49 = vpop.f32.mrf.mxu1 }
 0x12c   :  { %v451_v50 = vmax.f32 %v398_v45, 0.0  ;;  %v816_v51 = vmax.f32 %v763_v46, 0.0 }
 0x12d   :  { %v400_v53 = vpop.f32.mrf.mxu0  ;;  %v765_v54 = vpop.f32.mrf.mxu1 }
 0x12e   :  { %v7196_v55 = vadd.f32 %v816_v51, %v451_v50  ;;  %v401_v57 = vadd.f32 %v7116_v3, %v400_v53  ;;  %v766_v58 = vadd.f32 %v7116_v3, %v765_v54 }
 0x12f   :  { %v402_v59 = vpop.f32.mrf.mxu0  ;;  %v767_v60 = vpop.f32.mrf.mxu1 }
 0x130   :  { %v452_v61 = vmax.f32 %v401_v57, 0.0  ;;  %v817_v0 = vmax.f32 %v766_v58, 0.0 }
 0x131   :  { %v405_v1 = vpop.f32.mrf.mxu0  ;;  %v770_v4 = vpop.f32.mrf.mxu1 }
 0x132   :  { %v7200_v5 = vadd.f32 %v817_v0, %v452_v61  ;;  %v406_v6 = vadd.f32 %v7116_v3, %v405_v1  ;;  %v771_v7 = vadd.f32 %v7116_v3, %v770_v4 }
 0x133   :  { %v407_v8 = vpop.f32.mrf.mxu0  ;;  %v772_v9 = vpop.f32.mrf.mxu1 }
 0x134   :  { %v453_v11 = vmax.f32 %v406_v6, 0.0  ;;  %v818_v13 = vmax.f32 %v771_v7, 0.0 }
 0x135   :  { %v408_v14 = vpop.f32.mrf.mxu0  ;;  %v773_v15 = vpop.f32.mrf.mxu1 }
 0x136   :  { %v7204_v16 = vadd.f32 %v818_v13, %v453_v11  ;;  %v409_v17 = vadd.f32 %v7116_v3, %v408_v14  ;;  %v774_v18 = vadd.f32 %v7116_v3, %v773_v15 }
 0x137   :  { %v410_v19 = vpop.f32.mrf.mxu0  ;;  %v775_v23 = vpop.f32.mrf.mxu1 }
 0x138   :  { %v454_v24 = vmax.f32 %v409_v17, 0.0  ;;  %v819_v25 = vmax.f32 %v774_v18, 0.0 }
 0x139   :  { %v413_v26 = vpop.f32.mrf.mxu0  ;;  %v778_v27 = vpop.f32.mrf.mxu1 }
 0x13a   :  { %v7208_v28 = vadd.f32 %v819_v25, %v454_v24  ;;  %v414_v30 = vadd.f32 %v7116_v3, %v413_v26  ;;  %v779_v31 = vadd.f32 %v7116_v3, %v778_v27 }
 0x13b   :  { %v415_v34 = vpop.f32.mrf.mxu0  ;;  %v780_v35 = vpop.f32.mrf.mxu1 }
 0x13c   :  { %v455_v36 = vmax.f32 %v414_v30, 0.0  ;;  %v820_v37 = vmax.f32 %v779_v31, 0.0 }
 0x13d   :  { %v416_v39 = vpop.f32.mrf.mxu0  ;;  %v781_v40 = vpop.f32.mrf.mxu1 }
 0x13e   :  { %v7212_v41 = vadd.f32 %v820_v37, %v455_v36  ;;  %v417_v43 = vadd.f32 %v7116_v3, %v416_v39  ;;  %v782_v45 = vadd.f32 %v7116_v3, %v781_v40 }
 0x13f   :  { %v418_v46 = vpop.f32.mrf.mxu0  ;;  %v783_v48 = vpop.f32.mrf.mxu1 }
 0x140   :  { %v456_v49 = vmax.f32 %v417_v43, 0.0  ;;  %v821_v50 = vmax.f32 %v782_v45, 0.0 }
 0x141   :  { %v421_v51 = vpop.f32.mrf.mxu0  ;;  %v786_v53 = vpop.f32.mrf.mxu1 }
 0x142   :  { %v7216_v54 = vadd.f32 %v821_v50, %v456_v49  ;;  %v422_v57 = vadd.f32 %v7116_v3, %v421_v51  ;;  %v787_v58 = vadd.f32 %v7116_v3, %v786_v53 }
 0x143   :  { %v423_v59 = vpop.f32.mrf.mxu0  ;;  %v788_v60 = vpop.f32.mrf.mxu1 }
 0x144   :  { %v457_v61 = vmax.f32 %v422_v57, 0.0  ;;  %v822_v0 = vmax.f32 %v787_v58, 0.0 }
 0x145   :  { %v424_v1 = vpop.f32.mrf.mxu0  ;;  %v789_v4 = vpop.f32.mrf.mxu1 }
 0x146   :  { %v7220_v6 = vadd.f32 %v822_v0, %v457_v61  ;;  %v425_v7 = vadd.f32 %v7116_v3, %v424_v1  ;;  %v790_v8 = vadd.f32 %v7116_v3, %v789_v4 }
 0x147   :  { %v426_v9 = vpop.f32.mrf.mxu0  ;;  %v791_v11 = vpop.f32.mrf.mxu1 }
 0x148   :  { %v458_v13 = vmax.f32 %v425_v7, 0.0  ;;  %v823_v14 = vmax.f32 %v790_v8, 0.0 }
 0x149   :  { %v429_v15 = vpop.f32.mrf.mxu0  ;;  %v794_v17 = vpop.f32.mrf.mxu1 }
 0x14a   :  { %v7224_v18 = vadd.f32 %v823_v14, %v458_v13  ;;  %v430_v19 = vadd.f32 %v7116_v3, %v429_v15  ;;  %v795_v23 = vadd.f32 %v7116_v3, %v794_v17 }
 0x14b   :  { %v431_v24 = vpop.f32.mrf.mxu0  ;;  %v796_v25 = vpop.f32.mrf.mxu1 }
 0x14c   :  { %v459_v26 = vmax.f32 %v430_v19, 0.0  ;;  %v824_v27 = vmax.f32 %v795_v23, 0.0 }
 0x14d   :  { %v432_v30 = vpop.f32.mrf.mxu0  ;;  %v797_v31 = vpop.f32.mrf.mxu1 }
 0x14e   :  { %v7228_v34 = vadd.f32 %v824_v27, %v459_v26  ;;  %v6327_v26 = vld [vmem:[%s8247_s3 + $0xf0] sm:$0xff]  }
 0x14f   :  { %v433_v35 = vpop.f32.mrf.mxu0  ;;  %v798_v36 = vpop.f32.mrf.mxu1 }
 0x151   :  { %v1063_v37 = vpop.f32.mrf.mxu0  ;;  %v1428_v39 = vpop.f32.mrf.mxu1 }
 0x152   :  { %v1064_v40 = vadd.f32 %v7116_v3, %v1063_v37  ;;  %v1429_v43 = vadd.f32 %v7116_v3, %v1428_v39  ;;  %v6328_v37 = vld [vmem:[%s8247_s3 + $0xb0] sm:$0xff]   ;;  %v6329_v39 = vld [vmem:[%s8247_s3 + $0xe8] sm:$0xff]  }
 0x153   :  { %v1065_v45 = vpop.f32.mrf.mxu0  ;;  %v1430_v46 = vpop.f32.mrf.mxu1 }
 0x154   :  { %v1165_v48 = vmax.f32 %v1064_v40, 0.0  ;;  %v1530_v49 = vmax.f32 %v1429_v43, 0.0 }
 0x155   :  { %v1066_v50 = vpop.f32.mrf.mxu0  ;;  %v1431_v51 = vpop.f32.mrf.mxu1 }
 0x156   :  { %v1190_v53 = vadd.f32 %v1165_v48, %v7128_v20  ;;  %v1067_v57 = vadd.f32 %v7116_v3, %v1066_v50  ;;  %v1432_v58 = vadd.f32 %v7116_v3, %v1431_v51  ;;  %v6325_v20 = vld [vmem:[%s8247_s3 + $0xf8] sm:$0xff]   ;;  %v6330_v48 = vld [vmem:[%s8247_s3 + $0xa8] sm:$0xff]  }
 0x157   :  { %v1068_v59 = vpop.f32.mrf.mxu0  ;;  %v1433_v60 = vpop.f32.mrf.mxu1 }
 0x158   :  { %v1555_v61 = vadd.f32 %v1530_v49, %v1190_v53  ;;  %v1166_v0 = vmax.f32 %v1067_v57, 0.0  ;;  %v1531_v9 = vmax.f32 %v1432_v58, 0.0  ;;  %v6331_v49 = vld [vmem:[%s8247_s3 + $0xe0] sm:$0xff]  }
 0x159   :  { %v1071_v1 = vpop.f32.mrf.mxu0  ;;  %v7235_v4 = vpop.f32.mrf.mxu1 }
 0x15a   :  { %v1580_v7 = vmul.f32 0.25, %v1555_v61  ;;  %v1191_v8 = vadd.f32 %v1166_v0, %v7132_v29  ;;  %v6326_v29 = vld [vmem:[%s8247_s3 + $0xb8] sm:$0xff]   ;;  %v1072_v59 = vadd.f32 %v7116_v3, %v1071_v1 }
 0x15b   :  { %v1073_v11 = vpop.f32.mrf.mxu0  ;;  %v1438_v13 = vpop.f32.mrf.mxu1 }
 0x15c   :  { %v1605_v14 = vpack.c.bf16 %v1580_v7, %v1580_v7  ;;  %v1556_v15 = vadd.f32 %v1531_v9, %v1191_v8  ;;  %v6332_v7 = vld [vmem:[%s8247_s3 + $0xa0] sm:$0xff]   ;;  %v6333_v8 = vld [vmem:[%s8247_s3 + $0xd8] sm:$0xff]  }
 0x15d   :  { %v1074_v17 = vpop.f32.mrf.mxu0  ;;  %v1439_v19 = vpop.f32.mrf.mxu1 }
 0x15e   :  { %v1581_v23 = vmul.f32 0.25, %v1556_v15  ;;  %5641 = vmatmul.mubr.bf16.vlgmr.msra.gmra.mxu1 %v1605_v14  ;;  %v1075_v50 = vadd.f32 %v7116_v3, %v1074_v17  ;;  %v1440_v60 = vadd.f32 %v7116_v3, %v1439_v19  ;;  %v1167_v19 = vmax.f32 %v1072_v59, 0.0 }
 0x15f   :  { %5665 = vmatpush3.bf16.msra.mxu1 %v6325_v20  ;;  %v1076_v24 = vpop.f32.mrf.mxu0  ;;  %v1441_v25 = vpop.f32.mrf.mxu1  ;;  %5680 = vmatprep.mubr.msk.bf16.mxu1 %vm6528_vm1, %v6527_v63 }
 0x160   :  { %v1622_v27 = vpack.c.bf16 %v1581_v23, %v1581_v23  ;;  %5666 = vmatprep.subr.bf16.mxu1 %v6527_v63  ;;  %v1168_v9 = vmax.f32 %v1075_v50, 0.0  ;;  %v1437_v23 = vadd.f32 %v7116_v3, %v7235_v4  ;;  %v1533_v24 = vmax.f32 %v1440_v60, 0.0 }
 0x161   :  { %v7250_v30 = vpop.f32.mrf.mxu0  ;;  %v7252_v31 = vpop.f32.mrf.mxu1 }
 0x162   :  { %5621 = vmatmul.mubr.bf16.vlgmr.msra.gmra.mxu0 %v1622_v27  ;;  %v1193_v27 = vadd.f32 %v1168_v9, %v7144_v47  ;;  %v1532_v50 = vmax.f32 %v1437_v23, 0.0 }
 0x163   :  { %5645 = vmatpush3.bf16.msra.mxu0 %v6326_v29  ;;  %5667 = vmatpush3.bf16.msra.mxu1 %v6327_v26  ;;  %v1081_v35 = vpop.f32.mrf.mxu0  ;;  %v1446_v36 = vpop.f32.mrf.mxu1  ;;  %v6334_v26 = vld [vmem:[%s8247_s3 + $0x98] sm:$0xff]  }
 0x164   :  { %5646 = vmatprep.subr.bf16.mxu0 %v6527_v63  ;;  %5668 = vmatprep.subr.bf16.mxu1 %v6527_v63 }
 0x165   :  { %v7262_v40 = vpop.f32.mrf.mxu0  ;;  %v7264_v43 = vpop.f32.mrf.mxu1  ;;  %5660 = vmatprep.mubr.msk.bf16.mxu0 %vm6528_vm1, %v6527_v63 }
 0x167   :  { %5647 = vmatpush3.bf16.msra.mxu0 %v6328_v37  ;;  %5669 = vmatpush3.bf16.msra.mxu1 %v6329_v39  ;;  %v1084_v45 = vpop.f32.mrf.mxu0  ;;  %v1449_v46 = vpop.f32.mrf.mxu1 }
 0x168   :  { %5648 = vmatprep.subr.bf16.mxu0 %v6527_v63  ;;  %5670 = vmatprep.subr.bf16.mxu1 %v6527_v63 }
 0x169   :  { %v1087_v51 = vpop.f32.mrf.mxu0  ;;  %v1452_v53 = vpop.f32.mrf.mxu1 }
 0x16a   :  { %v1088_v57 = vadd.f32 %v7116_v3, %v1087_v51  ;;  %v1453_v58 = vadd.f32 %v7116_v3, %v1452_v53  ;;  %v6336_v53 = vld [vmem:[%s8247_s3 + $0x90] sm:$0xff]  }
 0x16b   :  { %5649 = vmatpush3.bf16.msra.mxu0 %v6330_v48  ;;  %5671 = vmatpush3.bf16.msra.mxu1 %v6331_v49  ;;  %v1089_v61 = vpop.f32.mrf.mxu0  ;;  %v1454_v0 = vpop.f32.mrf.mxu1  ;;  %v1192_v49 = vadd.f32 %v1167_v19, %v7140_v38 }
 0x16c   :  { %v1171_v11 = vmax.f32 %v1088_v57, 0.0  ;;  %v1536_v13 = vmax.f32 %v1453_v58, 0.0  ;;  %5650 = vmatprep.subr.bf16.mxu0 %v6527_v63  ;;  %5672 = vmatprep.subr.bf16.mxu1 %v6527_v63  ;;  %v6337_v57 = vld [vmem:[%s8247_s3 + $0xc8] sm:$0xff]  }
 0x16d   :  { %v1090_v1 = vpop.f32.mrf.mxu0  ;;  %v1455_v20 = vpop.f32.mrf.mxu1  ;;  %v1557_v9 = vadd.f32 %v1532_v50, %v1192_v49  ;;  %v7349_v49 = vld [vmem:[%s8248_s2] ss:$0 sm:$0xff] }
 0x16e   :  { %v1196_v14 = vadd.f32 %v1171_v11, %v7156_v12  ;;  %v1091_v15 = vadd.f32 %v7116_v3, %v1090_v1  ;;  %v1456_v17 = vadd.f32 %v7116_v3, %v1455_v20  ;;  %v6335_v12 = vld [vmem:[%s8247_s3 + $0xd0] sm:$0xff]   ;;  %v6338_v1 = vld [vmem:[%s8247_s3 + $0x88] sm:$0xff]   ;;  %v6339_v20 = vld [vmem:[%s8247_s3 + $0xc0] sm:$0xff]  }
 0x16f   :  { %5651 = vmatpush3.bf16.msra.mxu0 %v6332_v7  ;;  %5673 = vmatpush3.bf16.msra.mxu1 %v6333_v8  ;;  %v1092_v25 = vpop.f32.mrf.mxu0  ;;  %v1457_v29 = vpop.f32.mrf.mxu1 }
 0x170   :  { %v7301_v35 = vadd.f32 %v1536_v13, %v1196_v14  ;;  %v1172_v36 = vmax.f32 %v1091_v15, 0.0  ;;  %v1537_v37 = vmax.f32 %v1456_v17, 0.0  ;;  %5652 = vmatprep.subr.bf16.mxu0 %v6527_v63  ;;  %5674 = vmatprep.subr.bf16.mxu1 %v6527_v63 }
 0x171   :  { %v1095_v4 = vpop.f32.mrf.mxu0  ;;  %v1460_v39 = vpop.f32.mrf.mxu1 }
 0x172   :  { %v1197_v45 = vadd.f32 %v1172_v36, %v7160_v22  ;;  %v1096_v46 = vadd.f32 %v7116_v3, %v1095_v4  ;;  %v1461_v48 = vadd.f32 %v7116_v3, %v1460_v39  ;;  %v1558_v22 = vadd.f32 %v1533_v24, %v1193_v27  ;;  %v6340_v36 = vld [vmem:[%s8247_s3 + $0x80] sm:$0xff]  }
 0x173   :  { %5653 = vmatpush3.bf16.msra.mxu0 %v6334_v26  ;;  %5675 = vmatpush3.bf16.msra.mxu1 %v6335_v12  ;;  %v1097_v47 = vpop.f32.mrf.mxu0  ;;  %v1462_v51 = vpop.f32.mrf.mxu1  ;;  %v1582_v26 = vmul.f32 0.25, %v1557_v9 }
 0x174   :  { %v7315_v58 = vadd.f32 %v1537_v37, %v1197_v45  ;;  %v1173_v59 = vmax.f32 %v1096_v46, 0.0  ;;  %v1538_v60 = vmax.f32 %v1461_v48, 0.0  ;;  %5654 = vmatprep.subr.bf16.mxu0 %v6527_v63  ;;  %5676 = vmatprep.subr.bf16.mxu1 %v6527_v63  ;;  %v1583_v14 = vmul.f32 0.25, %v1558_v22  ;;  %v6341_v37 = vld [vmem:[%s8247_s3 + $0x178] sm:$0xff]  }
 0x175   :  { %v1098_v38 = vpop.f32.mrf.mxu0  ;;  %v1463_v61 = vpop.f32.mrf.mxu1  ;;  %v1816_v22 = vpack.c.bf16 %v1582_v26, %v1582_v26 }
 0x176   :  { %v1198_v0 = vadd.f32 %v1173_v59, %v7164_v32  ;;  %v1099_v7 = vadd.f32 %v7116_v3, %v1098_v38  ;;  %v1464_v8 = vadd.f32 %v7116_v3, %v1463_v61  ;;  %v1923_v4 = vpack.c.bf16 %v1583_v14, %v1583_v14 }
 0x177   :  { %5655 = vmatpush3.bf16.msra.mxu0 %v6336_v53  ;;  %5677 = vmatpush3.bf16.msra.mxu1 %v6337_v57  ;;  %v1100_v11 = vpop.f32.mrf.mxu0  ;;  %v1465_v13 = vpop.f32.mrf.mxu1  ;;  %v6342_v57 = vld [vmem:[%s8247_s3 + $0x138] sm:$0xff]  }
 0x178   :  { %v7328_v15 = vadd.f32 %v1538_v60, %v1198_v0  ;;  %v1174_v32 = vmax.f32 %v1099_v7, 0.0  ;;  %v1539_v17 = vmax.f32 %v1464_v8, 0.0  ;;  %5656 = vmatprep.subr.bf16.mxu0 %v6527_v63  ;;  %5678 = vmatprep.subr.bf16.mxu1 %v6527_v63 }
 0x179   :  { %v1103_v19 = vpop.f32.mrf.mxu0  ;;  %v1468_v23 = vpop.f32.mrf.mxu1 }
 0x17a   :  { %v1199_v24 = vadd.f32 %v1174_v32, %v7168_v42  ;;  %v1104_v25 = vadd.f32 %v7116_v3, %v1103_v19  ;;  %v1469_v29 = vadd.f32 %v7116_v3, %v1468_v23 }
 0x17b   :  { %5657 = vmatpush3.bf16.msra.mxu0 %v6338_v1  ;;  %5679 = vmatpush3.bf16.msra.mxu1 %v6339_v20  ;;  %v1105_v12 = vpop.f32.mrf.mxu0  ;;  %v1470_v27 = vpop.f32.mrf.mxu1  ;;  %v6344_v1 = vld [vmem:[%s8247_s3 + $0x130] sm:$0xff]   ;;  %v6345_v20 = vld [vmem:[%s8247_s3 + $0x168] sm:$0xff]  }
 0x17c   :  { %v7341_v39 = vadd.f32 %v1539_v17, %v1199_v24  ;;  %v1175_v42 = vmax.f32 %v1104_v25, 0.0  ;;  %v1540_v45 = vmax.f32 %v1469_v29, 0.0  ;;  %5658 = vmatprep.subr.bf16.mxu0 %v6527_v63  ;;  %5704 = vmatprep.subr.bf16.mxu1 %v6527_v63  ;;  %v6346_v12 = vld [vmem:[%s8247_s3 + $0x128] sm:$0xff]   ;;  %v6347_v27 = vld [vmem:[%s8247_s3 + $0x160] sm:$0xff]  }
 0x17d   :  { %v1106_v3 = vpop.f32.mrf.mxu0  ;;  %v1471_v46 = vpop.f32.mrf.mxu1 }
 0x17e   :  { %v1200_v48 = vadd.f32 %v1175_v42, %v7172_v52  ;;  %v1107_v50 = vadd.f32 %v7349_v49, %v1106_v3  ;;  %5681 = vmatmul.mubr.bf16.vlgmr.msra.gmra.mxu1 %v1923_v4  ;;  %v1472_v47 = vadd.f32 %v7349_v49, %v1471_v46  ;;  %v6343_v52 = vld [vmem:[%s8247_s3 + $0x170] sm:$0xff]  }
 0x17f   :  { %5659 = vmatpush3.bf16.msra.mxu0 %v6340_v36  ;;  %5705 = vmatpush3.bf16.msra.mxu1 %v6341_v37  ;;  %v1108_v51 = vpop.f32.mrf.mxu0  ;;  %v1473_v53 = vpop.f32.mrf.mxu1  ;;  %v1083_v36 = vadd.f32 %v7349_v49, %v7262_v40  ;;  %v1448_v40 = vadd.f32 %v7349_v49, %v7264_v43 }
 0x180   :  { %v7359_v59 = vadd.f32 %v1540_v45, %v1200_v48  ;;  %v1176_v60 = vmax.f32 %v1107_v50, 0.0  ;;  %v1541_v38 = vmax.f32 %v1472_v47, 0.0  ;;  %5684 = vmatprep.subr.bf16.mxu0 %v6527_v63  ;;  %5706 = vmatprep.subr.bf16.mxu1 %v6527_v63  ;;  %v1080_v50 = vadd.f32 %v7349_v49, %v7250_v30  ;;  %v6348_v53 = vld [vmem:[%s8247_s3 + $0x120] sm:$0xff]  }
 0x181   :  { %v1111_v61 = vpop.f32.mrf.mxu0  ;;  %v1476_v0 = vpop.f32.mrf.mxu1  ;;  %5720 = vmatprep.mubr.msk.bf16.mxu1 %vm6528_vm1, %v6527_v63 }
 0x182   :  { %v1201_v7 = vadd.f32 %v1176_v60, %v7176_v62  ;;  %v1112_v8 = vadd.f32 %v7349_v49, %v1111_v61  ;;  %5661 = vmatmul.mubr.bf16.vlgmr.msra.gmra.mxu0 %v1816_v22  ;;  %v1477_v9 = vadd.f32 %v7349_v49, %v1476_v0 }
 0x183   :  { %5685 = vmatpush3.bf16.msra.mxu0 %v6342_v57  ;;  %5707 = vmatpush3.bf16.msra.mxu1 %v6343_v52  ;;  %v1113_v11 = vpop.f32.mrf.mxu0  ;;  %v1478_v13 = vpop.f32.mrf.mxu1  ;;  %v1170_v57 = vmax.f32 %v1083_v36, 0.0  ;;  %v6353_v36 = vld [vmem:[%s8247_s3 + $0x148] sm:$0xff]  }
 0x184   :  { %v7374_v14 = vadd.f32 %v1541_v38, %v1201_v7  ;;  %v1177_v62 = vmax.f32 %v1112_v8, 0.0  ;;  %v1542_v32 = vmax.f32 %v1477_v9, 0.0  ;;  %5686 = vmatprep.subr.bf16.mxu0 %v6527_v63  ;;  %5708 = vmatprep.subr.bf16.mxu1 %v6527_v63  ;;  %v1169_v7 = vmax.f32 %v1080_v50, 0.0 }
 0x185   :  { %v1114_v17 = vpop.f32.mrf.mxu0  ;;  %v1479_v19 = vpop.f32.mrf.mxu1  ;;  %5700 = vmatprep.mubr.msk.bf16.mxu0 %vm6528_vm1, %v6527_v63  ;;  %v1445_v8 = vadd.f32 %v7349_v49, %v7252_v31  ;;  %v1535_v9 = vmax.f32 %v1448_v40, 0.0 }
 0x186   :  { %v1202_v23 = vadd.f32 %v1177_v62, %v7180_v10  ;;  %v1115_v24 = vadd.f32 %v7349_v49, %v1114_v17  ;;  %v1480_v25 = vadd.f32 %v7349_v49, %v1479_v19 }
 0x187   :  { %5687 = vmatpush3.bf16.msra.mxu0 %v6344_v1  ;;  %5709 = vmatpush3.bf16.msra.mxu1 %v6345_v20  ;;  %v1116_v29 = vpop.f32.mrf.mxu0  ;;  %v1481_v26 = vpop.f32.mrf.mxu1  ;;  %v6350_v1 = vld [vmem:[%s8247_s3 + $0x118] sm:$0xff]   ;;  %v1195_v20 = vadd.f32 %v1170_v57, %v7152_v2 }
 0x188   :  { %v7391_v10 = vadd.f32 %v1542_v32, %v1202_v23  ;;  %v1178_v37 = vmax.f32 %v1115_v24, 0.0  ;;  %v1543_v4 = vmax.f32 %v1480_v25, 0.0  ;;  %5688 = vmatprep.subr.bf16.mxu0 %v6527_v63  ;;  %5710 = vmatprep.subr.bf16.mxu1 %v6527_v63  ;;  %v1194_v29 = vadd.f32 %v1169_v7, %v7148_v56 }
 0x189   :  { %v1119_v42 = vpop.f32.mrf.mxu0  ;;  %v1484_v45 = vpop.f32.mrf.mxu1  ;;  %v1534_v26 = vmax.f32 %v1445_v8, 0.0 }
 0x18a   :  { %v1203_v3 = vadd.f32 %v1178_v37, %v7184_v21  ;;  %v1120_v46 = vadd.f32 %v7349_v49, %v1119_v42  ;;  %v1485_v48 = vadd.f32 %v7349_v49, %v1484_v45  ;;  %v6349_v21 = vld [vmem:[%s8247_s3 + $0x158] sm:$0xff]  }
 0x18b   :  { %5689 = vmatpush3.bf16.msra.mxu0 %v6346_v12  ;;  %5711 = vmatpush3.bf16.msra.mxu1 %v6347_v27  ;;  %v1121_v47 = vpop.f32.mrf.mxu0  ;;  %v1486_v51 = vpop.f32.mrf.mxu1  ;;  %v6352_v27 = vld [vmem:[%s8247_s3 + $0x110] sm:$0xff]   ;;  %v1559_v50 = vadd.f32 %v1534_v26, %v1194_v29 }
 0x18c   :  { %v7408_v52 = vadd.f32 %v1543_v4, %v1203_v3  ;;  %v1179_v22 = vmax.f32 %v1120_v46, 0.0  ;;  %v1544_v30 = vmax.f32 %v1485_v48, 0.0  ;;  %5690 = vmatprep.subr.bf16.mxu0 %v6527_v63  ;;  %5712 = vmatprep.subr.bf16.mxu1 %v6527_v63  ;;  %v6354_v51 = vld [vmem:[%s8247_s3 + $0x108] sm:$0xff]   ;;  %v6359_v29 = vld [vmem:[%s8247_s3 + $0x1f0] sm:$0xff]  }
 0x18d   :  { %v1122_v43 = vpop.f32.mrf.mxu0  ;;  %v1487_v60 = vpop.f32.mrf.mxu1 }
 0x18e   :  { %v1204_v38 = vadd.f32 %v1179_v22, %v7188_v33  ;;  %v1123_v61 = vadd.f32 %v7349_v49, %v1122_v43  ;;  %v1488_v0 = vadd.f32 %v7349_v49, %v1487_v60  ;;  %v6351_v33 = vld [vmem:[%s8247_s3 + $0x150] sm:$0xff]  }
 0x18f   :  { %5691 = vmatpush3.bf16.msra.mxu0 %v6348_v53  ;;  %5713 = vmatpush3.bf16.msra.mxu1 %v6349_v21  ;;  %v1124_v11 = vpop.f32.mrf.mxu0  ;;  %v1489_v13 = vpop.f32.mrf.mxu1  ;;  %v6355_v53 = vld [vmem:[%s8247_s3 + $0x140] sm:$0xff]  }
 0x190   :  { %v7424_v62 = vadd.f32 %v1544_v30, %v1204_v38  ;;  %v1180_v32 = vmax.f32 %v1123_v61, 0.0  ;;  %v1545_v17 = vmax.f32 %v1488_v0, 0.0  ;;  %5692 = vmatprep.subr.bf16.mxu0 %v6527_v63  ;;  %5714 = vmatprep.subr.bf16.mxu1 %v6527_v63  ;;  %v1584_v0 = vmul.f32 0.25, %v1559_v50  ;;  %v6357_v11 = vld [vmem:[%s8247_s3 + $0x1f8] sm:$0xff]  }
 0x191   :  { %v1127_v31 = vpop.f32.mrf.mxu0  ;;  %v1492_v19 = vpop.f32.mrf.mxu1 }
 0x192   :  { %v1205_v23 = vadd.f32 %v1180_v32, %v7192_v44  ;;  %v1128_v24 = vadd.f32 %v7349_v49, %v1127_v31  ;;  %v1493_v25 = vadd.f32 %v7349_v49, %v1492_v19  ;;  %v1560_v44 = vadd.f32 %v1535_v9, %v1195_v20  ;;  %v6356_v9 = vld [vmem:[%s8247_s3 + $0x100] sm:$0xff]  }
 0x193   :  { %5693 = vmatpush3.bf16.msra.mxu0 %v6350_v1  ;;  %5715 = vmatpush3.bf16.msra.mxu1 %v6351_v33  ;;  %v1129_v2 = vpop.f32.mrf.mxu0  ;;  %v1494_v12 = vpop.f32.mrf.mxu1  ;;  %v2030_v26 = vpack.c.bf16 %v1584_v0, %v1584_v0 }
 0x194   :  { %v7438_v37 = vadd.f32 %v1545_v17, %v1205_v23  ;;  %v1181_v4 = vmax.f32 %v1128_v24, 0.0  ;;  %v1546_v42 = vmax.f32 %v1493_v25, 0.0  ;;  %5694 = vmatprep.subr.bf16.mxu0 %v6527_v63  ;;  %5716 = vmatprep.subr.bf16.mxu1 %v6527_v63  ;;  %v1585_v21 = vmul.f32 0.25, %v1560_v44  ;;  %v6358_v25 = vld [vmem:[%s8247_s3 + $0x1b8] sm:$0xff]  }
 0x195   :  { %v1130_v56 = vpop.f32.mrf.mxu0  ;;  %v1495_v45 = vpop.f32.mrf.mxu1 }
 0x196   :  { %v1206_v3 = vadd.f32 %v1181_v4, %v7196_v55  ;;  %v1131_v46 = vadd.f32 %v7349_v49, %v1130_v56  ;;  %v1496_v48 = vadd.f32 %v7349_v49, %v1495_v45  ;;  %v2137_v13 = vpack.c.bf16 %v1585_v21, %v1585_v21 }
 0x197   :  { %5695 = vmatpush3.bf16.msra.mxu0 %v6352_v27  ;;  %5717 = vmatpush3.bf16.msra.mxu1 %v6353_v36  ;;  %v1132_v40 = vpop.f32.mrf.mxu0  ;;  %v1497_v47 = vpop.f32.mrf.mxu1 }
 0x198   :  { %v7451_v57 = vadd.f32 %v1546_v42, %v1206_v3  ;;  %v1182_v55 = vmax.f32 %v1131_v46, 0.0  ;;  %v1547_v22 = vmax.f32 %v1496_v48, 0.0  ;;  %5696 = vmatprep.subr.bf16.mxu0 %v6527_v63  ;;  %5718 = vmatprep.subr.bf16.mxu1 %v6527_v63  ;;  %v6360_v3 = vld [vmem:[%s8247_s3 + $0x1b0] sm:$0xff]   ;;  %v6361_v46 = vld [vmem:[%s8247_s3 + $0x1e8] sm:$0xff]  }
 0x199   :  { %v1135_v30 = vpop.f32.mrf.mxu0  ;;  %v1500_v43 = vpop.f32.mrf.mxu1 }
 0x19a   :  { %v1207_v60 = vadd.f32 %v1182_v55, %v7200_v5  ;;  %v1136_v38 = vadd.f32 %v7349_v49, %v1135_v30  ;;  %v1501_v61 = vadd.f32 %v7349_v49, %v1500_v43  ;;  %v6362_v30 = vld [vmem:[%s8247_s3 + $0x1a8] sm:$0xff]   ;;  %v6363_v43 = vld [vmem:[%s8247_s3 + $0x1e0] sm:$0xff]  }
 0x19b   :  { %5697 = vmatpush3.bf16.msra.mxu0 %v6354_v51  ;;  %5719 = vmatpush3.bf16.msra.mxu1 %v6355_v53  ;;  %v1137_v7 = vpop.f32.mrf.mxu0  ;;  %v1502_v8 = vpop.f32.mrf.mxu1 }
 0x19c   :  { %v7464_v1 = vadd.f32 %v1547_v22, %v1207_v60  ;;  %v1183_v5 = vmax.f32 %v1136_v38, 0.0  ;;  %v1548_v33 = vmax.f32 %v1501_v61, 0.0  ;;  %5698 = vmatprep.subr.bf16.mxu0 %v6527_v63  ;;  %5744 = vmatprep.subr.bf16.mxu1 %v6527_v63 }
 0x19d   :  { %v1138_v20 = vpop.f32.mrf.mxu0  ;;  %v1503_v32 = vpop.f32.mrf.mxu1 }
 0x19e   :  { %v1208_v17 = vadd.f32 %v1183_v5, %v7204_v16  ;;  %v1139_v31 = vadd.f32 %v7349_v49, %v1138_v20  ;;  %5721 = vmatmul.mubr.bf16.vlgmr.msra.gmra.mxu1 %v2137_v13  ;;  %v1504_v19 = vadd.f32 %v7349_v49, %v1503_v32  ;;  %v6364_v5 = vld [vmem:[%s8247_s3 + $0x1a0] sm:$0xff]  }
 0x19f   :  { %5699 = vmatpush3.bf16.msra.mxu0 %v6356_v9  ;;  %5745 = vmatpush3.bf16.msra.mxu1 %v6357_v11  ;;  %v1140_v23 = vpop.f32.mrf.mxu0  ;;  %v1505_v24 = vpop.f32.mrf.mxu1 }
 0x1a0   :  { %v7477_v2 = vadd.f32 %v1548_v33, %v1208_v17  ;;  %v1184_v16 = vmax.f32 %v1139_v31, 0.0  ;;  %v1549_v12 = vmax.f32 %v1504_v19, 0.0  ;;  %5724 = vmatprep.subr.bf16.mxu0 %v6527_v63  ;;  %5746 = vmatprep.subr.bf16.mxu1 %v6527_v63  ;;  %v6365_v33 = vld [vmem:[%s8247_s3 + $0x1d8] sm:$0xff]  }
 0x1a1   :  { %v1143_v27 = vpop.f32.mrf.mxu0  ;;  %v1508_v36 = vpop.f32.mrf.mxu1  ;;  %5760 = vmatprep.mubr.msk.bf16.mxu1 %vm6528_vm1, %v6527_v63 }
 0x1a2   :  { %v1209_v44 = vadd.f32 %v1184_v16, %v7208_v28  ;;  %v1144_v4 = vadd.f32 %v7349_v49, %v1143_v27  ;;  %5701 = vmatmul.mubr.bf16.vlgmr.msra.gmra.mxu0 %v2030_v26  ;;  %v1509_v42 = vadd.f32 %v7349_v49, %v1508_v36  ;;  %v6366_v26 = vld [vmem:[%s8247_s3 + $0x198] sm:$0xff]   ;;  %v6367_v16 = vld [vmem:[%s8247_s3 + $0x1d0] sm:$0xff]  }
 0x1a3   :  { %5725 = vmatpush3.bf16.msra.mxu0 %v6358_v25  ;;  %5747 = vmatpush3.bf16.msra.mxu1 %v6359_v29  ;;  %v1145_v56 = vpop.f32.mrf.mxu0  ;;  %v1510_v45 = vpop.f32.mrf.mxu1 }
 0x1a4   :  { %v7492_v48 = vadd.f32 %v1549_v12, %v1209_v44  ;;  %v1185_v28 = vmax.f32 %v1144_v4, 0.0  ;;  %v1550_v50 = vmax.f32 %v1509_v42, 0.0  ;;  %5726 = vmatprep.subr.bf16.mxu0 %v6527_v63  ;;  %5748 = vmatprep.subr.bf16.mxu1 %v6527_v63  ;;  %v6368_v45 = vld [vmem:[%s8247_s3 + $0x190] sm:$0xff]  }
 0x1a5   :  { %v1146_v40 = vpop.f32.mrf.mxu0  ;;  %v1511_v47 = vpop.f32.mrf.mxu1  ;;  %5740 = vmatprep.mubr.msk.bf16.mxu0 %vm6528_vm1, %v6527_v63 }
 0x1a6   :  { %v1210_v51 = vadd.f32 %v1185_v28, %v7212_v41  ;;  %v1147_v53 = vadd.f32 %v7349_v49, %v1146_v40  ;;  %v1512_v21 = vadd.f32 %v7349_v49, %v1511_v47 }
 0x1a7   :  { %5727 = vmatpush3.bf16.msra.mxu0 %v6360_v3  ;;  %5749 = vmatpush3.bf16.msra.mxu1 %v6361_v46  ;;  %v1148_v55 = vpop.f32.mrf.mxu0  ;;  %v1513_v22 = vpop.f32.mrf.mxu1  ;;  %v6369_v3 = vld [vmem:[%s8247_s3 + $0x1c8] sm:$0xff]  }
 0x1a8   :  { %v7507_v60 = vadd.f32 %v1550_v50, %v1210_v51  ;;  %v1186_v38 = vmax.f32 %v1147_v53, 0.0  ;;  %v1551_v41 = vmax.f32 %v1512_v21, 0.0  ;;  %5728 = vmatprep.subr.bf16.mxu0 %v6527_v63  ;;  %5750 = vmatprep.subr.bf16.mxu1 %v6527_v63  ;;  %v6370_v53 = vld [vmem:[%s8247_s3 + $0x188] sm:$0xff]   ;;  %v6371_v21 = vld [vmem:[%s8247_s3 + $0x1c0] sm:$0xff]  }
 0x1a9   :  { %v1151_v61 = vpop.f32.mrf.mxu0  ;;  %v1516_v0 = vpop.f32.mrf.mxu1 }
 0x1aa   :  { %v1211_v7 = vadd.f32 %v1186_v38, %v7216_v54  ;;  %v1152_v8 = vadd.f32 %v7349_v49, %v1151_v61  ;;  %v1517_v9 = vadd.f32 %v7349_v49, %v1516_v0  ;;  %v6373_v38 = vld [vmem:[%s8247_s3 + $0x278] sm:$0xff]   ;;  %v6375_v0 = vld [vmem:[%s8247_s3 + $0x270] sm:$0xff]  }
 0x1ab   :  { %5729 = vmatpush3.bf16.msra.mxu0 %v6362_v30  ;;  %5751 = vmatpush3.bf16.msra.mxu1 %v6363_v43  ;;  %v1153_v11 = vpop.f32.mrf.mxu0  ;;  %v1518_v13 = vpop.f32.mrf.mxu1  ;;  %v1587_v30 = vmul.f32 0.25, %v7315_v58  ;;  %v6374_v58 = vld [vmem:[%s8247_s3 + $0x238] sm:$0xff]  }
 0x1ac   :  { %v7520_v20 = vadd.f32 %v1551_v41, %v1211_v7  ;;  %v1187_v32 = vmax.f32 %v1152_v8, 0.0  ;;  %v1552_v54 = vmax.f32 %v1517_v9, 0.0  ;;  %5730 = vmatprep.subr.bf16.mxu0 %v6527_v63  ;;  %5752 = vmatprep.subr.bf16.mxu1 %v6527_v63  ;;  %v1586_v41 = vmul.f32 0.25, %v7301_v35  ;;  %v6376_v35 = vld [vmem:[%s8247_s3 + $0x230] sm:$0xff]   ;;  %v6377_v8 = vld [vmem:[%s8247_s3 + $0x268] sm:$0xff]   ;;  %v6379_v11 = vld [vmem:[%s8247_s3 + $0x260] sm:$0xff]  }
 0x1ad   :  { %v1154_v17 = vpop.f32.mrf.mxu0  ;;  %v1519_v31 = vpop.f32.mrf.mxu1  ;;  %v2351_v61 = vpack.c.bf16 %v1587_v30, %v1587_v30  ;;  %v6378_v9 = vld [vmem:[%s8247_s3 + $0x228] sm:$0xff]   ;;  %v6380_v13 = vld [vmem:[%s8247_s3 + $0x220] sm:$0xff]  }
 0x1ae   :  { %v1212_v19 = vadd.f32 %v1187_v32, %v7220_v6  ;;  %v1155_v23 = vadd.f32 %v7349_v49, %v1154_v17  ;;  %v1520_v24 = vadd.f32 %v7349_v49, %v1519_v31  ;;  %v2244_v7 = vpack.c.bf16 %v1586_v41, %v1586_v41  ;;  %v6383_v32 = vld [vmem:[%s8247_s3 + $0x250] sm:$0xff]   ;;  %v6385_v17 = vld [vmem:[%s8247_s3 + $0x248] sm:$0xff]   ;;  %v6413_v41 = vld [vmem:[%s8247_s3 + $0x358] sm:$0xff]  }
 0x1af   :  { %5731 = vmatpush3.bf16.msra.mxu0 %v6364_v5  ;;  %5753 = vmatpush3.bf16.msra.mxu1 %v6365_v33  ;;  %v1156_v25 = vpop.f32.mrf.mxu0  ;;  %v1521_v29 = vpop.f32.mrf.mxu1  ;;  %v6381_v5 = vld [vmem:[%s8247_s3 + $0x258] sm:$0xff]   ;;  %v6386_v31 = vld [vmem:[%s8247_s3 + $0x208] sm:$0xff]  }
 0x1b0   :  { %v7533_v12 = vadd.f32 %v1552_v54, %v1212_v19  ;;  %v1188_v27 = vmax.f32 %v1155_v23, 0.0  ;;  %v1553_v6 = vmax.f32 %v1520_v24, 0.0  ;;  %5732 = vmatprep.subr.bf16.mxu0 %v6527_v63  ;;  %5754 = vmatprep.subr.bf16.mxu1 %v6527_v63  ;;  %v6382_v33 = vld [vmem:[%s8247_s3 + $0x218] sm:$0xff]   ;;  %v6384_v54 = vld [vmem:[%s8247_s3 + $0x210] sm:$0xff]   ;;  %v6387_v19 = vld [vmem:[%s8247_s3 + $0x240] sm:$0xff]   ;;  %v1589_v23 = vmul.f32 0.25, %v7341_v39 }
 0x1b1   :  { %v1159_v36 = vpop.f32.mrf.mxu0  ;;  %v1524_v44 = vpop.f32.mrf.mxu1  ;;  %v6388_v24 = vld [vmem:[%s8247_s3 + $0x200] sm:$0xff]   ;;  %v6389_v25 = vld [vmem:[%s8247_s3 + $0x2f8] sm:$0xff]   ;;  %v1588_v29 = vmul.f32 0.25, %v7328_v15  ;;  %v6392_v15 = vld [vmem:[%s8247_s3 + $0x2b0] sm:$0xff]  }
 0x1b2   :  { %v1213_v4 = vadd.f32 %v1188_v27, %v7224_v18  ;;  %v1160_v42 = vadd.f32 %v7349_v49, %v1159_v36  ;;  %v1525_v56 = vadd.f32 %v7349_v49, %v1524_v44  ;;  %v6390_v39 = vld [vmem:[%s8247_s3 + $0x2b8] sm:$0xff]   ;;  %v6394_v36 = vld [vmem:[%s8247_s3 + $0x2a8] sm:$0xff]   ;;  %v6395_v44 = vld [vmem:[%s8247_s3 + $0x2e0] sm:$0xff]  }
 0x1b3   :  { %5733 = vmatpush3.bf16.msra.mxu0 %v6366_v26  ;;  %5755 = vmatpush3.bf16.msra.mxu1 %v6367_v16  ;;  %v1161_v46 = vpop.f32.mrf.mxu0  ;;  %v1526_v28 = vpop.f32.mrf.mxu1  ;;  %v2565_v26 = vpack.c.bf16 %v1589_v23, %v1589_v23  ;;  %v6391_v16 = vld [vmem:[%s8247_s3 + $0x2f0] sm:$0xff]   ;;  %v2458_v27 = vpack.c.bf16 %v1588_v29, %v1588_v29  ;;  %v6410_v30 = vld [vmem:[%s8247_s3 + $0x328] sm:$0xff]  }
 0x1b4   :  { %v7546_v50 = vadd.f32 %v1553_v6, %v1213_v4  ;;  %v1189_v40 = vmax.f32 %v1160_v42, 0.0  ;;  %v1554_v18 = vmax.f32 %v1525_v56, 0.0  ;;  %5734 = vmatprep.subr.bf16.mxu0 %v6527_v63  ;;  %5756 = vmatprep.subr.bf16.mxu1 %v6527_v63  ;;  %v6393_v6 = vld [vmem:[%s8247_s3 + $0x2e8] sm:$0xff]   ;;  %v6396_v4 = vld [vmem:[%s8247_s3 + $0x2a0] sm:$0xff]   ;;  %v6397_v42 = vld [vmem:[%s8247_s3 + $0x2d8] sm:$0xff]  }
 0x1b5   :  { %v1162_v49 = vpop.f32.mrf.mxu0  ;;  %v1527_v47 = vpop.f32.mrf.mxu1  ;;  %v6398_v56 = vld [vmem:[%s8247_s3 + $0x298] sm:$0xff]   ;;  %v6401_v46 = vld [vmem:[%s8247_s3 + $0x2c8] sm:$0xff]  }
 0x1b6   :  { %v1214_v51 = vadd.f32 %v1189_v40, %v7228_v34  ;;  %v6372_v34 = vld [vmem:[%s8247_s3 + $0x180] sm:$0xff]   ;;  %v6402_v28 = vld [vmem:[%s8247_s3 + $0x288] sm:$0xff]   ;;  %v6405_v47 = vld [vmem:[%s8247_s3 + $0x378] sm:$0xff]  }
 0x1b7   :  { %5735 = vmatpush3.bf16.msra.mxu0 %v6368_v45  ;;  %5757 = vmatpush3.bf16.msra.mxu1 %v6369_v3  ;;  %v1163_v55 = vpop.f32.mrf.mxu0  ;;  %v1528_v22 = vpop.f32.mrf.mxu1  ;;  %v6399_v45 = vld [vmem:[%s8247_s3 + $0x2d0] sm:$0xff]   ;;  %v6403_v40 = vld [vmem:[%s8247_s3 + $0x2c0] sm:$0xff]  }
 0x1b8   :  { %v7558_v43 = vadd.f32 %v1554_v18, %v1214_v51  ;;  %5736 = vmatprep.subr.bf16.mxu0 %v6527_v63  ;;  %5758 = vmatprep.subr.bf16.mxu1 %v6527_v63  ;;  %v6400_v3 = vld [vmem:[%s8247_s3 + $0x290] sm:$0xff]   ;;  %v1591_v18 = vmul.f32 0.25, %v7374_v14  ;;  %v6404_v49 = vld [vmem:[%s8247_s3 + $0x280] sm:$0xff]   ;;  %v1590_v51 = vmul.f32 0.25, %v7359_v59  ;;  %v6406_v14 = vld [vmem:[%s8247_s3 + $0x338] sm:$0xff]  }
 0x1b9   :  { %v6408_v59 = vld [vmem:[%s8247_s3 + $0x330] sm:$0xff]   ;;  %v6409_v22 = vld [vmem:[%s8247_s3 + $0x368] sm:$0xff]  }
 0x1ba   :  { %v2672_v55 = vpack.c.bf16 %v1590_v51, %v1590_v51  ;;  %v6439_v51 = vld [vmem:[%s8247_s3 + $0x470] sm:$0xff]  }
 0x1bb   :  { %5737 = vmatpush3.bf16.msra.mxu0 %v6370_v53  ;;  %5759 = vmatpush3.bf16.msra.mxu1 %v6371_v21  ;;  %v2779_v53 = vpack.c.bf16 %v1591_v18, %v1591_v18  ;;  %v6407_v21 = vld [vmem:[%s8247_s3 + $0x370] sm:$0xff]   ;;  %v1594_v18 = vmul.f32 0.25, %v7424_v62 }
 0x1bc   :  { %5738 = vmatprep.subr.bf16.mxu0 %v6527_v63  ;;  %5784 = vmatprep.subr.bf16.mxu1 %v6527_v63 }
 0x1be   :  { %5761 = vmatmul.mubr.bf16.vlgmr.msra.gmra.mxu1 %v2351_v61  ;;  %v6414_v61 = vld [vmem:[%s8247_s3 + $0x318] sm:$0xff]  }
 0x1bf   :  { %5739 = vmatpush3.bf16.msra.mxu0 %v6372_v34  ;;  %5785 = vmatpush3.bf16.msra.mxu1 %v6373_v38  ;;  %v6411_v34 = vld [vmem:[%s8247_s3 + $0x360] sm:$0xff]  }
 0x1c0   :  { %5764 = vmatprep.subr.bf16.mxu0 %v6527_v63  ;;  %5786 = vmatprep.subr.bf16.mxu1 %v6527_v63  ;;  %v6412_v38 = vld [vmem:[%s8247_s3 + $0x320] sm:$0xff]  }
 0x1c1   :  { %5800 = vmatprep.mubr.msk.bf16.mxu1 %vm6528_vm1, %v6527_v63 }
 0x1c2   :  { %5741 = vmatmul.mubr.bf16.vlgmr.msra.gmra.mxu0 %v2244_v7  ;;  %v6417_v7 = vld [vmem:[%s8247_s3 + $0x348] sm:$0xff]  }
 0x1c3   :  { %5765 = vmatpush3.bf16.msra.mxu0 %v6374_v58  ;;  %5787 = vmatpush3.bf16.msra.mxu1 %v6375_v0  ;;  %v6415_v58 = vld [vmem:[%s8247_s3 + $0x350] sm:$0xff]  }
 0x1c4   :  { %5766 = vmatprep.subr.bf16.mxu0 %v6527_v63  ;;  %5788 = vmatprep.subr.bf16.mxu1 %v6527_v63  ;;  %v6416_v0 = vld [vmem:[%s8247_s3 + $0x310] sm:$0xff]  }
 0x1c5   :  { %5780 = vmatprep.mubr.msk.bf16.mxu0 %vm6528_vm1, %v6527_v63 }
 0x1c7   :  { %5767 = vmatpush3.bf16.msra.mxu0 %v6376_v35  ;;  %5789 = vmatpush3.bf16.msra.mxu1 %v6377_v8  ;;  %v6418_v35 = vld [vmem:[%s8247_s3 + $0x308] sm:$0xff]   ;;  %v6419_v8 = vld [vmem:[%s8247_s3 + $0x340] sm:$0xff]  }
 0x1c8   :  { %5768 = vmatprep.subr.bf16.mxu0 %v6527_v63  ;;  %5790 = vmatprep.subr.bf16.mxu1 %v6527_v63 }
 0x1cb   :  { %5769 = vmatpush3.bf16.msra.mxu0 %v6378_v9  ;;  %5791 = vmatpush3.bf16.msra.mxu1 %v6379_v11  ;;  %v1593_v9 = vmul.f32 0.25, %v7408_v52  ;;  %v6420_v11 = vld [vmem:[%s8247_s3 + $0x300] sm:$0xff]  }
 0x1cc   :  { %5770 = vmatprep.subr.bf16.mxu0 %v6527_v63  ;;  %5792 = vmatprep.subr.bf16.mxu1 %v6527_v63 }
 0x1cf   :  { %5771 = vmatpush3.bf16.msra.mxu0 %v6380_v13  ;;  %5793 = vmatpush3.bf16.msra.mxu1 %v6381_v5  ;;  %v6421_v13 = vld [vmem:[%s8247_s3 + $0x3f8] sm:$0xff]   ;;  %v1592_v5 = vmul.f32 0.25, %v7391_v10 }
 0x1d0   :  { %5772 = vmatprep.subr.bf16.mxu0 %v6527_v63  ;;  %5794 = vmatprep.subr.bf16.mxu1 %v6527_v63 }
 0x1d3   :  { %5773 = vmatpush3.bf16.msra.mxu0 %v6382_v33  ;;  %5795 = vmatpush3.bf16.msra.mxu1 %v6383_v32  ;;  %v2993_v33 = vpack.c.bf16 %v1593_v9, %v1593_v9  ;;  %v6422_v32 = vld [vmem:[%s8247_s3 + $0x3b8] sm:$0xff]   ;;  %v6447_v9 = vld [vmem:[%s8247_s3 + $0x450] sm:$0xff]  }
 0x1d4   :  { %5774 = vmatprep.subr.bf16.mxu0 %v6527_v63  ;;  %5796 = vmatprep.subr.bf16.mxu1 %v6527_v63 }
 0x1d7   :  { %5775 = vmatpush3.bf16.msra.mxu0 %v6384_v54  ;;  %5797 = vmatpush3.bf16.msra.mxu1 %v6385_v17  ;;  %v6423_v54 = vld [vmem:[%s8247_s3 + $0x3f0] sm:$0xff]   ;;  %v2886_v17 = vpack.c.bf16 %v1592_v5, %v1592_v5  ;;  %v6450_v5 = vld [vmem:[%s8247_s3 + $0x408] sm:$0xff]  }
 0x1d8   :  { %5776 = vmatprep.subr.bf16.mxu0 %v6527_v63  ;;  %5798 = vmatprep.subr.bf16.mxu1 %v6527_v63 }
 0x1db   :  { %5777 = vmatpush3.bf16.msra.mxu0 %v6386_v31  ;;  %5799 = vmatpush3.bf16.msra.mxu1 %v6387_v19 }
 0x1dc   :  { %5778 = vmatprep.subr.bf16.mxu0 %v6527_v63  ;;  %5824 = vmatprep.subr.bf16.mxu1 %v6527_v63 }
 0x1de   :  { %5801 = vmatmul.mubr.bf16.vlgmr.msra.gmra.mxu1 %v2565_v26 }
 0x1df   :  { %5779 = vmatpush3.bf16.msra.mxu0 %v6388_v24  ;;  %5825 = vmatpush3.bf16.msra.mxu1 %v6389_v25  ;;  %v6424_v24 = vld [vmem:[%s8247_s3 + $0x3b0] sm:$0xff]   ;;  %v6425_v25 = vld [vmem:[%s8247_s3 + $0x3e8] sm:$0xff]  }
 0x1e0   :  { %5804 = vmatprep.subr.bf16.mxu0 %v6527_v63  ;;  %5826 = vmatprep.subr.bf16.mxu1 %v6527_v63 }
 0x1e1   :  { %5840 = vmatprep.mubr.msk.bf16.mxu1 %vm6528_vm1, %v6527_v63 }
 0x1e2   :  { %5781 = vmatmul.mubr.bf16.vlgmr.msra.gmra.mxu0 %v2458_v27  ;;  %v6427_v27 = vld [vmem:[%s8247_s3 + $0x3e0] sm:$0xff]  }
 0x1e3   :  { %5805 = vmatpush3.bf16.msra.mxu0 %v6390_v39  ;;  %5827 = vmatpush3.bf16.msra.mxu1 %v6391_v16  ;;  %v6426_v16 = vld [vmem:[%s8247_s3 + $0x3a8] sm:$0xff]  }
 0x1e4   :  { %5806 = vmatprep.subr.bf16.mxu0 %v6527_v63  ;;  %5828 = vmatprep.subr.bf16.mxu1 %v6527_v63 }
 0x1e5   :  { %5820 = vmatprep.mubr.msk.bf16.mxu0 %vm6528_vm1, %v6527_v63 }
 0x1e7   :  { %5807 = vmatpush3.bf16.msra.mxu0 %v6392_v15  ;;  %5829 = vmatpush3.bf16.msra.mxu1 %v6393_v6  ;;  %v6428_v6 = vld [vmem:[%s8247_s3 + $0x3a0] sm:$0xff]  }
 0x1e8   :  { %5808 = vmatprep.subr.bf16.mxu0 %v6527_v63  ;;  %5830 = vmatprep.subr.bf16.mxu1 %v6527_v63 }
 0x1eb   :  { %5809 = vmatpush3.bf16.msra.mxu0 %v6394_v36  ;;  %5831 = vmatpush3.bf16.msra.mxu1 %v6395_v44  ;;  %v6429_v36 = vld [vmem:[%s8247_s3 + $0x3d8] sm:$0xff]  }
 0x1ec   :  { %5810 = vmatprep.subr.bf16.mxu0 %v6527_v63  ;;  %5832 = vmatprep.subr.bf16.mxu1 %v6527_v63  ;;  %v6430_v44 = vld [vmem:[%s8247_s3 + $0x398] sm:$0xff]  }
 0x1ef   :  { %5811 = vmatpush3.bf16.msra.mxu0 %v6396_v4  ;;  %5833 = vmatpush3.bf16.msra.mxu1 %v6397_v42  ;;  %v6431_v4 = vld [vmem:[%s8247_s3 + $0x3d0] sm:$0xff]  }
 0x1f0   :  { %5812 = vmatprep.subr.bf16.mxu0 %v6527_v63  ;;  %5834 = vmatprep.subr.bf16.mxu1 %v6527_v63  ;;  %v6432_v42 = vld [vmem:[%s8247_s3 + $0x390] sm:$0xff]  }
 0x1f3   :  { %5813 = vmatpush3.bf16.msra.mxu0 %v6398_v56  ;;  %5835 = vmatpush3.bf16.msra.mxu1 %v6399_v45  ;;  %v6433_v56 = vld [vmem:[%s8247_s3 + $0x3c8] sm:$0xff]  }
 0x1f4   :  { %5814 = vmatprep.subr.bf16.mxu0 %v6527_v63  ;;  %5836 = vmatprep.subr.bf16.mxu1 %v6527_v63  ;;  %v6434_v45 = vld [vmem:[%s8247_s3 + $0x388] sm:$0xff]  }
 0x1f7   :  { %5815 = vmatpush3.bf16.msra.mxu0 %v6400_v3  ;;  %5837 = vmatpush3.bf16.msra.mxu1 %v6401_v46  ;;  %v6435_v3 = vld [vmem:[%s8247_s3 + $0x3c0] sm:$0xff]   ;;  %v1595_v46 = vmul.f32 0.25, %v7438_v37 }
 0x1f8   :  { %5816 = vmatprep.subr.bf16.mxu0 %v6527_v63  ;;  %5838 = vmatprep.subr.bf16.mxu1 %v6527_v63 }
 0x1fb   :  { %5817 = vmatpush3.bf16.msra.mxu0 %v6402_v28  ;;  %5839 = vmatpush3.bf16.msra.mxu1 %v6403_v40  ;;  %v6436_v28 = vld [vmem:[%s8247_s3 + $0x380] sm:$0xff]   ;;  %v6437_v40 = vld [vmem:[%s8247_s3 + $0x478] sm:$0xff]  }
 0x1fc   :  { %5818 = vmatprep.subr.bf16.mxu0 %v6527_v63  ;;  %5864 = vmatprep.subr.bf16.mxu1 %v6527_v63 }
 0x1fe   :  { %5841 = vmatmul.mubr.bf16.vlgmr.msra.gmra.mxu1 %v2779_v53  ;;  %v3100_v53 = vpack.c.bf16 %v1594_v18, %v1594_v18  ;;  %v6467_v18 = vld [vmem:[%s8247_s3 + $0x4c0] sm:$0xff]  }
 0x1ff   :  { %5819 = vmatpush3.bf16.msra.mxu0 %v6404_v49  ;;  %5865 = vmatpush3.bf16.msra.mxu1 %v6405_v47  ;;  %v3207_v49 = vpack.c.bf16 %v1595_v46, %v1595_v46  ;;  %v6438_v47 = vld [vmem:[%s8247_s3 + $0x438] sm:$0xff]   ;;  %v6464_v46 = vld [vmem:[%s8247_s3 + $0x490] sm:$0xff]  }
 0x200   :  { %5844 = vmatprep.subr.bf16.mxu0 %v6527_v63  ;;  %5866 = vmatprep.subr.bf16.mxu1 %v6527_v63 }
 0x201   :  { %5880 = vmatprep.mubr.msk.bf16.mxu1 %vm6528_vm1, %v6527_v63 }
 0x202   :  { %5821 = vmatmul.mubr.bf16.vlgmr.msra.gmra.mxu0 %v2672_v55 }
 0x203   :  { %5845 = vmatpush3.bf16.msra.mxu0 %v6406_v14  ;;  %5867 = vmatpush3.bf16.msra.mxu1 %v6407_v21 }
 0x204   :  { %5846 = vmatprep.subr.bf16.mxu0 %v6527_v63  ;;  %5868 = vmatprep.subr.bf16.mxu1 %v6527_v63 }
 0x205   :  { %5860 = vmatprep.mubr.msk.bf16.mxu0 %vm6528_vm1, %v6527_v63 }
 0x207   :  { %5847 = vmatpush3.bf16.msra.mxu0 %v6408_v59  ;;  %5869 = vmatpush3.bf16.msra.mxu1 %v6409_v22  ;;  %v6440_v59 = vld [vmem:[%s8247_s3 + $0x430] sm:$0xff]   ;;  %v6441_v22 = vld [vmem:[%s8247_s3 + $0x468] sm:$0xff]  }
 0x208   :  { %5848 = vmatprep.subr.bf16.mxu0 %v6527_v63  ;;  %5870 = vmatprep.subr.bf16.mxu1 %v6527_v63 }
 0x20b   :  { %5849 = vmatpush3.bf16.msra.mxu0 %v6410_v30  ;;  %5871 = vmatpush3.bf16.msra.mxu1 %v6411_v34 }
 0x20c   :  { %5850 = vmatprep.subr.bf16.mxu0 %v6527_v63  ;;  %5872 = vmatprep.subr.bf16.mxu1 %v6527_v63 }
 0x20f   :  { %5851 = vmatpush3.bf16.msra.mxu0 %v6412_v38  ;;  %5873 = vmatpush3.bf16.msra.mxu1 %v6413_v41 }
 0x210   :  { %5852 = vmatprep.subr.bf16.mxu0 %v6527_v63  ;;  %5874 = vmatprep.subr.bf16.mxu1 %v6527_v63 }
 0x213   :  { %5853 = vmatpush3.bf16.msra.mxu0 %v6414_v61  ;;  %5875 = vmatpush3.bf16.msra.mxu1 %v6415_v58  ;;  %v6442_v61 = vld [vmem:[%s8247_s3 + $0x428] sm:$0xff]   ;;  %v6443_v58 = vld [vmem:[%s8247_s3 + $0x460] sm:$0xff]  }
 0x214   :  { %5854 = vmatprep.subr.bf16.mxu0 %v6527_v63  ;;  %5876 = vmatprep.subr.bf16.mxu1 %v6527_v63 }
 0x217   :  { %5855 = vmatpush3.bf16.msra.mxu0 %v6416_v0  ;;  %5877 = vmatpush3.bf16.msra.mxu1 %v6417_v7  ;;  %v6444_v7 = vld [vmem:[%s8247_s3 + $0x420] sm:$0xff]  }
 0x218   :  { %5856 = vmatprep.subr.bf16.mxu0 %v6527_v63  ;;  %5878 = vmatprep.subr.bf16.mxu1 %v6527_v63 }
 0x21b   :  { %5857 = vmatpush3.bf16.msra.mxu0 %v6418_v35  ;;  %5879 = vmatpush3.bf16.msra.mxu1 %v6419_v8  ;;  %v6445_v35 = vld [vmem:[%s8247_s3 + $0x458] sm:$0xff]  }
 0x21c   :  { %5858 = vmatprep.subr.bf16.mxu0 %v6527_v63  ;;  %5904 = vmatprep.subr.bf16.mxu1 %v6527_v63  ;;  %v6446_v8 = vld [vmem:[%s8247_s3 + $0x418] sm:$0xff]  }
 0x21e   :  { %5881 = vmatmul.mubr.bf16.vlgmr.msra.gmra.mxu1 %v2993_v33  ;;  %v1810_v52 = vpop.f32.mrf.mxu1  ;;  %v6451_v33 = vld [vmem:[%s8247_s3 + $0x440] sm:$0xff]  }
 0x21f   :  { %5859 = vmatpush3.bf16.msra.mxu0 %v6420_v11  ;;  %5905 = vmatpush3.bf16.msra.mxu1 %v6421_v13  ;;  %v6448_v11 = vld [vmem:[%s8247_s3 + $0x410] sm:$0xff]   ;;  %v6449_v13 = vld [vmem:[%s8247_s3 + $0x448] sm:$0xff]  }
 0x220   :  { %v5642_v31 = vpop.f32.mrf.mxu1  ;;  %5884 = vmatprep.subr.bf16.mxu0 %v6527_v63  ;;  %5906 = vmatprep.subr.bf16.mxu1 %v6527_v63 }
 0x221   :  { %5920 = vmatprep.mubr.msk.bf16.mxu1 %vm6528_vm1, %v6527_v63 }
 0x222   :  { %5861 = vmatmul.mubr.bf16.vlgmr.msra.gmra.mxu0 %v2886_v17  ;;  %v1722_v10 = vpop.f32.mrf.mxu0  ;;  %v1813_v19 = vpop.f32.mrf.mxu1  ;;  %v1596_v17 = vmul.f32 0.25, %v7451_v57 }
 0x223   :  { %v7791_v23 = vadd.f32 %v1810_v52, %v1722_v10  ;;  %5885 = vmatpush3.bf16.msra.mxu0 %v6422_v32  ;;  %5907 = vmatpush3.bf16.msra.mxu1 %v6423_v54  ;;  %v1597_v52 = vmul.f32 0.25, %v7464_v1  ;;  %v6452_v32 = vld [vmem:[%s8247_s3 + $0x400] sm:$0xff]   ;;  %v6453_v54 = vld [vmem:[%s8247_s3 + $0x4f8] sm:$0xff]   ;;  %v6455_v19 = vld [vmem:[%s8247_s3 + $0x4f0] sm:$0xff]  }
 0x224   :  { %v5622_v29 = vpop.f32.mrf.mxu0  ;;  %v5643_v26 = vpop.f32.mrf.mxu1  ;;  %5886 = vmatprep.subr.bf16.mxu0 %v6527_v63  ;;  %5908 = vmatprep.subr.bf16.mxu1 %v6527_v63  ;;  %v6454_v10 = vld [vmem:[%s8247_s3 + $0x4b8] sm:$0xff]  }
 0x225   :  { %5900 = vmatprep.mubr.msk.bf16.mxu0 %vm6528_vm1, %v6527_v63  ;;  %v3421_v31 = vpack.c.bf16 %v1597_v52, %v1597_v52  ;;  %v6456_v26 = vld [vmem:[%s8247_s3 + $0x4b0] sm:$0xff]   ;;  %v6482_v52 = vld [vmem:[%s8247_s3 + $0x508] sm:$0xff]  }
 0x226   :  { %v1725_v39 = vpop.f32.mrf.mxu0 }
 0x227   :  { %5887 = vmatpush3.bf16.msra.mxu0 %v6424_v24  ;;  %5909 = vmatpush3.bf16.msra.mxu1 %v6425_v25  ;;  %v6457_v39 = vld [vmem:[%s8247_s3 + $0x4e8] sm:$0xff]  }
 0x228   :  { %v5623_v15 = vpop.f32.mrf.mxu0  ;;  %5888 = vmatprep.subr.bf16.mxu0 %v6527_v63  ;;  %5910 = vmatprep.subr.bf16.mxu1 %v6527_v63 }
 0x22b   :  { %5889 = vmatpush3.bf16.msra.mxu0 %v6426_v16  ;;  %5911 = vmatpush3.bf16.msra.mxu1 %v6427_v27 }
 0x22c   :  { %5890 = vmatprep.subr.bf16.mxu0 %v6527_v63  ;;  %5912 = vmatprep.subr.bf16.mxu1 %v6527_v63 }
 0x22f   :  { %5891 = vmatpush3.bf16.msra.mxu0 %v6428_v6  ;;  %5913 = vmatpush3.bf16.msra.mxu1 %v6429_v36  ;;  %v6458_v36 = vld [vmem:[%s8247_s3 + $0x4a8] sm:$0xff]  }
 0x230   :  { %5892 = vmatprep.subr.bf16.mxu0 %v6527_v63  ;;  %5914 = vmatprep.subr.bf16.mxu1 %v6527_v63 }
 0x233   :  { %5893 = vmatpush3.bf16.msra.mxu0 %v6430_v44  ;;  %5915 = vmatpush3.bf16.msra.mxu1 %v6431_v4  ;;  %v6459_v44 = vld [vmem:[%s8247_s3 + $0x4e0] sm:$0xff]  }
 0x234   :  { %5894 = vmatprep.subr.bf16.mxu0 %v6527_v63  ;;  %5916 = vmatprep.subr.bf16.mxu1 %v6527_v63 }
 0x237   :  { %5895 = vmatpush3.bf16.msra.mxu0 %v6432_v42  ;;  %5917 = vmatpush3.bf16.msra.mxu1 %v6433_v56  ;;  %v6460_v42 = vld [vmem:[%s8247_s3 + $0x4a0] sm:$0xff]   ;;  %v6461_v56 = vld [vmem:[%s8247_s3 + $0x4d8] sm:$0xff]  }
 0x238   :  { %5896 = vmatprep.subr.bf16.mxu0 %v6527_v63  ;;  %5918 = vmatprep.subr.bf16.mxu1 %v6527_v63 }
 0x23b   :  { %5897 = vmatpush3.bf16.msra.mxu0 %v6434_v45  ;;  %5919 = vmatpush3.bf16.msra.mxu1 %v6435_v3  ;;  %v6462_v45 = vld [vmem:[%s8247_s3 + $0x498] sm:$0xff]   ;;  %v6463_v3 = vld [vmem:[%s8247_s3 + $0x4d0] sm:$0xff]  }
 0x23c   :  { %5898 = vmatprep.subr.bf16.mxu0 %v6527_v63  ;;  %5944 = vmatprep.subr.bf16.mxu1 %v6527_v63 }
 0x23e   :  { %v2023_v37 = vpop.f32.mrf.mxu1  ;;  %5921 = vmatmul.mubr.bf16.vlgmr.msra.gmra.mxu1 %v3207_v49  ;;  %v1599_v49 = vmul.f32 0.25, %v7492_v48 }
 0x23f   :  { %5899 = vmatpush3.bf16.msra.mxu0 %v6436_v28  ;;  %5945 = vmatpush3.bf16.msra.mxu1 %v6437_v40  ;;  %v6465_v28 = vld [vmem:[%s8247_s3 + $0x4c8] sm:$0xff]  }
 0x240   :  { %v5682_v14 = vpop.f32.mrf.mxu1  ;;  %5924 = vmatprep.subr.bf16.mxu0 %v6527_v63  ;;  %5946 = vmatprep.subr.bf16.mxu1 %v6527_v63  ;;  %v6466_v40 = vld [vmem:[%s8247_s3 + $0x488] sm:$0xff]  }
 0x241   :  { %5960 = vmatprep.mubr.msk.bf16.mxu1 %vm6528_vm1, %v6527_v63  ;;  %v6470_v14 = vld [vmem:[%s8247_s3 + $0x538] sm:$0xff]  }
 0x242   :  { %v1916_v62 = vpop.f32.mrf.mxu0  ;;  %v2026_v21 = vpop.f32.mrf.mxu1  ;;  %5901 = vmatmul.mubr.bf16.vlgmr.msra.gmra.mxu0 %v3100_v53  ;;  %v3635_v53 = vpack.c.bf16 %v1599_v49, %v1599_v49  ;;  %v1603_v49 = vmul.f32 0.25, %v7546_v50  ;;  %v6501_v50 = vld [vmem:[%s8247_s3 + $0x638] sm:$0xff]  }
 0x243   :  { %v1922_v55 = vadd.f32 %v1916_v62, %v7791_v23  ;;  %5925 = vmatpush3.bf16.msra.mxu0 %v6438_v47  ;;  %5947 = vmatpush3.bf16.msra.mxu1 %v6439_v51  ;;  %v3314_v23 = vpack.c.bf16 %v1596_v17, %v1596_v17  ;;  %v6469_v47 = vld [vmem:[%s8247_s3 + $0x578] sm:$0xff]   ;;  %v1598_v51 = vmul.f32 0.25, %v7477_v2  ;;  %v6471_v62 = vld [vmem:[%s8247_s3 + $0x570] sm:$0xff]   ;;  %v6484_v17 = vld [vmem:[%s8247_s3 + $0x500] sm:$0xff]  }
 0x244   :  { %v5662_v30 = vpop.f32.mrf.mxu0  ;;  %v5683_v34 = vpop.f32.mrf.mxu1  ;;  %5926 = vmatprep.subr.bf16.mxu0 %v6527_v63  ;;  %5948 = vmatprep.subr.bf16.mxu1 %v6527_v63 }
 0x245   :  { %5940 = vmatprep.mubr.msk.bf16.mxu0 %vm6528_vm1, %v6527_v63  ;;  %v2029_v38 = vadd.f32 %v2023_v37, %v1922_v55  ;;  %v6468_v37 = vld [vmem:[%s8247_s3 + $0x480] sm:$0xff]   ;;  %v3528_v21 = vpack.c.bf16 %v1598_v51, %v1598_v51  ;;  %v6472_v30 = vld [vmem:[%s8247_s3 + $0x530] sm:$0xff]   ;;  %v6473_v34 = vld [vmem:[%s8247_s3 + $0x568] sm:$0xff]   ;;  %v4063_v51 = vpack.c.bf16 %v1603_v49, %v1603_v49 }
 0x246   :  { %v1919_v41 = vpop.f32.mrf.mxu0  ;;  %v6517_v49 = vld [vmem:[%s8250_s7 + $0x38] sm:$0xff]  }
 0x247   :  { %5927 = vmatpush3.bf16.msra.mxu0 %v6440_v59  ;;  %5949 = vmatpush3.bf16.msra.mxu1 %v6441_v22 }
 0x248   :  { %v5663_v0 = vpop.f32.mrf.mxu0  ;;  %5928 = vmatprep.subr.bf16.mxu0 %v6527_v63  ;;  %5950 = vmatprep.subr.bf16.mxu1 %v6527_v63 }
 0x249   :  { %v6474_v0 = vld [vmem:[%s8247_s3 + $0x528] sm:$0xff]  }
 0x24b   :  { %5929 = vmatpush3.bf16.msra.mxu0 %v6442_v61  ;;  %5951 = vmatpush3.bf16.msra.mxu1 %v6443_v58 }
 0x24c   :  { %5930 = vmatprep.subr.bf16.mxu0 %v6527_v63  ;;  %5952 = vmatprep.subr.bf16.mxu1 %v6527_v63 }
 0x24f   :  { %5931 = vmatpush3.bf16.msra.mxu0 %v6444_v7  ;;  %5953 = vmatpush3.bf16.msra.mxu1 %v6445_v35  ;;  %v6475_v7 = vld [vmem:[%s8247_s3 + $0x560] sm:$0xff]  }
 0x250   :  { %5932 = vmatprep.subr.bf16.mxu0 %v6527_v63  ;;  %5954 = vmatprep.subr.bf16.mxu1 %v6527_v63 }
 0x253   :  { %5933 = vmatpush3.bf16.msra.mxu0 %v6446_v8  ;;  %5955 = vmatpush3.bf16.msra.mxu1 %v6447_v9  ;;  %v6476_v8 = vld [vmem:[%s8247_s3 + $0x520] sm:$0xff]   ;;  %v6477_v9 = vld [vmem:[%s8247_s3 + $0x558] sm:$0xff]  }
 0x254   :  { %5934 = vmatprep.subr.bf16.mxu0 %v6527_v63  ;;  %5956 = vmatprep.subr.bf16.mxu1 %v6527_v63 }
 0x257   :  { %5935 = vmatpush3.bf16.msra.mxu0 %v6448_v11  ;;  %5957 = vmatpush3.bf16.msra.mxu1 %v6449_v13  ;;  %v6478_v11 = vld [vmem:[%s8247_s3 + $0x518] sm:$0xff]   ;;  %v6479_v13 = vld [vmem:[%s8247_s3 + $0x550] sm:$0xff]  }
 0x258   :  { %5936 = vmatprep.subr.bf16.mxu0 %v6527_v63  ;;  %5958 = vmatprep.subr.bf16.mxu1 %v6527_v63 }
 0x25b   :  { %5937 = vmatpush3.bf16.msra.mxu0 %v6450_v5  ;;  %5959 = vmatpush3.bf16.msra.mxu1 %v6451_v33  ;;  %v6480_v5 = vld [vmem:[%s8247_s3 + $0x510] sm:$0xff]   ;;  %v6481_v33 = vld [vmem:[%s8247_s3 + $0x548] sm:$0xff]  }
 0x25c   :  { %5938 = vmatprep.subr.bf16.mxu0 %v6527_v63  ;;  %5984 = vmatprep.subr.bf16.mxu1 %v6527_v63 }
 0x25e   :  { %v2237_v1 = vpop.f32.mrf.mxu1  ;;  %5961 = vmatmul.mubr.bf16.vlgmr.msra.gmra.mxu1 %v3421_v31  ;;  %v6485_v31 = vld [vmem:[%s8247_s3 + $0x5f8] sm:$0xff]  }
 0x25f   :  { %5939 = vmatpush3.bf16.msra.mxu0 %v6452_v32  ;;  %5985 = vmatpush3.bf16.msra.mxu1 %v6453_v54  ;;  %v6483_v32 = vld [vmem:[%s8247_s3 + $0x540] sm:$0xff]   ;;  %v1601_v54 = vmul.f32 0.25, %v7520_v20 }
 0x260   :  { %v5722_v24 = vpop.f32.mrf.mxu1  ;;  %5964 = vmatprep.subr.bf16.mxu0 %v6527_v63  ;;  %5986 = vmatprep.subr.bf16.mxu1 %v6527_v63 }
 0x261   :  { %6000 = vmatprep.mubr.msk.bf16.mxu1 %vm6528_vm1, %v6527_v63 }
 0x262   :  { %v2130_v57 = vpop.f32.mrf.mxu0  ;;  %v2240_v25 = vpop.f32.mrf.mxu1  ;;  %5941 = vmatmul.mubr.bf16.vlgmr.msra.gmra.mxu0 %v3314_v23  ;;  %v6487_v23 = vld [vmem:[%s8247_s3 + $0x5f0] sm:$0xff]  }
 0x263   :  { %v2136_v29 = vadd.f32 %v2130_v57, %v2029_v38  ;;  %5965 = vmatpush3.bf16.msra.mxu0 %v6454_v10  ;;  %5987 = vmatpush3.bf16.msra.mxu1 %v6455_v19  ;;  %v3849_v10 = vpack.c.bf16 %v1601_v54, %v1601_v54  ;;  %v6486_v19 = vld [vmem:[%s8247_s3 + $0x5b8] sm:$0xff]  }
 0x264   :  { %v5702_v16 = vpop.f32.mrf.mxu0  ;;  %v5723_v27 = vpop.f32.mrf.mxu1  ;;  %5966 = vmatprep.subr.bf16.mxu0 %v6527_v63  ;;  %5988 = vmatprep.subr.bf16.mxu1 %v6527_v63 }
 0x265   :  { %5980 = vmatprep.mubr.msk.bf16.mxu0 %vm6528_vm1, %v6527_v63  ;;  %v2243_v15 = vadd.f32 %v2237_v1, %v2136_v29  ;;  %v1600_v1 = vmul.f32 0.25, %v7507_v60 }
 0x266   :  { %v2133_v6 = vpop.f32.mrf.mxu0 }
 0x267   :  { %5967 = vmatpush3.bf16.msra.mxu0 %v6456_v26  ;;  %5989 = vmatpush3.bf16.msra.mxu1 %v6457_v39  ;;  %v3742_v24 = vpack.c.bf16 %v1600_v1, %v1600_v1  ;;  %v6488_v26 = vld [vmem:[%s8247_s3 + $0x5b0] sm:$0xff]   ;;  %v6489_v39 = vld [vmem:[%s8247_s3 + $0x5e8] sm:$0xff]  }
 0x268   :  { %v5703_v4 = vpop.f32.mrf.mxu0  ;;  %5968 = vmatprep.subr.bf16.mxu0 %v6527_v63  ;;  %5990 = vmatprep.subr.bf16.mxu1 %v6527_v63 }
 0x26b   :  { %5969 = vmatpush3.bf16.msra.mxu0 %v6458_v36  ;;  %5991 = vmatpush3.bf16.msra.mxu1 %v6459_v44  ;;  %v6490_v36 = vld [vmem:[%s8247_s3 + $0x5a8] sm:$0xff]   ;;  %v6491_v44 = vld [vmem:[%s8247_s3 + $0x5e0] sm:$0xff]  }
 0x26c   :  { %5970 = vmatprep.subr.bf16.mxu0 %v6527_v63  ;;  %5992 = vmatprep.subr.bf16.mxu1 %v6527_v63 }
 0x26f   :  { %5971 = vmatpush3.bf16.msra.mxu0 %v6460_v42  ;;  %5993 = vmatpush3.bf16.msra.mxu1 %v6461_v56  ;;  %v6492_v42 = vld [vmem:[%s8247_s3 + $0x5a0] sm:$0xff]   ;;  %v6493_v56 = vld [vmem:[%s8247_s3 + $0x5d8] sm:$0xff]  }
 0x270   :  { %5972 = vmatprep.subr.bf16.mxu0 %v6527_v63  ;;  %5994 = vmatprep.subr.bf16.mxu1 %v6527_v63 }
 0x273   :  { %5973 = vmatpush3.bf16.msra.mxu0 %v6462_v45  ;;  %5995 = vmatpush3.bf16.msra.mxu1 %v6463_v3  ;;  %v6494_v45 = vld [vmem:[%s8247_s3 + $0x598] sm:$0xff]   ;;  %v6495_v3 = vld [vmem:[%s8247_s3 + $0x5d0] sm:$0xff]  }
 0x274   :  { %5974 = vmatprep.subr.bf16.mxu0 %v6527_v63  ;;  %5996 = vmatprep.subr.bf16.mxu1 %v6527_v63 }
 0x277   :  { %5975 = vmatpush3.bf16.msra.mxu0 %v6464_v46  ;;  %5997 = vmatpush3.bf16.msra.mxu1 %v6465_v28  ;;  %v6496_v46 = vld [vmem:[%s8247_s3 + $0x590] sm:$0xff]   ;;  %v6497_v28 = vld [vmem:[%s8247_s3 + $0x5c8] sm:$0xff]  }
 0x278   :  { %5976 = vmatprep.subr.bf16.mxu0 %v6527_v63  ;;  %5998 = vmatprep.subr.bf16.mxu1 %v6527_v63 }
 0x27b   :  { %5977 = vmatpush3.bf16.msra.mxu0 %v6466_v40  ;;  %5999 = vmatpush3.bf16.msra.mxu1 %v6467_v18  ;;  %v6498_v40 = vld [vmem:[%s8247_s3 + $0x588] sm:$0xff]   ;;  %v6499_v18 = vld [vmem:[%s8247_s3 + $0x5c0] sm:$0xff]  }
 0x27c   :  { %5978 = vmatprep.subr.bf16.mxu0 %v6527_v63  ;;  %6024 = vmatprep.subr.bf16.mxu1 %v6527_v63 }
 0x27e   :  { %v2451_v48 = vpop.f32.mrf.mxu1  ;;  %6001 = vmatmul.mubr.bf16.vlgmr.msra.gmra.mxu1 %v3635_v53 }
 0x27f   :  { %5979 = vmatpush3.bf16.msra.mxu0 %v6468_v37  ;;  %6025 = vmatpush3.bf16.msra.mxu1 %v6469_v47  ;;  %v6500_v37 = vld [vmem:[%s8247_s3 + $0x580] sm:$0xff]   ;;  %v1602_v47 = vmul.f32 0.25, %v7533_v12 }
 0x280   :  { %v5762_v55 = vpop.f32.mrf.mxu1  ;;  %6004 = vmatprep.subr.bf16.mxu0 %v6527_v63  ;;  %6026 = vmatprep.subr.bf16.mxu1 %v6527_v63 }
 0x281   :  { %6040 = vmatprep.mubr.msk.bf16.mxu1 %vm6528_vm1, %v6527_v63  ;;  %v6502_v55 = vld [vmem:[%s8247_s3 + $0x630] sm:$0xff]  }
 0x282   :  { %v2344_v2 = vpop.f32.mrf.mxu0  ;;  %v2454_v59 = vpop.f32.mrf.mxu1  ;;  %5981 = vmatmul.mubr.bf16.vlgmr.msra.gmra.mxu0 %v3528_v21 }
 0x283   :  { %v2350_v22 = vadd.f32 %v2344_v2, %v2243_v15  ;;  %6005 = vmatpush3.bf16.msra.mxu0 %v6470_v14  ;;  %6027 = vmatpush3.bf16.msra.mxu1 %v6471_v62 }
 0x284   :  { %v5742_v38 = vpop.f32.mrf.mxu0  ;;  %v5763_v41 = vpop.f32.mrf.mxu1  ;;  %6006 = vmatprep.subr.bf16.mxu0 %v6527_v63  ;;  %6028 = vmatprep.subr.bf16.mxu1 %v6527_v63 }
 0x285   :  { %6020 = vmatprep.mubr.msk.bf16.mxu0 %vm6528_vm1, %v6527_v63  ;;  %v2457_v61 = vadd.f32 %v2451_v48, %v2350_v22  ;;  %v3956_v48 = vpack.c.bf16 %v1602_v47, %v1602_v47  ;;  %v6504_v41 = vld [vmem:[%s8247_s3 + $0x620] sm:$0xff]   ;;  %v6519_v47 = vld [vmem:[%s8250_s7 + $0x28] sm:$0xff]  }
 0x286   :  { %v2347_v58 = vpop.f32.mrf.mxu0 }
 0x287   :  { %6007 = vmatpush3.bf16.msra.mxu0 %v6472_v30  ;;  %6029 = vmatpush3.bf16.msra.mxu1 %v6473_v34  ;;  %v6503_v34 = vld [vmem:[%s8247_s3 + $0x628] sm:$0xff]   ;;  %v6506_v58 = vld [vmem:[%s8247_s3 + $0x610] sm:$0xff]  }
 0x288   :  { %v5743_v35 = vpop.f32.mrf.mxu0  ;;  %6008 = vmatprep.subr.bf16.mxu0 %v6527_v63  ;;  %6030 = vmatprep.subr.bf16.mxu1 %v6527_v63 }
 0x289   :  { %v1604_v35 = vmul.f32 0.25, %v7558_v43 }
 0x28b   :  { %6009 = vmatpush3.bf16.msra.mxu0 %v6474_v0  ;;  %6031 = vmatpush3.bf16.msra.mxu1 %v6475_v7  ;;  %v6507_v0 = vld [vmem:[%s8247_s3 + $0x608] sm:$0xff]   ;;  %v6508_v7 = vld [vmem:[%s8247_s3 + $0x600] sm:$0xff]  }
 0x28c   :  { %6010 = vmatprep.subr.bf16.mxu0 %v6527_v63  ;;  %6032 = vmatprep.subr.bf16.mxu1 %v6527_v63 }
 0x28f   :  { %6011 = vmatpush3.bf16.msra.mxu0 %v6476_v8  ;;  %6033 = vmatpush3.bf16.msra.mxu1 %v6477_v9  ;;  %v4170_v9 = vpack.c.bf16 %v1604_v35, %v1604_v35 }
 0x290   :  { %6012 = vmatprep.subr.bf16.mxu0 %v6527_v63  ;;  %6034 = vmatprep.subr.bf16.mxu1 %v6527_v63 }
 0x293   :  { %6013 = vmatpush3.bf16.msra.mxu0 %v6478_v11  ;;  %6035 = vmatpush3.bf16.msra.mxu1 %v6479_v13 }
 0x294   :  { %6014 = vmatprep.subr.bf16.mxu0 %v6527_v63  ;;  %6036 = vmatprep.subr.bf16.mxu1 %v6527_v63 }
 0x297   :  { %6015 = vmatpush3.bf16.msra.mxu0 %v6480_v5  ;;  %6037 = vmatpush3.bf16.msra.mxu1 %v6481_v33 }
 0x298   :  { %6016 = vmatprep.subr.bf16.mxu0 %v6527_v63  ;;  %6038 = vmatprep.subr.bf16.mxu1 %v6527_v63 }
 0x29b   :  { %6017 = vmatpush3.bf16.msra.mxu0 %v6482_v52  ;;  %6039 = vmatpush3.bf16.msra.mxu1 %v6483_v32 }
 0x29c   :  { %6018 = vmatprep.subr.bf16.mxu0 %v6527_v63  ;;  %6064 = vmatprep.subr.bf16.mxu1 %v6527_v63 }
 0x29e   :  { %v2665_v20 = vpop.f32.mrf.mxu1  ;;  %6041 = vmatmul.mubr.bf16.vlgmr.msra.gmra.mxu1 %v3849_v10 }
 0x29f   :  { %6019 = vmatpush3.bf16.msra.mxu0 %v6484_v17  ;;  %6065 = vmatpush3.bf16.msra.mxu1 %v6485_v31 }
 0x2a0   :  { %v5802_v57 = vpop.f32.mrf.mxu1  ;;  %6044 = vmatprep.subr.bf16.mxu0 %v6527_v63  ;;  %6066 = vmatprep.subr.bf16.mxu1 %v6527_v63 }
 0x2a1   :  { %6080 = vmatprep.mubr.msk.bf16.mxu1 %vm6528_vm1, %v6527_v63 }
 0x2a2   :  { %v2558_v60 = vpop.f32.mrf.mxu0  ;;  %v2668_v25 = vpop.f32.mrf.mxu1  ;;  %6021 = vmatmul.mubr.bf16.vlgmr.msra.gmra.mxu0 %v3742_v24 }
 0x2a3   :  { %v2564_v29 = vadd.f32 %v2558_v60, %v2457_v61  ;;  %6045 = vmatpush3.bf16.msra.mxu0 %v6486_v19  ;;  %6067 = vmatpush3.bf16.msra.mxu1 %v6487_v23  ;;  %v6505_v61 = vld [vmem:[%s8247_s3 + $0x618] sm:$0xff]  }
 0x2a4   :  { %v5782_v16 = vpop.f32.mrf.mxu0  ;;  %v5803_v27 = vpop.f32.mrf.mxu1  ;;  %6046 = vmatprep.subr.bf16.mxu0 %v6527_v63  ;;  %6068 = vmatprep.subr.bf16.mxu1 %v6527_v63 }
 0x2a5   :  { %6060 = vmatprep.mubr.msk.bf16.mxu0 %vm6528_vm1, %v6527_v63  ;;  %v2671_v15 = vadd.f32 %v2665_v20, %v2564_v29  ;;  %v6509_v29 = vld [vmem:[%s8249_s5 + $0x38] sm:$0xff]   ;;  %v6512_v16 = vld [vmem:[%s8249_s5 + $0x20] sm:$0xff]  }
 0x2a6   :  { %v2561_v6 = vpop.f32.mrf.mxu0  ;;  %v6513_v27 = vld [vmem:[%s8249_s5 + $0x18] sm:$0xff]  }
 0x2a7   :  { %6047 = vmatpush3.bf16.msra.mxu0 %v6488_v26  ;;  %6069 = vmatpush3.bf16.msra.mxu1 %v6489_v39  ;;  %v6510_v26 = vld [vmem:[%s8249_s5 + $0x30] sm:$0xff]   ;;  %v6511_v39 = vld [vmem:[%s8249_s5 + $0x28] sm:$0xff]  }
 0x2a8   :  { %v5783_v4 = vpop.f32.mrf.mxu0  ;;  %6048 = vmatprep.subr.bf16.mxu0 %v6527_v63  ;;  %6070 = vmatprep.subr.bf16.mxu1 %v6527_v63 }
 0x2ab   :  { %6049 = vmatpush3.bf16.msra.mxu0 %v6490_v36  ;;  %6071 = vmatpush3.bf16.msra.mxu1 %v6491_v44 }
 0x2ac   :  { %6050 = vmatprep.subr.bf16.mxu0 %v6527_v63  ;;  %6072 = vmatprep.subr.bf16.mxu1 %v6527_v63 }
 0x2af   :  { %6051 = vmatpush3.bf16.msra.mxu0 %v6492_v42  ;;  %6073 = vmatpush3.bf16.msra.mxu1 %v6493_v56  ;;  %v6515_v42 = vld [vmem:[%s8249_s5 + $0x8] sm:$0xff]  }
 0x2b0   :  { %6052 = vmatprep.subr.bf16.mxu0 %v6527_v63  ;;  %6074 = vmatprep.subr.bf16.mxu1 %v6527_v63 }
 0x2b3   :  { %6053 = vmatpush3.bf16.msra.mxu0 %v6494_v45  ;;  %6075 = vmatpush3.bf16.msra.mxu1 %v6495_v3 }
 0x2b4   :  { %6054 = vmatprep.subr.bf16.mxu0 %v6527_v63  ;;  %6076 = vmatprep.subr.bf16.mxu1 %v6527_v63 }
 0x2b7   :  { %6055 = vmatpush3.bf16.msra.mxu0 %v6496_v46  ;;  %6077 = vmatpush3.bf16.msra.mxu1 %v6497_v28 }
 0x2b8   :  { %6056 = vmatprep.subr.bf16.mxu0 %v6527_v63  ;;  %6078 = vmatprep.subr.bf16.mxu1 %v6527_v63 }
 0x2bb   :  { %6057 = vmatpush3.bf16.msra.mxu0 %v6498_v40  ;;  %6079 = vmatpush3.bf16.msra.mxu1 %v6499_v18  ;;  %v6516_v40 = vld [vmem:[%s8249_s5] sm:$0xff]  }
 0x2bc   :  { %6058 = vmatprep.subr.bf16.mxu0 %v6527_v63  ;;  %6104 = vmatprep.subr.bf16.mxu1 %v6527_v63 }
 0x2be   :  { %v2879_v53 = vpop.f32.mrf.mxu1  ;;  %6081 = vmatmul.mubr.bf16.vlgmr.msra.gmra.mxu1 %v4063_v51  ;;  %v6520_v51 = vld [vmem:[%s8250_s7 + $0x20] sm:$0xff]  }
 0x2bf   :  { %6059 = vmatpush3.bf16.msra.mxu0 %v6500_v37  ;;  %6120 = vmatprep.mubr.msk.bf16.mxu1 %vm6528_vm1, %v6527_v63  ;;  %v6518_v37 = vld [vmem:[%s8250_s7 + $0x30] sm:$0xff]  }
 0x2c0   :  { %v5842_v14 = vpop.f32.mrf.mxu1  ;;  %6084 = vmatprep.subr.bf16.mxu0 %v6527_v63  ;;  %6105 = vmatpush3.bf16.msra.mxu1 %v6509_v29  ;;  %v6523_v29 = vld [vmem:[%s8250_s7 + $0x8] sm:$0xff]  }
 0x2c1   :  { %6106 = vmatprep.subr.bf16.mxu1 %v6527_v63 }
 0x2c2   :  { %v2772_v12 = vpop.f32.mrf.mxu0  ;;  %v2882_v62 = vpop.f32.mrf.mxu1  ;;  %6061 = vmatmul.mubr.bf16.vlgmr.msra.gmra.mxu0 %v3956_v48  ;;  %v6522_v48 = vld [vmem:[%s8250_s7 + $0x10] sm:$0xff]  }
 0x2c3   :  { %v2778_v21 = vadd.f32 %v2772_v12, %v2671_v15  ;;  %6085 = vmatpush3.bf16.msra.mxu0 %v6501_v50  ;;  %6100 = vmatprep.mubr.msk.bf16.mxu0 %vm6528_vm1, %v6527_v63  ;;  %v6514_v15 = vld [vmem:[%s8249_s5 + $0x10] sm:$0xff]  }
 0x2c4   :  { %v5822_v2 = vpop.f32.mrf.mxu0  ;;  %v5843_v59 = vpop.f32.mrf.mxu1  ;;  %6086 = vmatprep.subr.bf16.mxu0 %v6527_v63  ;;  %6107 = vmatpush3.bf16.msra.mxu1 %v6510_v26  ;;  %v6524_v26 = vld [vmem:[%s8250_s7] sm:$0xff]  }
 0x2c5   :  { %v2885_v22 = vadd.f32 %v2879_v53, %v2778_v21  ;;  %6108 = vmatprep.subr.bf16.mxu1 %v6527_v63  ;;  %v6521_v53 = vld [vmem:[%s8250_s7 + $0x18] sm:$0xff]  }
 0x2c6   :  { %v2775_v30 = vpop.f32.mrf.mxu0 }
 0x2c7   :  { %6087 = vmatpush3.bf16.msra.mxu0 %v6502_v55 }
 0x2c8   :  { %v5823_v38 = vpop.f32.mrf.mxu0  ;;  %6088 = vmatprep.subr.bf16.mxu0 %v6527_v63  ;;  %6109 = vmatpush3.bf16.msra.mxu1 %v6511_v39  ;;  %v5343_v39 = vld [vmem:[%s8252_s6] ss:$0 sm:$0xff] }
 0x2c9   :  { %6110 = vmatprep.subr.bf16.mxu1 %v6527_v63 }
 0x2cb   :  { %6089 = vmatpush3.bf16.msra.mxu0 %v6503_v34 }
 0x2cc   :  { %6090 = vmatprep.subr.bf16.mxu0 %v6527_v63  ;;  %6111 = vmatpush3.bf16.msra.mxu1 %v6512_v16 }
 0x2cd   :  { %6112 = vmatprep.subr.bf16.mxu1 %v6527_v63 }
 0x2cf   :  { %6091 = vmatpush3.bf16.msra.mxu0 %v6504_v41 }
 0x2d0   :  { %6092 = vmatprep.subr.bf16.mxu0 %v6527_v63  ;;  %6113 = vmatpush3.bf16.msra.mxu1 %v6513_v27 }
 0x2d1   :  { %6114 = vmatprep.subr.bf16.mxu1 %v6527_v63 }
 0x2d3   :  { %6093 = vmatpush3.bf16.msra.mxu0 %v6505_v61 }
 0x2d4   :  { %6094 = vmatprep.subr.bf16.mxu0 %v6527_v63  ;;  %6115 = vmatpush3.bf16.msra.mxu1 %v6514_v15 }
 0x2d5   :  { %6116 = vmatprep.subr.bf16.mxu1 %v6527_v63 }
 0x2d7   :  { %6095 = vmatpush3.bf16.msra.mxu0 %v6506_v58 }
 0x2d8   :  { %6096 = vmatprep.subr.bf16.mxu0 %v6527_v63  ;;  %6117 = vmatpush3.bf16.msra.mxu1 %v6515_v42 }
 0x2d9   :  { %6118 = vmatprep.subr.bf16.mxu1 %v6527_v63 }
 0x2db   :  { %6097 = vmatpush3.bf16.msra.mxu0 %v6507_v0 }
 0x2dc   :  { %6098 = vmatprep.subr.bf16.mxu0 %v6527_v63  ;;  %6119 = vmatpush3.bf16.msra.mxu1 %v6516_v40 }
 0x2de   :  { %v3093_v8 = vpop.f32.mrf.mxu1 }
 0x2df   :  { %6099 = vmatpush3.bf16.msra.mxu0 %v6508_v7 }
 0x2e0   :  { %v5882_v11 = vpop.f32.mrf.mxu1  ;;  %6124 = vmatprep.subr.bf16.mxu0 %v6527_v63 }
 0x2e2   :  { %v2986_v13 = vpop.f32.mrf.mxu0  ;;  %v3096_v5 = vpop.f32.mrf.mxu1  ;;  %6101 = vmatmul.mubr.bf16.vlgmr.msra.gmra.mxu0 %v4170_v9 }
 0x2e3   :  { %v2992_v33 = vadd.f32 %v2986_v13, %v2885_v22  ;;  %6140 = vmatprep.mubr.msk.bf16.mxu0 %vm6528_vm1, %v6527_v63  ;;  %6125 = vmatpush3.bf16.msra.mxu0 %v6517_v49 }
 0x2e4   :  { %v5862_v52 = vpop.f32.mrf.mxu0  ;;  %v5883_v32 = vpop.f32.mrf.mxu1  ;;  %6126 = vmatprep.subr.bf16.mxu0 %v6527_v63 }
 0x2e5   :  { %v3099_v54 = vadd.f32 %v3093_v8, %v2992_v33 }
 0x2e6   :  { %v2989_v17 = vpop.f32.mrf.mxu0 }
 0x2e7   :  { %6127 = vmatpush3.bf16.msra.mxu0 %v6518_v37 }
 0x2e8   :  { %v5863_v43 = vpop.f32.mrf.mxu0  ;;  %6128 = vmatprep.subr.bf16.mxu0 %v6527_v63 }
 0x2eb   :  { %6129 = vmatpush3.bf16.msra.mxu0 %v6519_v47 }
 0x2ec   :  { %6130 = vmatprep.subr.bf16.mxu0 %v6527_v63 }
 0x2ef   :  { %6131 = vmatpush3.bf16.msra.mxu0 %v6520_v51 }
 0x2f0   :  { %6132 = vmatprep.subr.bf16.mxu0 %v6527_v63 }
 0x2f3   :  { %6133 = vmatpush3.bf16.msra.mxu0 %v6521_v53 }
 0x2f4   :  { %6134 = vmatprep.subr.bf16.mxu0 %v6527_v63 }
 0x2f7   :  { %6135 = vmatpush3.bf16.msra.mxu0 %v6522_v48 }
 0x2f8   :  { %6136 = vmatprep.subr.bf16.mxu0 %v6527_v63 }
 0x2fb   :  { %6137 = vmatpush3.bf16.msra.mxu0 %v6523_v29 }
 0x2fc   :  { %6138 = vmatprep.subr.bf16.mxu0 %v6527_v63  ;;  %v5352_v63 = vld [vmem:[%s8253_s8] ss:$0 sm:$0xff] }
 0x2fe   :  { %v3307_v31 = vpop.f32.mrf.mxu1 }
 0x2ff   :  { %6139 = vmatpush3.bf16.msra.mxu0 %v6524_v26 }
 0x300   :  { %v5922_v1 = vpop.f32.mrf.mxu1 }
 0x302   :  { %v3200_v10 = vpop.f32.mrf.mxu0  ;;  %v3310_v20 = vpop.f32.mrf.mxu1 }
 0x303   :  { %v3206_v19 = vadd.f32 %v3200_v10, %v3099_v54  ;;  %v5342_v10 = vld [vmem:[%s8251_s4] ss:$0 sm:$0xff] }
 0x304   :  { %v5902_v23 = vpop.f32.mrf.mxu0  ;;  %v5923_v24 = vpop.f32.mrf.mxu1 }
 0x305   :  { %v3313_v57 = vadd.f32 %v3307_v31, %v3206_v19 }
 0x306   :  { %v3203_v60 = vpop.f32.mrf.mxu0 }
 0x308   :  { %v5903_v25 = vpop.f32.mrf.mxu0 }
 0x31e   :  { %v3521_v6 = vpop.f32.mrf.mxu1 }
 0x320   :  { %v5962_v36 = vpop.f32.mrf.mxu1 }
 0x322   :  { %v3414_v44 = vpop.f32.mrf.mxu0  ;;  %v3524_v4 = vpop.f32.mrf.mxu1 }
 0x323   :  { %v3420_v56 = vadd.f32 %v3414_v44, %v3313_v57 }
 0x324   :  { %v5942_v45 = vpop.f32.mrf.mxu0  ;;  %v5963_v3 = vpop.f32.mrf.mxu1 }
 0x325   :  { %v3527_v46 = vadd.f32 %v3521_v6, %v3420_v56 }
 0x326   :  { %v3417_v28 = vpop.f32.mrf.mxu0 }
 0x328   :  { %v5943_v18 = vpop.f32.mrf.mxu0 }
 0x33e   :  { %v3735_v50 = vpop.f32.mrf.mxu1 }
 0x340   :  { %v6002_v14 = vpop.f32.mrf.mxu1 }
 0x342   :  { %v3628_v12 = vpop.f32.mrf.mxu0  ;;  %v3738_v62 = vpop.f32.mrf.mxu1 }
 0x343   :  { %v3634_v21 = vadd.f32 %v3628_v12, %v3527_v46 }
 0x344   :  { %v5982_v55 = vpop.f32.mrf.mxu0  ;;  %v6003_v2 = vpop.f32.mrf.mxu1 }
 0x345   :  { %v3741_v59 = vadd.f32 %v3735_v50, %v3634_v21 }
 0x346   :  { %v3631_v22 = vpop.f32.mrf.mxu0 }
 0x348   :  { %v5983_v30 = vpop.f32.mrf.mxu0 }
 0x35e   :  { %v3949_v34 = vpop.f32.mrf.mxu1 }
 0x360   :  { %v6042_v38 = vpop.f32.mrf.mxu1 }
 0x362   :  { %v3842_v41 = vpop.f32.mrf.mxu0  ;;  %v3952_v61 = vpop.f32.mrf.mxu1 }
 0x363   :  { %v3848_v54 = vadd.f32 %v3842_v41, %v3741_v59 }
 0x364   :  { %v6022_v58 = vpop.f32.mrf.mxu0  ;;  %v6043_v0 = vpop.f32.mrf.mxu1 }
 0x365   :  { %v3955_v17 = vadd.f32 %v3949_v34, %v3848_v54 }
 0x366   :  { %v3845_v7 = vpop.f32.mrf.mxu0 }
 0x368   :  { %v6023_v35 = vpop.f32.mrf.mxu0 }
 0x37e   :  { %v4163_v8 = vpop.f32.mrf.mxu1 }
 0x380   :  { %v6082_v9 = vpop.f32.mrf.mxu1 }
 0x382   :  { %v4056_v11 = vpop.f32.mrf.mxu0  ;;  %v4166_v13 = vpop.f32.mrf.mxu1 }
 0x383   :  { %v4062_v43 = vadd.f32 %v4056_v11, %v3955_v17 }
 0x384   :  { %v6062_v5 = vpop.f32.mrf.mxu0  ;;  %v6083_v33 = vpop.f32.mrf.mxu1 }
 0x385   :  { %v4169_v31 = vadd.f32 %v4163_v8, %v4062_v43 }
 0x386   :  { %v4059_v52 = vpop.f32.mrf.mxu0 }
 0x388   :  { %v6063_v32 = vpop.f32.mrf.mxu0 }
 0x3a2   :  { %v4270_v1 = vpop.f32.mrf.mxu0 }
 0x3a3   :  { %v4276_v20 = vadd.f32 %v4270_v1, %v4169_v31 }
 0x3a4   :  { %v6102_v19 = vpop.f32.mrf.mxu0 }
 0x3a5   :  { %v4284_v23 = vadd.f32 %v5342_v10, %v4276_v20 }
 0x3a6   :  { %v4273_v24 = vpop.f32.mrf.mxu0 }
 0x3a7   :  { %v4285_v57 = vmax.f32 %v4284_v23, 0.0 }
 0x3a8   :  { %v6103_v60 = vpop.f32.mrf.mxu0 }
 0x3a9   :  { %v4286_v25 = vpack.c.bf16 %v4285_v57, %v4285_v57 }
 0x3ab   :  { %6121 = vmatmul.mubr.bf16.vlgmr.msra.gmra.mxu1 %v4286_v25 }
 0x46b   :  { %v4392_v16 = vpop.f32.mrf.mxu1 }
 0x46c   :  { %v4393_v27 = vadd.f32 %v5343_v39, %v4392_v16 }
 0x46d   :  { %v6122_v15 = vpop.f32.mrf.mxu1 }
 0x46e   :  { %v4398_v6 = vmax.f32 %v4393_v27, 0.0 }
 0x46f   :  { %v4395_v36 = vpop.f32.mrf.mxu1 }
 0x470   :  { %v4399_v44 = vpack.c.bf16 %v4398_v6, %v4398_v6 }
 0x471   :  { %v6123_v4 = vpop.f32.mrf.mxu1 }
 0x472   :  { %6141 = vmatmul.mubr.bf16.vlgmr.msra.gmra.mxu0 %v4399_v44 }
 0x532   :  { %v4505_v42 = vpop.f32.mrf.mxu0 }
 0x533   :  { %v4506_v56 = vadd.f32 %v5352_v63, %v4505_v42 }
 0x534   :  { %v6142_v45 = vpop.f32.mrf.mxu0 }
 0x535   :  { %4511 = vst [vmem:[%s8254_s9] sm:$0xff] %v4506_v56 }
 0x536   :  { %v4508_v3 = vpop.f32.mrf.mxu0 }
 0x538   :  { %v6143_v46 = vpop.f32.mrf.mxu0 }

</bundles_post_ra>
